<compile_context>
chip_gen: v5e
topology: v5e:2x2
jax: 0.10.0
libtpu: 0.0.40
codegen_flags: <defaults>
</compile_context>

<pallas_src>
import jax
import jax.numpy as jnp
from jax.experimental import pallas as pl
from jax.experimental.pallas import tpu as pltpu

B = 2        # batch
T_IN = 8     # encoder (input) sequence length
T_TGT = 8    # decoder (target) sequence length
H = 32       # hidden dim (encoder == decoder, as asserted in the module)
OUT_DIM = 1  # decoder out_dim (forced to 1 by `encoder_inputs[:, -1, -out_dim:]`)


def _sigmoid(x):
    # Single EUP op instead of exp + add + divide.
    return 0.5 * jnp.tanh(0.5 * x) + 0.5


def _gates_to_hc(gates, c):
    # gates: (B, 4H) pre-activation, PyTorch gate order (i, f, g, o).
    i = _sigmoid(gates[:, 0 * H:1 * H])
    f = _sigmoid(gates[:, 1 * H:2 * H])
    g = jnp.tanh(gates[:, 2 * H:3 * H])
    o = _sigmoid(gates[:, 3 * H:4 * H])
    c_new = f * c + i * g
    h_new = o * jnp.tanh(c_new)
    return h_new, c_new


def seq2seq_kernel(x_ref, wih_e_ref, whh_e_ref, b_e_ref,
                   wih_d_ref, whh_d_ref, b_d_ref,
                   wout_ref, bout_ref,
                   y_ref, attn_ref):
    x = x_ref[...]                                   # (B, T_IN)
    wih_e = wih_e_ref[...]                           # (1, 4H)
    whh_e = whh_e_ref[...].astype(jnp.bfloat16)      # (H, 4H)  bf16 MXU operand
    b_e = b_e_ref[...]                               # (1, 4H)  (b_ih + b_hh)
    wih_d = wih_d_ref[...]                           # (1, 4H)  (OUT_DIM == 1)
    whh_d = whh_d_ref[...].astype(jnp.bfloat16)      # (H, 4H)
    b_d = b_d_ref[...]                               # (1, 4H)
    wout = wout_ref[...]                             # (1, 2H)  PyTorch Linear weight
    bout = bout_ref[...]                             # (1, OUT_DIM)

    # ---------------- Encoder LSTM (zero-initialized h, c) ----------------
    # in_dim == 1: input-gate contribution is a scalar * row broadcast; do it
    # once for all timesteps outside the recurrence (no MXU, no per-step bias).
    gx_enc = x[:, :, None] * wih_e[None, :, :] + b_e[None, :, :]   # (B, T_IN, 4H)

    h = jnp.zeros((B, H), jnp.float32)
    c = jnp.zeros((B, H), jnp.float32)
    enc_hs = []
    for t in range(T_IN):                            # static unroll (small T_IN)
        gates = gx_enc[:, t, :] + jnp.dot(
            h.astype(jnp.bfloat16), whh_e, preferred_element_type=jnp.float32)
        h, c = _gates_to_hc(gates, c)
        enc_hs.append(h)                             # keep in registers
    enc_out = jnp.stack(enc_hs, axis=1)              # (B, T_IN, H)

    # -------- Pre-decoder hoists (everything step-invariant leaves the loop) --------
    dec_in = x[:, T_IN - 1:T_IN]                     # encoder_inputs[:, -1, -out_dim:] -> (B, 1)
    h_d, c_d = h, c                                  # decoder (h, c) initialized from encoder
    w_h = wout[:, :H]                                # (1, H)   output weight on decoder hidden
    w_c = wout[:, H:]                                # (1, H)   output weight on attention context
    # Output-linear contribution of each encoder hidden, computed once:
    #   sum(context * w_c) == sum_t attn_w[t] * enc_proj[t]   (exact rewrite)
    enc_proj = jnp.sum(enc_out * w_c[None, :, :], axis=-1)         # (B, T_IN)

    # ---------------- Attention decoder loop (teacher_forcing_ratio = 0) ----------------
    preds = []
    attns = []
    for di in range(T_TGT):                          # static unroll (small T_TGT)
        # in_dim == 1: VPU broadcast multiply instead of a K=1 MXU matmul.
        gates = dec_in * wih_d + b_d + jnp.dot(
            h_d.astype(jnp.bfloat16), whh_d, preferred_element_type=jnp.float32)
        h_d, c_d = _gates_to_hc(gates, c_d)

        # dot-product attention of decoder hidden over encoder outputs
        scores = jnp.sum(enc_out * h_d[:, None, :], axis=-1)        # (B, T_IN)
        scores = scores - jnp.max(scores, axis=-1, keepdims=True)
        e = jnp.exp(scores)
        inv_denom = pl.reciprocal(jnp.sum(e, axis=-1, keepdims=True), approx=True)
        attn_w = e * inv_denom                                      # (B, T_IN)

        # OUT_DIM == 1 output Linear([h_d ; context]) with the context term
        # folded into a (B, T_IN)-sized multiply + reduce (no (B,T_IN,H) work).
        pred = (jnp.sum(h_d * w_h, axis=-1, keepdims=True)
                + jnp.sum(attn_w * enc_proj, axis=-1, keepdims=True)
                + bout)                                             # (B, 1)

        preds.append(pred)
        attns.append(attn_w)
        dec_in = pred                                               # feed back prediction

    # Single store per output ref (no per-step masked partial stores).
    y_ref[...] = jnp.concatenate(preds, axis=1)                     # (B, T_TGT)
    attn_ref[...] = jnp.stack(attns, axis=1)                        # (B, T_TGT, T_IN)


def seq2seq_forward(x, sampled_target, params):
    (wih_e, whh_e, b_e, wih_d, whh_d, b_d, wout, bout) = params
    vmem = lambda: pl.BlockSpec(memory_space=pltpu.MemorySpace.VMEM)
    pre_y, attn = pl.pallas_call(
        seq2seq_kernel,
        out_shape=(jax.ShapeDtypeStruct((B, T_TGT), jnp.float32),
                   jax.ShapeDtypeStruct((B, T_TGT, T_IN), jnp.float32)),
        in_specs=[vmem() for _ in range(9)],
        out_specs=(vmem(), vmem()),
    )(x, wih_e, whh_e, b_e, wih_d, whh_d, b_d, wout, bout)
    # pre_y = decoder_outputs.reshape(sampled_target.shape); out_dim == 1 so (B, T_TGT)
    pre_y = pre_y.reshape(sampled_target.shape)
    return pre_y, attn


def make_params(key):
    ks = jax.random.split(key, 8)
    s = 0.1
    wih_e = jax.random.normal(ks[0], (1, 4 * H), jnp.float32) * s        # encoder W_ih^T
    whh_e = jax.random.normal(ks[1], (H, 4 * H), jnp.float32) * s        # encoder W_hh^T
    b_e = jax.random.normal(ks[2], (1, 4 * H), jnp.float32) * s          # b_ih + b_hh
    wih_d = jax.random.normal(ks[3], (OUT_DIM, 4 * H), jnp.float32) * s  # decoder W_ih^T
    whh_d = jax.random.normal(ks[4], (H, 4 * H), jnp.float32) * s        # decoder W_hh^T
    b_d = jax.random.normal(ks[5], (1, 4 * H), jnp.float32) * s
    wout = jax.random.normal(ks[6], (OUT_DIM, 2 * H), jnp.float32) * s   # output linear W (PyTorch layout)
    bout = jax.random.normal(ks[7], (1, OUT_DIM), jnp.float32) * s
    return (wih_e, whh_e, b_e, wih_d, whh_d, b_d, wout, bout)


if __name__ == "__main__":
    key = jax.random.PRNGKey(0)
    k_x, k_t, k_p = jax.random.split(key, 3)
    x = jax.random.normal(k_x, (B, T_IN), jnp.float32)                # input series
    sampled_target = jax.random.normal(k_t, (B, T_TGT), jnp.float32)  # only its shape matters (tf ratio = 0)
    params = make_params(k_p)

    pre_y, attn = seq2seq_forward(x, sampled_target, params)
    jax.block_until_ready((pre_y, attn))

    assert pre_y.shape == sampled_target.shape, pre_y.shape
    assert attn.shape == (B, T_TGT, T_IN), attn.shape
    assert bool(jnp.all(jnp.isfinite(pre_y))) and bool(jnp.all(jnp.isfinite(attn)))
    # attention rows must be (approximately) softmax-normalized; tolerance is
    # loose because the normalization uses the EUP approximate reciprocal.
    assert bool(jnp.allclose(jnp.sum(attn, axis=-1), 1.0, atol=1e-2))
    print("KERNEL_OK")
</pallas_src>

<mosaic_0001>
module attributes {stable_mosaic.version = 11 : i64} {
  func.func @seq2seq_kernel(%arg0: memref<2x8xf32, #tpu.memory_space<vmem>>, %arg1: memref<1x128xf32, #tpu.memory_space<vmem>>, %arg2: memref<32x128xf32, #tpu.memory_space<vmem>>, %arg3: memref<1x128xf32, #tpu.memory_space<vmem>>, %arg4: memref<1x128xf32, #tpu.memory_space<vmem>>, %arg5: memref<32x128xf32, #tpu.memory_space<vmem>>, %arg6: memref<1x128xf32, #tpu.memory_space<vmem>>, %arg7: memref<1x64xf32, #tpu.memory_space<vmem>>, %arg8: memref<1x1xf32, #tpu.memory_space<vmem>>, %arg9: memref<2x8xf32, #tpu.memory_space<vmem>>, %arg10: memref<2x8x8xf32, #tpu.memory_space<vmem>>) attributes {dimension_semantics = [], scalar_prefetch = 0 : i64, scratch_operands = 0 : i64, tpu.core_type = #tpu.core_type<tc>} {
    %c0 = arith.constant 0 : index
    %c0_0 = arith.constant 0 : index
    %0 = vector.load %arg0[%c0, %c0_0] : memref<2x8xf32, #tpu.memory_space<vmem>>, vector<2x8xf32>
    %c0_1 = arith.constant 0 : index
    %c0_2 = arith.constant 0 : index
    %1 = vector.load %arg1[%c0_1, %c0_2] : memref<1x128xf32, #tpu.memory_space<vmem>>, vector<1x128xf32>
    %c0_3 = arith.constant 0 : index
    %c0_4 = arith.constant 0 : index
    %2 = vector.load %arg2[%c0_3, %c0_4] : memref<32x128xf32, #tpu.memory_space<vmem>>, vector<32x128xf32>
    %3 = arith.truncf %2 : vector<32x128xf32> to vector<32x128xbf16>
    %c0_5 = arith.constant 0 : index
    %c0_6 = arith.constant 0 : index
    %4 = vector.load %arg3[%c0_5, %c0_6] : memref<1x128xf32, #tpu.memory_space<vmem>>, vector<1x128xf32>
    %c0_7 = arith.constant 0 : index
    %c0_8 = arith.constant 0 : index
    %5 = vector.load %arg4[%c0_7, %c0_8] : memref<1x128xf32, #tpu.memory_space<vmem>>, vector<1x128xf32>
    %c0_9 = arith.constant 0 : index
    %c0_10 = arith.constant 0 : index
    %6 = vector.load %arg5[%c0_9, %c0_10] : memref<32x128xf32, #tpu.memory_space<vmem>>, vector<32x128xf32>
    %7 = arith.truncf %6 : vector<32x128xf32> to vector<32x128xbf16>
    %c0_11 = arith.constant 0 : index
    %c0_12 = arith.constant 0 : index
    %8 = vector.load %arg6[%c0_11, %c0_12] : memref<1x128xf32, #tpu.memory_space<vmem>>, vector<1x128xf32>
    %c0_13 = arith.constant 0 : index
    %c0_14 = arith.constant 0 : index
    %9 = vector.load %arg7[%c0_13, %c0_14] : memref<1x64xf32, #tpu.memory_space<vmem>>, vector<1x64xf32>
    %c0_15 = arith.constant 0 : index
    %c0_16 = arith.constant 0 : index
    %10 = vector.load %arg8[%c0_15, %c0_16] : memref<1x1xf32, #tpu.memory_space<vmem>>, vector<1x1xf32>
    %11 = vector.shape_cast %0 : vector<2x8xf32> to vector<2x8x1xf32>
    %12 = vector.shape_cast %1 : vector<1x128xf32> to vector<1x1x128xf32>
    %13 = vector.broadcast %11 : vector<2x8x1xf32> to vector<2x8x128xf32>
    %14 = vector.broadcast %12 : vector<1x1x128xf32> to vector<2x8x128xf32>
    %15 = arith.mulf %13, %14 : vector<2x8x128xf32>
    %16 = vector.shape_cast %4 : vector<1x128xf32> to vector<1x1x128xf32>
    %17 = vector.broadcast %16 : vector<1x1x128xf32> to vector<2x8x128xf32>
    %18 = arith.addf %15, %17 : vector<2x8x128xf32>
    %cst = arith.constant 0.000000e+00 : f32
    %19 = vector.broadcast %cst : f32 to vector<2x32xf32>
    %cst_17 = arith.constant 0.000000e+00 : f32
    %20 = vector.broadcast %cst_17 : f32 to vector<2x32xf32>
    %21 = vector.extract_strided_slice %18 {offsets = [0, 0, 0], sizes = [2, 1, 128], strides = [1, 1, 1]} : vector<2x8x128xf32> to vector<2x1x128xf32>
    %22 = vector.shape_cast %21 : vector<2x1x128xf32> to vector<2x128xf32>
    %23 = arith.truncf %19 : vector<2x32xf32> to vector<2x32xbf16>
    %cst_18 = arith.constant dense<0.000000e+00> : vector<2x128xf32>
    %24 = tpu.matmul %23, %3, %cst_18 {dimension_numbers = #tpu.dot_dimension_numbers<[1], [0], [0], [1], [0, 0, 1, 1], [], []>} : vector<2x32xbf16>, vector<32x128xbf16>, vector<2x128xf32> -> vector<2x128xf32>
    %25 = arith.addf %22, %24 : vector<2x128xf32>
    %26 = vector.extract_strided_slice %25 {offsets = [0, 0], sizes = [2, 32], strides = [1, 1]} : vector<2x128xf32> to vector<2x32xf32>
    %cst_19 = arith.constant 5.000000e-01 : f32
    %27 = vector.broadcast %cst_19 : f32 to vector<2x32xf32>
    %28 = arith.mulf %27, %26 : vector<2x32xf32>
    %29 = math.tanh %28 : vector<2x32xf32>
    %cst_20 = arith.constant 5.000000e-01 : f32
    %30 = vector.broadcast %cst_20 : f32 to vector<2x32xf32>
    %31 = arith.mulf %30, %29 : vector<2x32xf32>
    %cst_21 = arith.constant 5.000000e-01 : f32
    %32 = vector.broadcast %cst_21 : f32 to vector<2x32xf32>
    %33 = arith.addf %31, %32 : vector<2x32xf32>
    %34 = vector.extract_strided_slice %25 {offsets = [0, 32], sizes = [2, 32], strides = [1, 1]} : vector<2x128xf32> to vector<2x32xf32>
    %cst_22 = arith.constant 5.000000e-01 : f32
    %35 = vector.broadcast %cst_22 : f32 to vector<2x32xf32>
    %36 = arith.mulf %35, %34 : vector<2x32xf32>
    %37 = math.tanh %36 : vector<2x32xf32>
    %cst_23 = arith.constant 5.000000e-01 : f32
    %38 = vector.broadcast %cst_23 : f32 to vector<2x32xf32>
    %39 = arith.mulf %38, %37 : vector<2x32xf32>
    %cst_24 = arith.constant 5.000000e-01 : f32
    %40 = vector.broadcast %cst_24 : f32 to vector<2x32xf32>
    %41 = arith.addf %39, %40 : vector<2x32xf32>
    %42 = vector.extract_strided_slice %25 {offsets = [0, 64], sizes = [2, 32], strides = [1, 1]} : vector<2x128xf32> to vector<2x32xf32>
    %43 = math.tanh %42 : vector<2x32xf32>
    %44 = vector.extract_strided_slice %25 {offsets = [0, 96], sizes = [2, 32], strides = [1, 1]} : vector<2x128xf32> to vector<2x32xf32>
    %cst_25 = arith.constant 5.000000e-01 : f32
    %45 = vector.broadcast %cst_25 : f32 to vector<2x32xf32>
    %46 = arith.mulf %45, %44 : vector<2x32xf32>
    %47 = math.tanh %46 : vector<2x32xf32>
    %cst_26 = arith.constant 5.000000e-01 : f32
    %48 = vector.broadcast %cst_26 : f32 to vector<2x32xf32>
    %49 = arith.mulf %48, %47 : vector<2x32xf32>
    %cst_27 = arith.constant 5.000000e-01 : f32
    %50 = vector.broadcast %cst_27 : f32 to vector<2x32xf32>
    %51 = arith.addf %49, %50 : vector<2x32xf32>
    %52 = arith.mulf %41, %20 : vector<2x32xf32>
    %53 = arith.mulf %33, %43 : vector<2x32xf32>
    %54 = arith.addf %52, %53 : vector<2x32xf32>
    %55 = math.tanh %54 : vector<2x32xf32>
    %56 = arith.mulf %51, %55 : vector<2x32xf32>
    %57 = vector.extract_strided_slice %18 {offsets = [0, 1, 0], sizes = [2, 1, 128], strides = [1, 1, 1]} : vector<2x8x128xf32> to vector<2x1x128xf32>
    %58 = vector.shape_cast %57 : vector<2x1x128xf32> to vector<2x128xf32>
    %59 = arith.truncf %56 : vector<2x32xf32> to vector<2x32xbf16>
    %cst_28 = arith.constant dense<0.000000e+00> : vector<2x128xf32>
    %60 = tpu.matmul %59, %3, %cst_28 {dimension_numbers = #tpu.dot_dimension_numbers<[1], [0], [0], [1], [0, 0, 1, 1], [], []>} : vector<2x32xbf16>, vector<32x128xbf16>, vector<2x128xf32> -> vector<2x128xf32>
    %61 = arith.addf %58, %60 : vector<2x128xf32>
    %62 = vector.extract_strided_slice %61 {offsets = [0, 0], sizes = [2, 32], strides = [1, 1]} : vector<2x128xf32> to vector<2x32xf32>
    %cst_29 = arith.constant 5.000000e-01 : f32
    %63 = vector.broadcast %cst_29 : f32 to vector<2x32xf32>
    %64 = arith.mulf %63, %62 : vector<2x32xf32>
    %65 = math.tanh %64 : vector<2x32xf32>
    %cst_30 = arith.constant 5.000000e-01 : f32
    %66 = vector.broadcast %cst_30 : f32 to vector<2x32xf32>
    %67 = arith.mulf %66, %65 : vector<2x32xf32>
    %cst_31 = arith.constant 5.000000e-01 : f32
    %68 = vector.broadcast %cst_31 : f32 to vector<2x32xf32>
    %69 = arith.addf %67, %68 : vector<2x32xf32>
    %70 = vector.extract_strided_slice %61 {offsets = [0, 32], sizes = [2, 32], strides = [1, 1]} : vector<2x128xf32> to vector<2x32xf32>
    %cst_32 = arith.constant 5.000000e-01 : f32
    %71 = vector.broadcast %cst_32 : f32 to vector<2x32xf32>
    %72 = arith.mulf %71, %70 : vector<2x32xf32>
    %73 = math.tanh %72 : vector<2x32xf32>
    %cst_33 = arith.constant 5.000000e-01 : f32
    %74 = vector.broadcast %cst_33 : f32 to vector<2x32xf32>
    %75 = arith.mulf %74, %73 : vector<2x32xf32>
    %cst_34 = arith.constant 5.000000e-01 : f32
    %76 = vector.broadcast %cst_34 : f32 to vector<2x32xf32>
    %77 = arith.addf %75, %76 : vector<2x32xf32>
    %78 = vector.extract_strided_slice %61 {offsets = [0, 64], sizes = [2, 32], strides = [1, 1]} : vector<2x128xf32> to vector<2x32xf32>
    %79 = math.tanh %78 : vector<2x32xf32>
    %80 = vector.extract_strided_slice %61 {offsets = [0, 96], sizes = [2, 32], strides = [1, 1]} : vector<2x128xf32> to vector<2x32xf32>
    %cst_35 = arith.constant 5.000000e-01 : f32
    %81 = vector.broadcast %cst_35 : f32 to vector<2x32xf32>
    %82 = arith.mulf %81, %80 : vector<2x32xf32>
    %83 = math.tanh %82 : vector<2x32xf32>
    %cst_36 = arith.constant 5.000000e-01 : f32
    %84 = vector.broadcast %cst_36 : f32 to vector<2x32xf32>
    %85 = arith.mulf %84, %83 : vector<2x32xf32>
    %cst_37 = arith.constant 5.000000e-01 : f32
    %86 = vector.broadcast %cst_37 : f32 to vector<2x32xf32>
    %87 = arith.addf %85, %86 : vector<2x32xf32>
    %88 = arith.mulf %77, %54 : vector<2x32xf32>
    %89 = arith.mulf %69, %79 : vector<2x32xf32>
    %90 = arith.addf %88, %89 : vector<2x32xf32>
    %91 = math.tanh %90 : vector<2x32xf32>
    %92 = arith.mulf %87, %91 : vector<2x32xf32>
    %93 = vector.extract_strided_slice %18 {offsets = [0, 2, 0], sizes = [2, 1, 128], strides = [1, 1, 1]} : vector<2x8x128xf32> to vector<2x1x128xf32>
    %94 = vector.shape_cast %93 : vector<2x1x128xf32> to vector<2x128xf32>
    %95 = arith.truncf %92 : vector<2x32xf32> to vector<2x32xbf16>
    %cst_38 = arith.constant dense<0.000000e+00> : vector<2x128xf32>
    %96 = tpu.matmul %95, %3, %cst_38 {dimension_numbers = #tpu.dot_dimension_numbers<[1], [0], [0], [1], [0, 0, 1, 1], [], []>} : vector<2x32xbf16>, vector<32x128xbf16>, vector<2x128xf32> -> vector<2x128xf32>
    %97 = arith.addf %94, %96 : vector<2x128xf32>
    %98 = vector.extract_strided_slice %97 {offsets = [0, 0], sizes = [2, 32], strides = [1, 1]} : vector<2x128xf32> to vector<2x32xf32>
    %cst_39 = arith.constant 5.000000e-01 : f32
    %99 = vector.broadcast %cst_39 : f32 to vector<2x32xf32>
    %100 = arith.mulf %99, %98 : vector<2x32xf32>
    %101 = math.tanh %100 : vector<2x32xf32>
    %cst_40 = arith.constant 5.000000e-01 : f32
    %102 = vector.broadcast %cst_40 : f32 to vector<2x32xf32>
    %103 = arith.mulf %102, %101 : vector<2x32xf32>
    %cst_41 = arith.constant 5.000000e-01 : f32
    %104 = vector.broadcast %cst_41 : f32 to vector<2x32xf32>
    %105 = arith.addf %103, %104 : vector<2x32xf32>
    %106 = vector.extract_strided_slice %97 {offsets = [0, 32], sizes = [2, 32], strides = [1, 1]} : vector<2x128xf32> to vector<2x32xf32>
    %cst_42 = arith.constant 5.000000e-01 : f32
    %107 = vector.broadcast %cst_42 : f32 to vector<2x32xf32>
    %108 = arith.mulf %107, %106 : vector<2x32xf32>
    %109 = math.tanh %108 : vector<2x32xf32>
    %cst_43 = arith.constant 5.000000e-01 : f32
    %110 = vector.broadcast %cst_43 : f32 to vector<2x32xf32>
    %111 = arith.mulf %110, %109 : vector<2x32xf32>
    %cst_44 = arith.constant 5.000000e-01 : f32
    %112 = vector.broadcast %cst_44 : f32 to vector<2x32xf32>
    %113 = arith.addf %111, %112 : vector<2x32xf32>
    %114 = vector.extract_strided_slice %97 {offsets = [0, 64], sizes = [2, 32], strides = [1, 1]} : vector<2x128xf32> to vector<2x32xf32>
    %115 = math.tanh %114 : vector<2x32xf32>
    %116 = vector.extract_strided_slice %97 {offsets = [0, 96], sizes = [2, 32], strides = [1, 1]} : vector<2x128xf32> to vector<2x32xf32>
    %cst_45 = arith.constant 5.000000e-01 : f32
    %117 = vector.broadcast %cst_45 : f32 to vector<2x32xf32>
    %118 = arith.mulf %117, %116 : vector<2x32xf32>
    %119 = math.tanh %118 : vector<2x32xf32>
    %cst_46 = arith.constant 5.000000e-01 : f32
    %120 = vector.broadcast %cst_46 : f32 to vector<2x32xf32>
    %121 = arith.mulf %120, %119 : vector<2x32xf32>
    %cst_47 = arith.constant 5.000000e-01 : f32
    %122 = vector.broadcast %cst_47 : f32 to vector<2x32xf32>
    %123 = arith.addf %121, %122 : vector<2x32xf32>
    %124 = arith.mulf %113, %90 : vector<2x32xf32>
    %125 = arith.mulf %105, %115 : vector<2x32xf32>
    %126 = arith.addf %124, %125 : vector<2x32xf32>
    %127 = math.tanh %126 : vector<2x32xf32>
    %128 = arith.mulf %123, %127 : vector<2x32xf32>
    %129 = vector.extract_strided_slice %18 {offsets = [0, 3, 0], sizes = [2, 1, 128], strides = [1, 1, 1]} : vector<2x8x128xf32> to vector<2x1x128xf32>
    %130 = vector.shape_cast %129 : vector<2x1x128xf32> to vector<2x128xf32>
    %131 = arith.truncf %128 : vector<2x32xf32> to vector<2x32xbf16>
    %cst_48 = arith.constant dense<0.000000e+00> : vector<2x128xf32>
    %132 = tpu.matmul %131, %3, %cst_48 {dimension_numbers = #tpu.dot_dimension_numbers<[1], [0], [0], [1], [0, 0, 1, 1], [], []>} : vector<2x32xbf16>, vector<32x128xbf16>, vector<2x128xf32> -> vector<2x128xf32>
    %133 = arith.addf %130, %132 : vector<2x128xf32>
    %134 = vector.extract_strided_slice %133 {offsets = [0, 0], sizes = [2, 32], strides = [1, 1]} : vector<2x128xf32> to vector<2x32xf32>
    %cst_49 = arith.constant 5.000000e-01 : f32
    %135 = vector.broadcast %cst_49 : f32 to vector<2x32xf32>
    %136 = arith.mulf %135, %134 : vector<2x32xf32>
    %137 = math.tanh %136 : vector<2x32xf32>
    %cst_50 = arith.constant 5.000000e-01 : f32
    %138 = vector.broadcast %cst_50 : f32 to vector<2x32xf32>
    %139 = arith.mulf %138, %137 : vector<2x32xf32>
    %cst_51 = arith.constant 5.000000e-01 : f32
    %140 = vector.broadcast %cst_51 : f32 to vector<2x32xf32>
    %141 = arith.addf %139, %140 : vector<2x32xf32>
    %142 = vector.extract_strided_slice %133 {offsets = [0, 32], sizes = [2, 32], strides = [1, 1]} : vector<2x128xf32> to vector<2x32xf32>
    %cst_52 = arith.constant 5.000000e-01 : f32
    %143 = vector.broadcast %cst_52 : f32 to vector<2x32xf32>
    %144 = arith.mulf %143, %142 : vector<2x32xf32>
    %145 = math.tanh %144 : vector<2x32xf32>
    %cst_53 = arith.constant 5.000000e-01 : f32
    %146 = vector.broadcast %cst_53 : f32 to vector<2x32xf32>
    %147 = arith.mulf %146, %145 : vector<2x32xf32>
    %cst_54 = arith.constant 5.000000e-01 : f32
    %148 = vector.broadcast %cst_54 : f32 to vector<2x32xf32>
    %149 = arith.addf %147, %148 : vector<2x32xf32>
    %150 = vector.extract_strided_slice %133 {offsets = [0, 64], sizes = [2, 32], strides = [1, 1]} : vector<2x128xf32> to vector<2x32xf32>
    %151 = math.tanh %150 : vector<2x32xf32>
    %152 = vector.extract_strided_slice %133 {offsets = [0, 96], sizes = [2, 32], strides = [1, 1]} : vector<2x128xf32> to vector<2x32xf32>
    %cst_55 = arith.constant 5.000000e-01 : f32
    %153 = vector.broadcast %cst_55 : f32 to vector<2x32xf32>
    %154 = arith.mulf %153, %152 : vector<2x32xf32>
    %155 = math.tanh %154 : vector<2x32xf32>
    %cst_56 = arith.constant 5.000000e-01 : f32
    %156 = vector.broadcast %cst_56 : f32 to vector<2x32xf32>
    %157 = arith.mulf %156, %155 : vector<2x32xf32>
    %cst_57 = arith.constant 5.000000e-01 : f32
    %158 = vector.broadcast %cst_57 : f32 to vector<2x32xf32>
    %159 = arith.addf %157, %158 : vector<2x32xf32>
    %160 = arith.mulf %149, %126 : vector<2x32xf32>
    %161 = arith.mulf %141, %151 : vector<2x32xf32>
    %162 = arith.addf %160, %161 : vector<2x32xf32>
    %163 = math.tanh %162 : vector<2x32xf32>
    %164 = arith.mulf %159, %163 : vector<2x32xf32>
    %165 = vector.extract_strided_slice %18 {offsets = [0, 4, 0], sizes = [2, 1, 128], strides = [1, 1, 1]} : vector<2x8x128xf32> to vector<2x1x128xf32>
    %166 = vector.shape_cast %165 : vector<2x1x128xf32> to vector<2x128xf32>
    %167 = arith.truncf %164 : vector<2x32xf32> to vector<2x32xbf16>
    %cst_58 = arith.constant dense<0.000000e+00> : vector<2x128xf32>
    %168 = tpu.matmul %167, %3, %cst_58 {dimension_numbers = #tpu.dot_dimension_numbers<[1], [0], [0], [1], [0, 0, 1, 1], [], []>} : vector<2x32xbf16>, vector<32x128xbf16>, vector<2x128xf32> -> vector<2x128xf32>
    %169 = arith.addf %166, %168 : vector<2x128xf32>
    %170 = vector.extract_strided_slice %169 {offsets = [0, 0], sizes = [2, 32], strides = [1, 1]} : vector<2x128xf32> to vector<2x32xf32>
    %cst_59 = arith.constant 5.000000e-01 : f32
    %171 = vector.broadcast %cst_59 : f32 to vector<2x32xf32>
    %172 = arith.mulf %171, %170 : vector<2x32xf32>
    %173 = math.tanh %172 : vector<2x32xf32>
    %cst_60 = arith.constant 5.000000e-01 : f32
    %174 = vector.broadcast %cst_60 : f32 to vector<2x32xf32>
    %175 = arith.mulf %174, %173 : vector<2x32xf32>
    %cst_61 = arith.constant 5.000000e-01 : f32
    %176 = vector.broadcast %cst_61 : f32 to vector<2x32xf32>
    %177 = arith.addf %175, %176 : vector<2x32xf32>
    %178 = vector.extract_strided_slice %169 {offsets = [0, 32], sizes = [2, 32], strides = [1, 1]} : vector<2x128xf32> to vector<2x32xf32>
    %cst_62 = arith.constant 5.000000e-01 : f32
    %179 = vector.broadcast %cst_62 : f32 to vector<2x32xf32>
    %180 = arith.mulf %179, %178 : vector<2x32xf32>
    %181 = math.tanh %180 : vector<2x32xf32>
    %cst_63 = arith.constant 5.000000e-01 : f32
    %182 = vector.broadcast %cst_63 : f32 to vector<2x32xf32>
    %183 = arith.mulf %182, %181 : vector<2x32xf32>
    %cst_64 = arith.constant 5.000000e-01 : f32
    %184 = vector.broadcast %cst_64 : f32 to vector<2x32xf32>
    %185 = arith.addf %183, %184 : vector<2x32xf32>
    %186 = vector.extract_strided_slice %169 {offsets = [0, 64], sizes = [2, 32], strides = [1, 1]} : vector<2x128xf32> to vector<2x32xf32>
    %187 = math.tanh %186 : vector<2x32xf32>
    %188 = vector.extract_strided_slice %169 {offsets = [0, 96], sizes = [2, 32], strides = [1, 1]} : vector<2x128xf32> to vector<2x32xf32>
    %cst_65 = arith.constant 5.000000e-01 : f32
    %189 = vector.broadcast %cst_65 : f32 to vector<2x32xf32>
    %190 = arith.mulf %189, %188 : vector<2x32xf32>
    %191 = math.tanh %190 : vector<2x32xf32>
    %cst_66 = arith.constant 5.000000e-01 : f32
    %192 = vector.broadcast %cst_66 : f32 to vector<2x32xf32>
    %193 = arith.mulf %192, %191 : vector<2x32xf32>
    %cst_67 = arith.constant 5.000000e-01 : f32
    %194 = vector.broadcast %cst_67 : f32 to vector<2x32xf32>
    %195 = arith.addf %193, %194 : vector<2x32xf32>
    %196 = arith.mulf %185, %162 : vector<2x32xf32>
    %197 = arith.mulf %177, %187 : vector<2x32xf32>
    %198 = arith.addf %196, %197 : vector<2x32xf32>
    %199 = math.tanh %198 : vector<2x32xf32>
    %200 = arith.mulf %195, %199 : vector<2x32xf32>
    %201 = vector.extract_strided_slice %18 {offsets = [0, 5, 0], sizes = [2, 1, 128], strides = [1, 1, 1]} : vector<2x8x128xf32> to vector<2x1x128xf32>
    %202 = vector.shape_cast %201 : vector<2x1x128xf32> to vector<2x128xf32>
    %203 = arith.truncf %200 : vector<2x32xf32> to vector<2x32xbf16>
    %cst_68 = arith.constant dense<0.000000e+00> : vector<2x128xf32>
    %204 = tpu.matmul %203, %3, %cst_68 {dimension_numbers = #tpu.dot_dimension_numbers<[1], [0], [0], [1], [0, 0, 1, 1], [], []>} : vector<2x32xbf16>, vector<32x128xbf16>, vector<2x128xf32> -> vector<2x128xf32>
    %205 = arith.addf %202, %204 : vector<2x128xf32>
    %206 = vector.extract_strided_slice %205 {offsets = [0, 0], sizes = [2, 32], strides = [1, 1]} : vector<2x128xf32> to vector<2x32xf32>
    %cst_69 = arith.constant 5.000000e-01 : f32
    %207 = vector.broadcast %cst_69 : f32 to vector<2x32xf32>
    %208 = arith.mulf %207, %206 : vector<2x32xf32>
    %209 = math.tanh %208 : vector<2x32xf32>
    %cst_70 = arith.constant 5.000000e-01 : f32
    %210 = vector.broadcast %cst_70 : f32 to vector<2x32xf32>
    %211 = arith.mulf %210, %209 : vector<2x32xf32>
    %cst_71 = arith.constant 5.000000e-01 : f32
    %212 = vector.broadcast %cst_71 : f32 to vector<2x32xf32>
    %213 = arith.addf %211, %212 : vector<2x32xf32>
    %214 = vector.extract_strided_slice %205 {offsets = [0, 32], sizes = [2, 32], strides = [1, 1]} : vector<2x128xf32> to vector<2x32xf32>
    %cst_72 = arith.constant 5.000000e-01 : f32
    %215 = vector.broadcast %cst_72 : f32 to vector<2x32xf32>
    %216 = arith.mulf %215, %214 : vector<2x32xf32>
    %217 = math.tanh %216 : vector<2x32xf32>
    %cst_73 = arith.constant 5.000000e-01 : f32
    %218 = vector.broadcast %cst_73 : f32 to vector<2x32xf32>
    %219 = arith.mulf %218, %217 : vector<2x32xf32>
    %cst_74 = arith.constant 5.000000e-01 : f32
    %220 = vector.broadcast %cst_74 : f32 to vector<2x32xf32>
    %221 = arith.addf %219, %220 : vector<2x32xf32>
    %222 = vector.extract_strided_slice %205 {offsets = [0, 64], sizes = [2, 32], strides = [1, 1]} : vector<2x128xf32> to vector<2x32xf32>
    %223 = math.tanh %222 : vector<2x32xf32>
    %224 = vector.extract_strided_slice %205 {offsets = [0, 96], sizes = [2, 32], strides = [1, 1]} : vector<2x128xf32> to vector<2x32xf32>
    %cst_75 = arith.constant 5.000000e-01 : f32
    %225 = vector.broadcast %cst_75 : f32 to vector<2x32xf32>
    %226 = arith.mulf %225, %224 : vector<2x32xf32>
    %227 = math.tanh %226 : vector<2x32xf32>
    %cst_76 = arith.constant 5.000000e-01 : f32
    %228 = vector.broadcast %cst_76 : f32 to vector<2x32xf32>
    %229 = arith.mulf %228, %227 : vector<2x32xf32>
    %cst_77 = arith.constant 5.000000e-01 : f32
    %230 = vector.broadcast %cst_77 : f32 to vector<2x32xf32>
    %231 = arith.addf %229, %230 : vector<2x32xf32>
    %232 = arith.mulf %221, %198 : vector<2x32xf32>
    %233 = arith.mulf %213, %223 : vector<2x32xf32>
    %234 = arith.addf %232, %233 : vector<2x32xf32>
    %235 = math.tanh %234 : vector<2x32xf32>
    %236 = arith.mulf %231, %235 : vector<2x32xf32>
    %237 = vector.extract_strided_slice %18 {offsets = [0, 6, 0], sizes = [2, 1, 128], strides = [1, 1, 1]} : vector<2x8x128xf32> to vector<2x1x128xf32>
    %238 = vector.shape_cast %237 : vector<2x1x128xf32> to vector<2x128xf32>
    %239 = arith.truncf %236 : vector<2x32xf32> to vector<2x32xbf16>
    %cst_78 = arith.constant dense<0.000000e+00> : vector<2x128xf32>
    %240 = tpu.matmul %239, %3, %cst_78 {dimension_numbers = #tpu.dot_dimension_numbers<[1], [0], [0], [1], [0, 0, 1, 1], [], []>} : vector<2x32xbf16>, vector<32x128xbf16>, vector<2x128xf32> -> vector<2x128xf32>
    %241 = arith.addf %238, %240 : vector<2x128xf32>
    %242 = vector.extract_strided_slice %241 {offsets = [0, 0], sizes = [2, 32], strides = [1, 1]} : vector<2x128xf32> to vector<2x32xf32>
    %cst_79 = arith.constant 5.000000e-01 : f32
    %243 = vector.broadcast %cst_79 : f32 to vector<2x32xf32>
    %244 = arith.mulf %243, %242 : vector<2x32xf32>
    %245 = math.tanh %244 : vector<2x32xf32>
    %cst_80 = arith.constant 5.000000e-01 : f32
    %246 = vector.broadcast %cst_80 : f32 to vector<2x32xf32>
    %247 = arith.mulf %246, %245 : vector<2x32xf32>
    %cst_81 = arith.constant 5.000000e-01 : f32
    %248 = vector.broadcast %cst_81 : f32 to vector<2x32xf32>
    %249 = arith.addf %247, %248 : vector<2x32xf32>
    %250 = vector.extract_strided_slice %241 {offsets = [0, 32], sizes = [2, 32], strides = [1, 1]} : vector<2x128xf32> to vector<2x32xf32>
    %cst_82 = arith.constant 5.000000e-01 : f32
    %251 = vector.broadcast %cst_82 : f32 to vector<2x32xf32>
    %252 = arith.mulf %251, %250 : vector<2x32xf32>
    %253 = math.tanh %252 : vector<2x32xf32>
    %cst_83 = arith.constant 5.000000e-01 : f32
    %254 = vector.broadcast %cst_83 : f32 to vector<2x32xf32>
    %255 = arith.mulf %254, %253 : vector<2x32xf32>
    %cst_84 = arith.constant 5.000000e-01 : f32
    %256 = vector.broadcast %cst_84 : f32 to vector<2x32xf32>
    %257 = arith.addf %255, %256 : vector<2x32xf32>
    %258 = vector.extract_strided_slice %241 {offsets = [0, 64], sizes = [2, 32], strides = [1, 1]} : vector<2x128xf32> to vector<2x32xf32>
    %259 = math.tanh %258 : vector<2x32xf32>
    %260 = vector.extract_strided_slice %241 {offsets = [0, 96], sizes = [2, 32], strides = [1, 1]} : vector<2x128xf32> to vector<2x32xf32>
    %cst_85 = arith.constant 5.000000e-01 : f32
    %261 = vector.broadcast %cst_85 : f32 to vector<2x32xf32>
    %262 = arith.mulf %261, %260 : vector<2x32xf32>
    %263 = math.tanh %262 : vector<2x32xf32>
    %cst_86 = arith.constant 5.000000e-01 : f32
    %264 = vector.broadcast %cst_86 : f32 to vector<2x32xf32>
    %265 = arith.mulf %264, %263 : vector<2x32xf32>
    %cst_87 = arith.constant 5.000000e-01 : f32
    %266 = vector.broadcast %cst_87 : f32 to vector<2x32xf32>
    %267 = arith.addf %265, %266 : vector<2x32xf32>
    %268 = arith.mulf %257, %234 : vector<2x32xf32>
    %269 = arith.mulf %249, %259 : vector<2x32xf32>
    %270 = arith.addf %268, %269 : vector<2x32xf32>
    %271 = math.tanh %270 : vector<2x32xf32>
    %272 = arith.mulf %267, %271 : vector<2x32xf32>
    %273 = vector.extract_strided_slice %18 {offsets = [0, 7, 0], sizes = [2, 1, 128], strides = [1, 1, 1]} : vector<2x8x128xf32> to vector<2x1x128xf32>
    %274 = vector.shape_cast %273 : vector<2x1x128xf32> to vector<2x128xf32>
    %275 = arith.truncf %272 : vector<2x32xf32> to vector<2x32xbf16>
    %cst_88 = arith.constant dense<0.000000e+00> : vector<2x128xf32>
    %276 = tpu.matmul %275, %3, %cst_88 {dimension_numbers = #tpu.dot_dimension_numbers<[1], [0], [0], [1], [0, 0, 1, 1], [], []>} : vector<2x32xbf16>, vector<32x128xbf16>, vector<2x128xf32> -> vector<2x128xf32>
    %277 = arith.addf %274, %276 : vector<2x128xf32>
    %278 = vector.extract_strided_slice %277 {offsets = [0, 0], sizes = [2, 32], strides = [1, 1]} : vector<2x128xf32> to vector<2x32xf32>
    %cst_89 = arith.constant 5.000000e-01 : f32
    %279 = vector.broadcast %cst_89 : f32 to vector<2x32xf32>
    %280 = arith.mulf %279, %278 : vector<2x32xf32>
    %281 = math.tanh %280 : vector<2x32xf32>
    %cst_90 = arith.constant 5.000000e-01 : f32
    %282 = vector.broadcast %cst_90 : f32 to vector<2x32xf32>
    %283 = arith.mulf %282, %281 : vector<2x32xf32>
    %cst_91 = arith.constant 5.000000e-01 : f32
    %284 = vector.broadcast %cst_91 : f32 to vector<2x32xf32>
    %285 = arith.addf %283, %284 : vector<2x32xf32>
    %286 = vector.extract_strided_slice %277 {offsets = [0, 32], sizes = [2, 32], strides = [1, 1]} : vector<2x128xf32> to vector<2x32xf32>
    %cst_92 = arith.constant 5.000000e-01 : f32
    %287 = vector.broadcast %cst_92 : f32 to vector<2x32xf32>
    %288 = arith.mulf %287, %286 : vector<2x32xf32>
    %289 = math.tanh %288 : vector<2x32xf32>
    %cst_93 = arith.constant 5.000000e-01 : f32
    %290 = vector.broadcast %cst_93 : f32 to vector<2x32xf32>
    %291 = arith.mulf %290, %289 : vector<2x32xf32>
    %cst_94 = arith.constant 5.000000e-01 : f32
    %292 = vector.broadcast %cst_94 : f32 to vector<2x32xf32>
    %293 = arith.addf %291, %292 : vector<2x32xf32>
    %294 = vector.extract_strided_slice %277 {offsets = [0, 64], sizes = [2, 32], strides = [1, 1]} : vector<2x128xf32> to vector<2x32xf32>
    %295 = math.tanh %294 : vector<2x32xf32>
    %296 = vector.extract_strided_slice %277 {offsets = [0, 96], sizes = [2, 32], strides = [1, 1]} : vector<2x128xf32> to vector<2x32xf32>
    %cst_95 = arith.constant 5.000000e-01 : f32
    %297 = vector.broadcast %cst_95 : f32 to vector<2x32xf32>
    %298 = arith.mulf %297, %296 : vector<2x32xf32>
    %299 = math.tanh %298 : vector<2x32xf32>
    %cst_96 = arith.constant 5.000000e-01 : f32
    %300 = vector.broadcast %cst_96 : f32 to vector<2x32xf32>
    %301 = arith.mulf %300, %299 : vector<2x32xf32>
    %cst_97 = arith.constant 5.000000e-01 : f32
    %302 = vector.broadcast %cst_97 : f32 to vector<2x32xf32>
    %303 = arith.addf %301, %302 : vector<2x32xf32>
    %304 = arith.mulf %293, %270 : vector<2x32xf32>
    %305 = arith.mulf %285, %295 : vector<2x32xf32>
    %306 = arith.addf %304, %305 : vector<2x32xf32>
    %307 = math.tanh %306 : vector<2x32xf32>
    %308 = arith.mulf %303, %307 : vector<2x32xf32>
    %309 = vector.shape_cast %56 : vector<2x32xf32> to vector<2x1x32xf32>
    %310 = vector.shape_cast %92 : vector<2x32xf32> to vector<2x1x32xf32>
    %311 = vector.shape_cast %128 : vector<2x32xf32> to vector<2x1x32xf32>
    %312 = vector.shape_cast %164 : vector<2x32xf32> to vector<2x1x32xf32>
    %313 = vector.shape_cast %200 : vector<2x32xf32> to vector<2x1x32xf32>
    %314 = vector.shape_cast %236 : vector<2x32xf32> to vector<2x1x32xf32>
    %315 = vector.shape_cast %272 : vector<2x32xf32> to vector<2x1x32xf32>
    %316 = vector.shape_cast %308 : vector<2x32xf32> to vector<2x1x32xf32>
    %317 = tpu.concatenate %309, %310, %311, %312, %313, %314, %315, %316 in 1 : vector<2x1x32xf32>, vector<2x1x32xf32>, vector<2x1x32xf32>, vector<2x1x32xf32>, vector<2x1x32xf32>, vector<2x1x32xf32>, vector<2x1x32xf32>, vector<2x1x32xf32> -> vector<2x8x32xf32>
    %318 = vector.extract_strided_slice %0 {offsets = [0, 7], sizes = [2, 1], strides = [1, 1]} : vector<2x8xf32> to vector<2x1xf32>
    %319 = vector.extract_strided_slice %9 {offsets = [0, 0], sizes = [1, 32], strides = [1, 1]} : vector<1x64xf32> to vector<1x32xf32>
    %320 = vector.extract_strided_slice %9 {offsets = [0, 32], sizes = [1, 32], strides = [1, 1]} : vector<1x64xf32> to vector<1x32xf32>
    %321 = vector.shape_cast %320 : vector<1x32xf32> to vector<1x1x32xf32>
    %322 = vector.broadcast %321 : vector<1x1x32xf32> to vector<2x8x32xf32>
    %323 = arith.mulf %317, %322 : vector<2x8x32xf32>
    %cst_98 = arith.constant dense<0.000000e+00> : vector<2x8xf32>
    %324 = vector.multi_reduction <add>, %323, %cst_98 [2] : vector<2x8x32xf32> to vector<2x8xf32>
    %325 = vector.broadcast %318 : vector<2x1xf32> to vector<2x128xf32>
    %326 = vector.broadcast %5 : vector<1x128xf32> to vector<2x128xf32>
    %327 = arith.mulf %325, %326 : vector<2x128xf32>
    %328 = vector.broadcast %8 : vector<1x128xf32> to vector<2x128xf32>
    %329 = arith.addf %327, %328 : vector<2x128xf32>
    %330 = arith.truncf %308 : vector<2x32xf32> to vector<2x32xbf16>
    %cst_99 = arith.constant dense<0.000000e+00> : vector<2x128xf32>
    %331 = tpu.matmul %330, %7, %cst_99 {dimension_numbers = #tpu.dot_dimension_numbers<[1], [0], [0], [1], [0, 0, 1, 1], [], []>} : vector<2x32xbf16>, vector<32x128xbf16>, vector<2x128xf32> -> vector<2x128xf32>
    %332 = arith.addf %329, %331 : vector<2x128xf32>
    %333 = vector.extract_strided_slice %332 {offsets = [0, 0], sizes = [2, 32], strides = [1, 1]} : vector<2x128xf32> to vector<2x32xf32>
    %cst_100 = arith.constant 5.000000e-01 : f32
    %334 = vector.broadcast %cst_100 : f32 to vector<2x32xf32>
    %335 = arith.mulf %334, %333 : vector<2x32xf32>
    %336 = math.tanh %335 : vector<2x32xf32>
    %cst_101 = arith.constant 5.000000e-01 : f32
    %337 = vector.broadcast %cst_101 : f32 to vector<2x32xf32>
    %338 = arith.mulf %337, %336 : vector<2x32xf32>
    %cst_102 = arith.constant 5.000000e-01 : f32
    %339 = vector.broadcast %cst_102 : f32 to vector<2x32xf32>
    %340 = arith.addf %338, %339 : vector<2x32xf32>
    %341 = vector.extract_strided_slice %332 {offsets = [0, 32], sizes = [2, 32], strides = [1, 1]} : vector<2x128xf32> to vector<2x32xf32>
    %cst_103 = arith.constant 5.000000e-01 : f32
    %342 = vector.broadcast %cst_103 : f32 to vector<2x32xf32>
    %343 = arith.mulf %342, %341 : vector<2x32xf32>
    %344 = math.tanh %343 : vector<2x32xf32>
    %cst_104 = arith.constant 5.000000e-01 : f32
    %345 = vector.broadcast %cst_104 : f32 to vector<2x32xf32>
    %346 = arith.mulf %345, %344 : vector<2x32xf32>
    %cst_105 = arith.constant 5.000000e-01 : f32
    %347 = vector.broadcast %cst_105 : f32 to vector<2x32xf32>
    %348 = arith.addf %346, %347 : vector<2x32xf32>
    %349 = vector.extract_strided_slice %332 {offsets = [0, 64], sizes = [2, 32], strides = [1, 1]} : vector<2x128xf32> to vector<2x32xf32>
    %350 = math.tanh %349 : vector<2x32xf32>
    %351 = vector.extract_strided_slice %332 {offsets = [0, 96], sizes = [2, 32], strides = [1, 1]} : vector<2x128xf32> to vector<2x32xf32>
    %cst_106 = arith.constant 5.000000e-01 : f32
    %352 = vector.broadcast %cst_106 : f32 to vector<2x32xf32>
    %353 = arith.mulf %352, %351 : vector<2x32xf32>
    %354 = math.tanh %353 : vector<2x32xf32>
    %cst_107 = arith.constant 5.000000e-01 : f32
    %355 = vector.broadcast %cst_107 : f32 to vector<2x32xf32>
    %356 = arith.mulf %355, %354 : vector<2x32xf32>
    %cst_108 = arith.constant 5.000000e-01 : f32
    %357 = vector.broadcast %cst_108 : f32 to vector<2x32xf32>
    %358 = arith.addf %356, %357 : vector<2x32xf32>
    %359 = arith.mulf %348, %306 : vector<2x32xf32>
    %360 = arith.mulf %340, %350 : vector<2x32xf32>
    %361 = arith.addf %359, %360 : vector<2x32xf32>
    %362 = math.tanh %361 : vector<2x32xf32>
    %363 = arith.mulf %358, %362 : vector<2x32xf32>
    %364 = vector.shape_cast %363 : vector<2x32xf32> to vector<2x1x32xf32>
    %365 = vector.broadcast %364 : vector<2x1x32xf32> to vector<2x8x32xf32>
    %366 = arith.mulf %317, %365 : vector<2x8x32xf32>
    %cst_109 = arith.constant dense<0.000000e+00> : vector<2x8xf32>
    %367 = vector.multi_reduction <add>, %366, %cst_109 [2] : vector<2x8x32xf32> to vector<2x8xf32>
    %cst_110 = arith.constant dense<0xFF800000> : vector<2xf32>
    %368 = vector.multi_reduction <maximumf>, %367, %cst_110 [1] : vector<2x8xf32> to vector<2xf32>
    %369 = vector.shape_cast %368 : vector<2xf32> to vector<2x1xf32>
    %370 = vector.broadcast %369 : vector<2x1xf32> to vector<2x8xf32>
    %371 = arith.subf %367, %370 : vector<2x8xf32>
    %372 = math.exp %371 : vector<2x8xf32>
    %cst_111 = arith.constant dense<0.000000e+00> : vector<2xf32>
    %373 = vector.multi_reduction <add>, %372, %cst_111 [1] : vector<2x8xf32> to vector<2xf32>
    %374 = vector.shape_cast %373 : vector<2xf32> to vector<2x1xf32>
    %375 = tpu.reciprocal %374 {approx = true} : vector<2x1xf32> -> vector<2x1xf32>
    %376 = vector.broadcast %375 : vector<2x1xf32> to vector<2x8xf32>
    %377 = arith.mulf %372, %376 : vector<2x8xf32>
    %378 = vector.broadcast %319 : vector<1x32xf32> to vector<2x32xf32>
    %379 = arith.mulf %363, %378 : vector<2x32xf32>
    %cst_112 = arith.constant dense<0.000000e+00> : vector<2xf32>
    %380 = vector.multi_reduction <add>, %379, %cst_112 [1] : vector<2x32xf32> to vector<2xf32>
    %381 = vector.shape_cast %380 : vector<2xf32> to vector<2x1xf32>
    %382 = arith.mulf %377, %324 : vector<2x8xf32>
    %cst_113 = arith.constant dense<0.000000e+00> : vector<2xf32>
    %383 = vector.multi_reduction <add>, %382, %cst_113 [1] : vector<2x8xf32> to vector<2xf32>
    %384 = vector.shape_cast %383 : vector<2xf32> to vector<2x1xf32>
    %385 = arith.addf %381, %384 : vector<2x1xf32>
    %386 = vector.broadcast %10 : vector<1x1xf32> to vector<2x1xf32>
    %387 = arith.addf %385, %386 : vector<2x1xf32>
    %388 = vector.broadcast %387 : vector<2x1xf32> to vector<2x128xf32>
    %389 = vector.broadcast %5 : vector<1x128xf32> to vector<2x128xf32>
    %390 = arith.mulf %388, %389 : vector<2x128xf32>
    %391 = vector.broadcast %8 : vector<1x128xf32> to vector<2x128xf32>
    %392 = arith.addf %390, %391 : vector<2x128xf32>
    %393 = arith.truncf %363 : vector<2x32xf32> to vector<2x32xbf16>
    %cst_114 = arith.constant dense<0.000000e+00> : vector<2x128xf32>
    %394 = tpu.matmul %393, %7, %cst_114 {dimension_numbers = #tpu.dot_dimension_numbers<[1], [0], [0], [1], [0, 0, 1, 1], [], []>} : vector<2x32xbf16>, vector<32x128xbf16>, vector<2x128xf32> -> vector<2x128xf32>
    %395 = arith.addf %392, %394 : vector<2x128xf32>
    %396 = vector.extract_strided_slice %395 {offsets = [0, 0], sizes = [2, 32], strides = [1, 1]} : vector<2x128xf32> to vector<2x32xf32>
    %cst_115 = arith.constant 5.000000e-01 : f32
    %397 = vector.broadcast %cst_115 : f32 to vector<2x32xf32>
    %398 = arith.mulf %397, %396 : vector<2x32xf32>
    %399 = math.tanh %398 : vector<2x32xf32>
    %cst_116 = arith.constant 5.000000e-01 : f32
    %400 = vector.broadcast %cst_116 : f32 to vector<2x32xf32>
    %401 = arith.mulf %400, %399 : vector<2x32xf32>
    %cst_117 = arith.constant 5.000000e-01 : f32
    %402 = vector.broadcast %cst_117 : f32 to vector<2x32xf32>
    %403 = arith.addf %401, %402 : vector<2x32xf32>
    %404 = vector.extract_strided_slice %395 {offsets = [0, 32], sizes = [2, 32], strides = [1, 1]} : vector<2x128xf32> to vector<2x32xf32>
    %cst_118 = arith.constant 5.000000e-01 : f32
    %405 = vector.broadcast %cst_118 : f32 to vector<2x32xf32>
    %406 = arith.mulf %405, %404 : vector<2x32xf32>
    %407 = math.tanh %406 : vector<2x32xf32>
    %cst_119 = arith.constant 5.000000e-01 : f32
    %408 = vector.broadcast %cst_119 : f32 to vector<2x32xf32>
    %409 = arith.mulf %408, %407 : vector<2x32xf32>
    %cst_120 = arith.constant 5.000000e-01 : f32
    %410 = vector.broadcast %cst_120 : f32 to vector<2x32xf32>
    %411 = arith.addf %409, %410 : vector<2x32xf32>
    %412 = vector.extract_strided_slice %395 {offsets = [0, 64], sizes = [2, 32], strides = [1, 1]} : vector<2x128xf32> to vector<2x32xf32>
    %413 = math.tanh %412 : vector<2x32xf32>
    %414 = vector.extract_strided_slice %395 {offsets = [0, 96], sizes = [2, 32], strides = [1, 1]} : vector<2x128xf32> to vector<2x32xf32>
    %cst_121 = arith.constant 5.000000e-01 : f32
    %415 = vector.broadcast %cst_121 : f32 to vector<2x32xf32>
    %416 = arith.mulf %415, %414 : vector<2x32xf32>
    %417 = math.tanh %416 : vector<2x32xf32>
    %cst_122 = arith.constant 5.000000e-01 : f32
    %418 = vector.broadcast %cst_122 : f32 to vector<2x32xf32>
    %419 = arith.mulf %418, %417 : vector<2x32xf32>
    %cst_123 = arith.constant 5.000000e-01 : f32
    %420 = vector.broadcast %cst_123 : f32 to vector<2x32xf32>
    %421 = arith.addf %419, %420 : vector<2x32xf32>
    %422 = arith.mulf %411, %361 : vector<2x32xf32>
    %423 = arith.mulf %403, %413 : vector<2x32xf32>
    %424 = arith.addf %422, %423 : vector<2x32xf32>
    %425 = math.tanh %424 : vector<2x32xf32>
    %426 = arith.mulf %421, %425 : vector<2x32xf32>
    %427 = vector.shape_cast %426 : vector<2x32xf32> to vector<2x1x32xf32>
    %428 = vector.broadcast %427 : vector<2x1x32xf32> to vector<2x8x32xf32>
    %429 = arith.mulf %317, %428 : vector<2x8x32xf32>
    %cst_124 = arith.constant dense<0.000000e+00> : vector<2x8xf32>
    %430 = vector.multi_reduction <add>, %429, %cst_124 [2] : vector<2x8x32xf32> to vector<2x8xf32>
    %cst_125 = arith.constant dense<0xFF800000> : vector<2xf32>
    %431 = vector.multi_reduction <maximumf>, %430, %cst_125 [1] : vector<2x8xf32> to vector<2xf32>
    %432 = vector.shape_cast %431 : vector<2xf32> to vector<2x1xf32>
    %433 = vector.broadcast %432 : vector<2x1xf32> to vector<2x8xf32>
    %434 = arith.subf %430, %433 : vector<2x8xf32>
    %435 = math.exp %434 : vector<2x8xf32>
    %cst_126 = arith.constant dense<0.000000e+00> : vector<2xf32>
    %436 = vector.multi_reduction <add>, %435, %cst_126 [1] : vector<2x8xf32> to vector<2xf32>
    %437 = vector.shape_cast %436 : vector<2xf32> to vector<2x1xf32>
    %438 = tpu.reciprocal %437 {approx = true} : vector<2x1xf32> -> vector<2x1xf32>
    %439 = vector.broadcast %438 : vector<2x1xf32> to vector<2x8xf32>
    %440 = arith.mulf %435, %439 : vector<2x8xf32>
    %441 = vector.broadcast %319 : vector<1x32xf32> to vector<2x32xf32>
    %442 = arith.mulf %426, %441 : vector<2x32xf32>
    %cst_127 = arith.constant dense<0.000000e+00> : vector<2xf32>
    %443 = vector.multi_reduction <add>, %442, %cst_127 [1] : vector<2x32xf32> to vector<2xf32>
    %444 = vector.shape_cast %443 : vector<2xf32> to vector<2x1xf32>
    %445 = arith.mulf %440, %324 : vector<2x8xf32>
    %cst_128 = arith.constant dense<0.000000e+00> : vector<2xf32>
    %446 = vector.multi_reduction <add>, %445, %cst_128 [1] : vector<2x8xf32> to vector<2xf32>
    %447 = vector.shape_cast %446 : vector<2xf32> to vector<2x1xf32>
    %448 = arith.addf %444, %447 : vector<2x1xf32>
    %449 = vector.broadcast %10 : vector<1x1xf32> to vector<2x1xf32>
    %450 = arith.addf %448, %449 : vector<2x1xf32>
    %451 = vector.broadcast %450 : vector<2x1xf32> to vector<2x128xf32>
    %452 = vector.broadcast %5 : vector<1x128xf32> to vector<2x128xf32>
    %453 = arith.mulf %451, %452 : vector<2x128xf32>
    %454 = vector.broadcast %8 : vector<1x128xf32> to vector<2x128xf32>
    %455 = arith.addf %453, %454 : vector<2x128xf32>
    %456 = arith.truncf %426 : vector<2x32xf32> to vector<2x32xbf16>
    %cst_129 = arith.constant dense<0.000000e+00> : vector<2x128xf32>
    %457 = tpu.matmul %456, %7, %cst_129 {dimension_numbers = #tpu.dot_dimension_numbers<[1], [0], [0], [1], [0, 0, 1, 1], [], []>} : vector<2x32xbf16>, vector<32x128xbf16>, vector<2x128xf32> -> vector<2x128xf32>
    %458 = arith.addf %455, %457 : vector<2x128xf32>
    %459 = vector.extract_strided_slice %458 {offsets = [0, 0], sizes = [2, 32], strides = [1, 1]} : vector<2x128xf32> to vector<2x32xf32>
    %cst_130 = arith.constant 5.000000e-01 : f32
    %460 = vector.broadcast %cst_130 : f32 to vector<2x32xf32>
    %461 = arith.mulf %460, %459 : vector<2x32xf32>
    %462 = math.tanh %461 : vector<2x32xf32>
    %cst_131 = arith.constant 5.000000e-01 : f32
    %463 = vector.broadcast %cst_131 : f32 to vector<2x32xf32>
    %464 = arith.mulf %463, %462 : vector<2x32xf32>
    %cst_132 = arith.constant 5.000000e-01 : f32
    %465 = vector.broadcast %cst_132 : f32 to vector<2x32xf32>
    %466 = arith.addf %464, %465 : vector<2x32xf32>
    %467 = vector.extract_strided_slice %458 {offsets = [0, 32], sizes = [2, 32], strides = [1, 1]} : vector<2x128xf32> to vector<2x32xf32>
    %cst_133 = arith.constant 5.000000e-01 : f32
    %468 = vector.broadcast %cst_133 : f32 to vector<2x32xf32>
    %469 = arith.mulf %468, %467 : vector<2x32xf32>
    %470 = math.tanh %469 : vector<2x32xf32>
    %cst_134 = arith.constant 5.000000e-01 : f32
    %471 = vector.broadcast %cst_134 : f32 to vector<2x32xf32>
    %472 = arith.mulf %471, %470 : vector<2x32xf32>
    %cst_135 = arith.constant 5.000000e-01 : f32
    %473 = vector.broadcast %cst_135 : f32 to vector<2x32xf32>
    %474 = arith.addf %472, %473 : vector<2x32xf32>
    %475 = vector.extract_strided_slice %458 {offsets = [0, 64], sizes = [2, 32], strides = [1, 1]} : vector<2x128xf32> to vector<2x32xf32>
    %476 = math.tanh %475 : vector<2x32xf32>
    %477 = vector.extract_strided_slice %458 {offsets = [0, 96], sizes = [2, 32], strides = [1, 1]} : vector<2x128xf32> to vector<2x32xf32>
    %cst_136 = arith.constant 5.000000e-01 : f32
    %478 = vector.broadcast %cst_136 : f32 to vector<2x32xf32>
    %479 = arith.mulf %478, %477 : vector<2x32xf32>
    %480 = math.tanh %479 : vector<2x32xf32>
    %cst_137 = arith.constant 5.000000e-01 : f32
    %481 = vector.broadcast %cst_137 : f32 to vector<2x32xf32>
    %482 = arith.mulf %481, %480 : vector<2x32xf32>
    %cst_138 = arith.constant 5.000000e-01 : f32
    %483 = vector.broadcast %cst_138 : f32 to vector<2x32xf32>
    %484 = arith.addf %482, %483 : vector<2x32xf32>
    %485 = arith.mulf %474, %424 : vector<2x32xf32>
    %486 = arith.mulf %466, %476 : vector<2x32xf32>
    %487 = arith.addf %485, %486 : vector<2x32xf32>
    %488 = math.tanh %487 : vector<2x32xf32>
    %489 = arith.mulf %484, %488 : vector<2x32xf32>
    %490 = vector.shape_cast %489 : vector<2x32xf32> to vector<2x1x32xf32>
    %491 = vector.broadcast %490 : vector<2x1x32xf32> to vector<2x8x32xf32>
    %492 = arith.mulf %317, %491 : vector<2x8x32xf32>
    %cst_139 = arith.constant dense<0.000000e+00> : vector<2x8xf32>
    %493 = vector.multi_reduction <add>, %492, %cst_139 [2] : vector<2x8x32xf32> to vector<2x8xf32>
    %cst_140 = arith.constant dense<0xFF800000> : vector<2xf32>
    %494 = vector.multi_reduction <maximumf>, %493, %cst_140 [1] : vector<2x8xf32> to vector<2xf32>
    %495 = vector.shape_cast %494 : vector<2xf32> to vector<2x1xf32>
    %496 = vector.broadcast %495 : vector<2x1xf32> to vector<2x8xf32>
    %497 = arith.subf %493, %496 : vector<2x8xf32>
    %498 = math.exp %497 : vector<2x8xf32>
    %cst_141 = arith.constant dense<0.000000e+00> : vector<2xf32>
    %499 = vector.multi_reduction <add>, %498, %cst_141 [1] : vector<2x8xf32> to vector<2xf32>
    %500 = vector.shape_cast %499 : vector<2xf32> to vector<2x1xf32>
    %501 = tpu.reciprocal %500 {approx = true} : vector<2x1xf32> -> vector<2x1xf32>
    %502 = vector.broadcast %501 : vector<2x1xf32> to vector<2x8xf32>
    %503 = arith.mulf %498, %502 : vector<2x8xf32>
    %504 = vector.broadcast %319 : vector<1x32xf32> to vector<2x32xf32>
    %505 = arith.mulf %489, %504 : vector<2x32xf32>
    %cst_142 = arith.constant dense<0.000000e+00> : vector<2xf32>
    %506 = vector.multi_reduction <add>, %505, %cst_142 [1] : vector<2x32xf32> to vector<2xf32>
    %507 = vector.shape_cast %506 : vector<2xf32> to vector<2x1xf32>
    %508 = arith.mulf %503, %324 : vector<2x8xf32>
    %cst_143 = arith.constant dense<0.000000e+00> : vector<2xf32>
    %509 = vector.multi_reduction <add>, %508, %cst_143 [1] : vector<2x8xf32> to vector<2xf32>
    %510 = vector.shape_cast %509 : vector<2xf32> to vector<2x1xf32>
    %511 = arith.addf %507, %510 : vector<2x1xf32>
    %512 = vector.broadcast %10 : vector<1x1xf32> to vector<2x1xf32>
    %513 = arith.addf %511, %512 : vector<2x1xf32>
    %514 = vector.broadcast %513 : vector<2x1xf32> to vector<2x128xf32>
    %515 = vector.broadcast %5 : vector<1x128xf32> to vector<2x128xf32>
    %516 = arith.mulf %514, %515 : vector<2x128xf32>
    %517 = vector.broadcast %8 : vector<1x128xf32> to vector<2x128xf32>
    %518 = arith.addf %516, %517 : vector<2x128xf32>
    %519 = arith.truncf %489 : vector<2x32xf32> to vector<2x32xbf16>
    %cst_144 = arith.constant dense<0.000000e+00> : vector<2x128xf32>
    %520 = tpu.matmul %519, %7, %cst_144 {dimension_numbers = #tpu.dot_dimension_numbers<[1], [0], [0], [1], [0, 0, 1, 1], [], []>} : vector<2x32xbf16>, vector<32x128xbf16>, vector<2x128xf32> -> vector<2x128xf32>
    %521 = arith.addf %518, %520 : vector<2x128xf32>
    %522 = vector.extract_strided_slice %521 {offsets = [0, 0], sizes = [2, 32], strides = [1, 1]} : vector<2x128xf32> to vector<2x32xf32>
    %cst_145 = arith.constant 5.000000e-01 : f32
    %523 = vector.broadcast %cst_145 : f32 to vector<2x32xf32>
    %524 = arith.mulf %523, %522 : vector<2x32xf32>
    %525 = math.tanh %524 : vector<2x32xf32>
    %cst_146 = arith.constant 5.000000e-01 : f32
    %526 = vector.broadcast %cst_146 : f32 to vector<2x32xf32>
    %527 = arith.mulf %526, %525 : vector<2x32xf32>
    %cst_147 = arith.constant 5.000000e-01 : f32
    %528 = vector.broadcast %cst_147 : f32 to vector<2x32xf32>
    %529 = arith.addf %527, %528 : vector<2x32xf32>
    %530 = vector.extract_strided_slice %521 {offsets = [0, 32], sizes = [2, 32], strides = [1, 1]} : vector<2x128xf32> to vector<2x32xf32>
    %cst_148 = arith.constant 5.000000e-01 : f32
    %531 = vector.broadcast %cst_148 : f32 to vector<2x32xf32>
    %532 = arith.mulf %531, %530 : vector<2x32xf32>
    %533 = math.tanh %532 : vector<2x32xf32>
    %cst_149 = arith.constant 5.000000e-01 : f32
    %534 = vector.broadcast %cst_149 : f32 to vector<2x32xf32>
    %535 = arith.mulf %534, %533 : vector<2x32xf32>
    %cst_150 = arith.constant 5.000000e-01 : f32
    %536 = vector.broadcast %cst_150 : f32 to vector<2x32xf32>
    %537 = arith.addf %535, %536 : vector<2x32xf32>
    %538 = vector.extract_strided_slice %521 {offsets = [0, 64], sizes = [2, 32], strides = [1, 1]} : vector<2x128xf32> to vector<2x32xf32>
    %539 = math.tanh %538 : vector<2x32xf32>
    %540 = vector.extract_strided_slice %521 {offsets = [0, 96], sizes = [2, 32], strides = [1, 1]} : vector<2x128xf32> to vector<2x32xf32>
    %cst_151 = arith.constant 5.000000e-01 : f32
    %541 = vector.broadcast %cst_151 : f32 to vector<2x32xf32>
    %542 = arith.mulf %541, %540 : vector<2x32xf32>
    %543 = math.tanh %542 : vector<2x32xf32>
    %cst_152 = arith.constant 5.000000e-01 : f32
    %544 = vector.broadcast %cst_152 : f32 to vector<2x32xf32>
    %545 = arith.mulf %544, %543 : vector<2x32xf32>
    %cst_153 = arith.constant 5.000000e-01 : f32
    %546 = vector.broadcast %cst_153 : f32 to vector<2x32xf32>
    %547 = arith.addf %545, %546 : vector<2x32xf32>
    %548 = arith.mulf %537, %487 : vector<2x32xf32>
    %549 = arith.mulf %529, %539 : vector<2x32xf32>
    %550 = arith.addf %548, %549 : vector<2x32xf32>
    %551 = math.tanh %550 : vector<2x32xf32>
    %552 = arith.mulf %547, %551 : vector<2x32xf32>
    %553 = vector.shape_cast %552 : vector<2x32xf32> to vector<2x1x32xf32>
    %554 = vector.broadcast %553 : vector<2x1x32xf32> to vector<2x8x32xf32>
    %555 = arith.mulf %317, %554 : vector<2x8x32xf32>
    %cst_154 = arith.constant dense<0.000000e+00> : vector<2x8xf32>
    %556 = vector.multi_reduction <add>, %555, %cst_154 [2] : vector<2x8x32xf32> to vector<2x8xf32>
    %cst_155 = arith.constant dense<0xFF800000> : vector<2xf32>
    %557 = vector.multi_reduction <maximumf>, %556, %cst_155 [1] : vector<2x8xf32> to vector<2xf32>
    %558 = vector.shape_cast %557 : vector<2xf32> to vector<2x1xf32>
    %559 = vector.broadcast %558 : vector<2x1xf32> to vector<2x8xf32>
    %560 = arith.subf %556, %559 : vector<2x8xf32>
    %561 = math.exp %560 : vector<2x8xf32>
    %cst_156 = arith.constant dense<0.000000e+00> : vector<2xf32>
    %562 = vector.multi_reduction <add>, %561, %cst_156 [1] : vector<2x8xf32> to vector<2xf32>
    %563 = vector.shape_cast %562 : vector<2xf32> to vector<2x1xf32>
    %564 = tpu.reciprocal %563 {approx = true} : vector<2x1xf32> -> vector<2x1xf32>
    %565 = vector.broadcast %564 : vector<2x1xf32> to vector<2x8xf32>
    %566 = arith.mulf %561, %565 : vector<2x8xf32>
    %567 = vector.broadcast %319 : vector<1x32xf32> to vector<2x32xf32>
    %568 = arith.mulf %552, %567 : vector<2x32xf32>
    %cst_157 = arith.constant dense<0.000000e+00> : vector<2xf32>
    %569 = vector.multi_reduction <add>, %568, %cst_157 [1] : vector<2x32xf32> to vector<2xf32>
    %570 = vector.shape_cast %569 : vector<2xf32> to vector<2x1xf32>
    %571 = arith.mulf %566, %324 : vector<2x8xf32>
    %cst_158 = arith.constant dense<0.000000e+00> : vector<2xf32>
    %572 = vector.multi_reduction <add>, %571, %cst_158 [1] : vector<2x8xf32> to vector<2xf32>
    %573 = vector.shape_cast %572 : vector<2xf32> to vector<2x1xf32>
    %574 = arith.addf %570, %573 : vector<2x1xf32>
    %575 = vector.broadcast %10 : vector<1x1xf32> to vector<2x1xf32>
    %576 = arith.addf %574, %575 : vector<2x1xf32>
    %577 = vector.broadcast %576 : vector<2x1xf32> to vector<2x128xf32>
    %578 = vector.broadcast %5 : vector<1x128xf32> to vector<2x128xf32>
    %579 = arith.mulf %577, %578 : vector<2x128xf32>
    %580 = vector.broadcast %8 : vector<1x128xf32> to vector<2x128xf32>
    %581 = arith.addf %579, %580 : vector<2x128xf32>
    %582 = arith.truncf %552 : vector<2x32xf32> to vector<2x32xbf16>
    %cst_159 = arith.constant dense<0.000000e+00> : vector<2x128xf32>
    %583 = tpu.matmul %582, %7, %cst_159 {dimension_numbers = #tpu.dot_dimension_numbers<[1], [0], [0], [1], [0, 0, 1, 1], [], []>} : vector<2x32xbf16>, vector<32x128xbf16>, vector<2x128xf32> -> vector<2x128xf32>
    %584 = arith.addf %581, %583 : vector<2x128xf32>
    %585 = vector.extract_strided_slice %584 {offsets = [0, 0], sizes = [2, 32], strides = [1, 1]} : vector<2x128xf32> to vector<2x32xf32>
    %cst_160 = arith.constant 5.000000e-01 : f32
    %586 = vector.broadcast %cst_160 : f32 to vector<2x32xf32>
    %587 = arith.mulf %586, %585 : vector<2x32xf32>
    %588 = math.tanh %587 : vector<2x32xf32>
    %cst_161 = arith.constant 5.000000e-01 : f32
    %589 = vector.broadcast %cst_161 : f32 to vector<2x32xf32>
    %590 = arith.mulf %589, %588 : vector<2x32xf32>
    %cst_162 = arith.constant 5.000000e-01 : f32
    %591 = vector.broadcast %cst_162 : f32 to vector<2x32xf32>
    %592 = arith.addf %590, %591 : vector<2x32xf32>
    %593 = vector.extract_strided_slice %584 {offsets = [0, 32], sizes = [2, 32], strides = [1, 1]} : vector<2x128xf32> to vector<2x32xf32>
    %cst_163 = arith.constant 5.000000e-01 : f32
    %594 = vector.broadcast %cst_163 : f32 to vector<2x32xf32>
    %595 = arith.mulf %594, %593 : vector<2x32xf32>
    %596 = math.tanh %595 : vector<2x32xf32>
    %cst_164 = arith.constant 5.000000e-01 : f32
    %597 = vector.broadcast %cst_164 : f32 to vector<2x32xf32>
    %598 = arith.mulf %597, %596 : vector<2x32xf32>
    %cst_165 = arith.constant 5.000000e-01 : f32
    %599 = vector.broadcast %cst_165 : f32 to vector<2x32xf32>
    %600 = arith.addf %598, %599 : vector<2x32xf32>
    %601 = vector.extract_strided_slice %584 {offsets = [0, 64], sizes = [2, 32], strides = [1, 1]} : vector<2x128xf32> to vector<2x32xf32>
    %602 = math.tanh %601 : vector<2x32xf32>
    %603 = vector.extract_strided_slice %584 {offsets = [0, 96], sizes = [2, 32], strides = [1, 1]} : vector<2x128xf32> to vector<2x32xf32>
    %cst_166 = arith.constant 5.000000e-01 : f32
    %604 = vector.broadcast %cst_166 : f32 to vector<2x32xf32>
    %605 = arith.mulf %604, %603 : vector<2x32xf32>
    %606 = math.tanh %605 : vector<2x32xf32>
    %cst_167 = arith.constant 5.000000e-01 : f32
    %607 = vector.broadcast %cst_167 : f32 to vector<2x32xf32>
    %608 = arith.mulf %607, %606 : vector<2x32xf32>
    %cst_168 = arith.constant 5.000000e-01 : f32
    %609 = vector.broadcast %cst_168 : f32 to vector<2x32xf32>
    %610 = arith.addf %608, %609 : vector<2x32xf32>
    %611 = arith.mulf %600, %550 : vector<2x32xf32>
    %612 = arith.mulf %592, %602 : vector<2x32xf32>
    %613 = arith.addf %611, %612 : vector<2x32xf32>
    %614 = math.tanh %613 : vector<2x32xf32>
    %615 = arith.mulf %610, %614 : vector<2x32xf32>
    %616 = vector.shape_cast %615 : vector<2x32xf32> to vector<2x1x32xf32>
    %617 = vector.broadcast %616 : vector<2x1x32xf32> to vector<2x8x32xf32>
    %618 = arith.mulf %317, %617 : vector<2x8x32xf32>
    %cst_169 = arith.constant dense<0.000000e+00> : vector<2x8xf32>
    %619 = vector.multi_reduction <add>, %618, %cst_169 [2] : vector<2x8x32xf32> to vector<2x8xf32>
    %cst_170 = arith.constant dense<0xFF800000> : vector<2xf32>
    %620 = vector.multi_reduction <maximumf>, %619, %cst_170 [1] : vector<2x8xf32> to vector<2xf32>
    %621 = vector.shape_cast %620 : vector<2xf32> to vector<2x1xf32>
    %622 = vector.broadcast %621 : vector<2x1xf32> to vector<2x8xf32>
    %623 = arith.subf %619, %622 : vector<2x8xf32>
    %624 = math.exp %623 : vector<2x8xf32>
    %cst_171 = arith.constant dense<0.000000e+00> : vector<2xf32>
    %625 = vector.multi_reduction <add>, %624, %cst_171 [1] : vector<2x8xf32> to vector<2xf32>
    %626 = vector.shape_cast %625 : vector<2xf32> to vector<2x1xf32>
    %627 = tpu.reciprocal %626 {approx = true} : vector<2x1xf32> -> vector<2x1xf32>
    %628 = vector.broadcast %627 : vector<2x1xf32> to vector<2x8xf32>
    %629 = arith.mulf %624, %628 : vector<2x8xf32>
    %630 = vector.broadcast %319 : vector<1x32xf32> to vector<2x32xf32>
    %631 = arith.mulf %615, %630 : vector<2x32xf32>
    %cst_172 = arith.constant dense<0.000000e+00> : vector<2xf32>
    %632 = vector.multi_reduction <add>, %631, %cst_172 [1] : vector<2x32xf32> to vector<2xf32>
    %633 = vector.shape_cast %632 : vector<2xf32> to vector<2x1xf32>
    %634 = arith.mulf %629, %324 : vector<2x8xf32>
    %cst_173 = arith.constant dense<0.000000e+00> : vector<2xf32>
    %635 = vector.multi_reduction <add>, %634, %cst_173 [1] : vector<2x8xf32> to vector<2xf32>
    %636 = vector.shape_cast %635 : vector<2xf32> to vector<2x1xf32>
    %637 = arith.addf %633, %636 : vector<2x1xf32>
    %638 = vector.broadcast %10 : vector<1x1xf32> to vector<2x1xf32>
    %639 = arith.addf %637, %638 : vector<2x1xf32>
    %640 = vector.broadcast %639 : vector<2x1xf32> to vector<2x128xf32>
    %641 = vector.broadcast %5 : vector<1x128xf32> to vector<2x128xf32>
    %642 = arith.mulf %640, %641 : vector<2x128xf32>
    %643 = vector.broadcast %8 : vector<1x128xf32> to vector<2x128xf32>
    %644 = arith.addf %642, %643 : vector<2x128xf32>
    %645 = arith.truncf %615 : vector<2x32xf32> to vector<2x32xbf16>
    %cst_174 = arith.constant dense<0.000000e+00> : vector<2x128xf32>
    %646 = tpu.matmul %645, %7, %cst_174 {dimension_numbers = #tpu.dot_dimension_numbers<[1], [0], [0], [1], [0, 0, 1, 1], [], []>} : vector<2x32xbf16>, vector<32x128xbf16>, vector<2x128xf32> -> vector<2x128xf32>
    %647 = arith.addf %644, %646 : vector<2x128xf32>
    %648 = vector.extract_strided_slice %647 {offsets = [0, 0], sizes = [2, 32], strides = [1, 1]} : vector<2x128xf32> to vector<2x32xf32>
    %cst_175 = arith.constant 5.000000e-01 : f32
    %649 = vector.broadcast %cst_175 : f32 to vector<2x32xf32>
    %650 = arith.mulf %649, %648 : vector<2x32xf32>
    %651 = math.tanh %650 : vector<2x32xf32>
    %cst_176 = arith.constant 5.000000e-01 : f32
    %652 = vector.broadcast %cst_176 : f32 to vector<2x32xf32>
    %653 = arith.mulf %652, %651 : vector<2x32xf32>
    %cst_177 = arith.constant 5.000000e-01 : f32
    %654 = vector.broadcast %cst_177 : f32 to vector<2x32xf32>
    %655 = arith.addf %653, %654 : vector<2x32xf32>
    %656 = vector.extract_strided_slice %647 {offsets = [0, 32], sizes = [2, 32], strides = [1, 1]} : vector<2x128xf32> to vector<2x32xf32>
    %cst_178 = arith.constant 5.000000e-01 : f32
    %657 = vector.broadcast %cst_178 : f32 to vector<2x32xf32>
    %658 = arith.mulf %657, %656 : vector<2x32xf32>
    %659 = math.tanh %658 : vector<2x32xf32>
    %cst_179 = arith.constant 5.000000e-01 : f32
    %660 = vector.broadcast %cst_179 : f32 to vector<2x32xf32>
    %661 = arith.mulf %660, %659 : vector<2x32xf32>
    %cst_180 = arith.constant 5.000000e-01 : f32
    %662 = vector.broadcast %cst_180 : f32 to vector<2x32xf32>
    %663 = arith.addf %661, %662 : vector<2x32xf32>
    %664 = vector.extract_strided_slice %647 {offsets = [0, 64], sizes = [2, 32], strides = [1, 1]} : vector<2x128xf32> to vector<2x32xf32>
    %665 = math.tanh %664 : vector<2x32xf32>
    %666 = vector.extract_strided_slice %647 {offsets = [0, 96], sizes = [2, 32], strides = [1, 1]} : vector<2x128xf32> to vector<2x32xf32>
    %cst_181 = arith.constant 5.000000e-01 : f32
    %667 = vector.broadcast %cst_181 : f32 to vector<2x32xf32>
    %668 = arith.mulf %667, %666 : vector<2x32xf32>
    %669 = math.tanh %668 : vector<2x32xf32>
    %cst_182 = arith.constant 5.000000e-01 : f32
    %670 = vector.broadcast %cst_182 : f32 to vector<2x32xf32>
    %671 = arith.mulf %670, %669 : vector<2x32xf32>
    %cst_183 = arith.constant 5.000000e-01 : f32
    %672 = vector.broadcast %cst_183 : f32 to vector<2x32xf32>
    %673 = arith.addf %671, %672 : vector<2x32xf32>
    %674 = arith.mulf %663, %613 : vector<2x32xf32>
    %675 = arith.mulf %655, %665 : vector<2x32xf32>
    %676 = arith.addf %674, %675 : vector<2x32xf32>
    %677 = math.tanh %676 : vector<2x32xf32>
    %678 = arith.mulf %673, %677 : vector<2x32xf32>
    %679 = vector.shape_cast %678 : vector<2x32xf32> to vector<2x1x32xf32>
    %680 = vector.broadcast %679 : vector<2x1x32xf32> to vector<2x8x32xf32>
    %681 = arith.mulf %317, %680 : vector<2x8x32xf32>
    %cst_184 = arith.constant dense<0.000000e+00> : vector<2x8xf32>
    %682 = vector.multi_reduction <add>, %681, %cst_184 [2] : vector<2x8x32xf32> to vector<2x8xf32>
    %cst_185 = arith.constant dense<0xFF800000> : vector<2xf32>
    %683 = vector.multi_reduction <maximumf>, %682, %cst_185 [1] : vector<2x8xf32> to vector<2xf32>
    %684 = vector.shape_cast %683 : vector<2xf32> to vector<2x1xf32>
    %685 = vector.broadcast %684 : vector<2x1xf32> to vector<2x8xf32>
    %686 = arith.subf %682, %685 : vector<2x8xf32>
    %687 = math.exp %686 : vector<2x8xf32>
    %cst_186 = arith.constant dense<0.000000e+00> : vector<2xf32>
    %688 = vector.multi_reduction <add>, %687, %cst_186 [1] : vector<2x8xf32> to vector<2xf32>
    %689 = vector.shape_cast %688 : vector<2xf32> to vector<2x1xf32>
    %690 = tpu.reciprocal %689 {approx = true} : vector<2x1xf32> -> vector<2x1xf32>
    %691 = vector.broadcast %690 : vector<2x1xf32> to vector<2x8xf32>
    %692 = arith.mulf %687, %691 : vector<2x8xf32>
    %693 = vector.broadcast %319 : vector<1x32xf32> to vector<2x32xf32>
    %694 = arith.mulf %678, %693 : vector<2x32xf32>
    %cst_187 = arith.constant dense<0.000000e+00> : vector<2xf32>
    %695 = vector.multi_reduction <add>, %694, %cst_187 [1] : vector<2x32xf32> to vector<2xf32>
    %696 = vector.shape_cast %695 : vector<2xf32> to vector<2x1xf32>
    %697 = arith.mulf %692, %324 : vector<2x8xf32>
    %cst_188 = arith.constant dense<0.000000e+00> : vector<2xf32>
    %698 = vector.multi_reduction <add>, %697, %cst_188 [1] : vector<2x8xf32> to vector<2xf32>
    %699 = vector.shape_cast %698 : vector<2xf32> to vector<2x1xf32>
    %700 = arith.addf %696, %699 : vector<2x1xf32>
    %701 = vector.broadcast %10 : vector<1x1xf32> to vector<2x1xf32>
    %702 = arith.addf %700, %701 : vector<2x1xf32>
    %703 = vector.broadcast %702 : vector<2x1xf32> to vector<2x128xf32>
    %704 = vector.broadcast %5 : vector<1x128xf32> to vector<2x128xf32>
    %705 = arith.mulf %703, %704 : vector<2x128xf32>
    %706 = vector.broadcast %8 : vector<1x128xf32> to vector<2x128xf32>
    %707 = arith.addf %705, %706 : vector<2x128xf32>
    %708 = arith.truncf %678 : vector<2x32xf32> to vector<2x32xbf16>
    %cst_189 = arith.constant dense<0.000000e+00> : vector<2x128xf32>
    %709 = tpu.matmul %708, %7, %cst_189 {dimension_numbers = #tpu.dot_dimension_numbers<[1], [0], [0], [1], [0, 0, 1, 1], [], []>} : vector<2x32xbf16>, vector<32x128xbf16>, vector<2x128xf32> -> vector<2x128xf32>
    %710 = arith.addf %707, %709 : vector<2x128xf32>
    %711 = vector.extract_strided_slice %710 {offsets = [0, 0], sizes = [2, 32], strides = [1, 1]} : vector<2x128xf32> to vector<2x32xf32>
    %cst_190 = arith.constant 5.000000e-01 : f32
    %712 = vector.broadcast %cst_190 : f32 to vector<2x32xf32>
    %713 = arith.mulf %712, %711 : vector<2x32xf32>
    %714 = math.tanh %713 : vector<2x32xf32>
    %cst_191 = arith.constant 5.000000e-01 : f32
    %715 = vector.broadcast %cst_191 : f32 to vector<2x32xf32>
    %716 = arith.mulf %715, %714 : vector<2x32xf32>
    %cst_192 = arith.constant 5.000000e-01 : f32
    %717 = vector.broadcast %cst_192 : f32 to vector<2x32xf32>
    %718 = arith.addf %716, %717 : vector<2x32xf32>
    %719 = vector.extract_strided_slice %710 {offsets = [0, 32], sizes = [2, 32], strides = [1, 1]} : vector<2x128xf32> to vector<2x32xf32>
    %cst_193 = arith.constant 5.000000e-01 : f32
    %720 = vector.broadcast %cst_193 : f32 to vector<2x32xf32>
    %721 = arith.mulf %720, %719 : vector<2x32xf32>
    %722 = math.tanh %721 : vector<2x32xf32>
    %cst_194 = arith.constant 5.000000e-01 : f32
    %723 = vector.broadcast %cst_194 : f32 to vector<2x32xf32>
    %724 = arith.mulf %723, %722 : vector<2x32xf32>
    %cst_195 = arith.constant 5.000000e-01 : f32
    %725 = vector.broadcast %cst_195 : f32 to vector<2x32xf32>
    %726 = arith.addf %724, %725 : vector<2x32xf32>
    %727 = vector.extract_strided_slice %710 {offsets = [0, 64], sizes = [2, 32], strides = [1, 1]} : vector<2x128xf32> to vector<2x32xf32>
    %728 = math.tanh %727 : vector<2x32xf32>
    %729 = vector.extract_strided_slice %710 {offsets = [0, 96], sizes = [2, 32], strides = [1, 1]} : vector<2x128xf32> to vector<2x32xf32>
    %cst_196 = arith.constant 5.000000e-01 : f32
    %730 = vector.broadcast %cst_196 : f32 to vector<2x32xf32>
    %731 = arith.mulf %730, %729 : vector<2x32xf32>
    %732 = math.tanh %731 : vector<2x32xf32>
    %cst_197 = arith.constant 5.000000e-01 : f32
    %733 = vector.broadcast %cst_197 : f32 to vector<2x32xf32>
    %734 = arith.mulf %733, %732 : vector<2x32xf32>
    %cst_198 = arith.constant 5.000000e-01 : f32
    %735 = vector.broadcast %cst_198 : f32 to vector<2x32xf32>
    %736 = arith.addf %734, %735 : vector<2x32xf32>
    %737 = arith.mulf %726, %676 : vector<2x32xf32>
    %738 = arith.mulf %718, %728 : vector<2x32xf32>
    %739 = arith.addf %737, %738 : vector<2x32xf32>
    %740 = math.tanh %739 : vector<2x32xf32>
    %741 = arith.mulf %736, %740 : vector<2x32xf32>
    %742 = vector.shape_cast %741 : vector<2x32xf32> to vector<2x1x32xf32>
    %743 = vector.broadcast %742 : vector<2x1x32xf32> to vector<2x8x32xf32>
    %744 = arith.mulf %317, %743 : vector<2x8x32xf32>
    %cst_199 = arith.constant dense<0.000000e+00> : vector<2x8xf32>
    %745 = vector.multi_reduction <add>, %744, %cst_199 [2] : vector<2x8x32xf32> to vector<2x8xf32>
    %cst_200 = arith.constant dense<0xFF800000> : vector<2xf32>
    %746 = vector.multi_reduction <maximumf>, %745, %cst_200 [1] : vector<2x8xf32> to vector<2xf32>
    %747 = vector.shape_cast %746 : vector<2xf32> to vector<2x1xf32>
    %748 = vector.broadcast %747 : vector<2x1xf32> to vector<2x8xf32>
    %749 = arith.subf %745, %748 : vector<2x8xf32>
    %750 = math.exp %749 : vector<2x8xf32>
    %cst_201 = arith.constant dense<0.000000e+00> : vector<2xf32>
    %751 = vector.multi_reduction <add>, %750, %cst_201 [1] : vector<2x8xf32> to vector<2xf32>
    %752 = vector.shape_cast %751 : vector<2xf32> to vector<2x1xf32>
    %753 = tpu.reciprocal %752 {approx = true} : vector<2x1xf32> -> vector<2x1xf32>
    %754 = vector.broadcast %753 : vector<2x1xf32> to vector<2x8xf32>
    %755 = arith.mulf %750, %754 : vector<2x8xf32>
    %756 = vector.broadcast %319 : vector<1x32xf32> to vector<2x32xf32>
    %757 = arith.mulf %741, %756 : vector<2x32xf32>
    %cst_202 = arith.constant dense<0.000000e+00> : vector<2xf32>
    %758 = vector.multi_reduction <add>, %757, %cst_202 [1] : vector<2x32xf32> to vector<2xf32>
    %759 = vector.shape_cast %758 : vector<2xf32> to vector<2x1xf32>
    %760 = arith.mulf %755, %324 : vector<2x8xf32>
    %cst_203 = arith.constant dense<0.000000e+00> : vector<2xf32>
    %761 = vector.multi_reduction <add>, %760, %cst_203 [1] : vector<2x8xf32> to vector<2xf32>
    %762 = vector.shape_cast %761 : vector<2xf32> to vector<2x1xf32>
    %763 = arith.addf %759, %762 : vector<2x1xf32>
    %764 = vector.broadcast %10 : vector<1x1xf32> to vector<2x1xf32>
    %765 = arith.addf %763, %764 : vector<2x1xf32>
    %766 = vector.broadcast %765 : vector<2x1xf32> to vector<2x128xf32>
    %767 = vector.broadcast %5 : vector<1x128xf32> to vector<2x128xf32>
    %768 = arith.mulf %766, %767 : vector<2x128xf32>
    %769 = vector.broadcast %8 : vector<1x128xf32> to vector<2x128xf32>
    %770 = arith.addf %768, %769 : vector<2x128xf32>
    %771 = arith.truncf %741 : vector<2x32xf32> to vector<2x32xbf16>
    %cst_204 = arith.constant dense<0.000000e+00> : vector<2x128xf32>
    %772 = tpu.matmul %771, %7, %cst_204 {dimension_numbers = #tpu.dot_dimension_numbers<[1], [0], [0], [1], [0, 0, 1, 1], [], []>} : vector<2x32xbf16>, vector<32x128xbf16>, vector<2x128xf32> -> vector<2x128xf32>
    %773 = arith.addf %770, %772 : vector<2x128xf32>
    %774 = vector.extract_strided_slice %773 {offsets = [0, 0], sizes = [2, 32], strides = [1, 1]} : vector<2x128xf32> to vector<2x32xf32>
    %cst_205 = arith.constant 5.000000e-01 : f32
    %775 = vector.broadcast %cst_205 : f32 to vector<2x32xf32>
    %776 = arith.mulf %775, %774 : vector<2x32xf32>
    %777 = math.tanh %776 : vector<2x32xf32>
    %cst_206 = arith.constant 5.000000e-01 : f32
    %778 = vector.broadcast %cst_206 : f32 to vector<2x32xf32>
    %779 = arith.mulf %778, %777 : vector<2x32xf32>
    %cst_207 = arith.constant 5.000000e-01 : f32
    %780 = vector.broadcast %cst_207 : f32 to vector<2x32xf32>
    %781 = arith.addf %779, %780 : vector<2x32xf32>
    %782 = vector.extract_strided_slice %773 {offsets = [0, 32], sizes = [2, 32], strides = [1, 1]} : vector<2x128xf32> to vector<2x32xf32>
    %cst_208 = arith.constant 5.000000e-01 : f32
    %783 = vector.broadcast %cst_208 : f32 to vector<2x32xf32>
    %784 = arith.mulf %783, %782 : vector<2x32xf32>
    %785 = math.tanh %784 : vector<2x32xf32>
    %cst_209 = arith.constant 5.000000e-01 : f32
    %786 = vector.broadcast %cst_209 : f32 to vector<2x32xf32>
    %787 = arith.mulf %786, %785 : vector<2x32xf32>
    %cst_210 = arith.constant 5.000000e-01 : f32
    %788 = vector.broadcast %cst_210 : f32 to vector<2x32xf32>
    %789 = arith.addf %787, %788 : vector<2x32xf32>
    %790 = vector.extract_strided_slice %773 {offsets = [0, 64], sizes = [2, 32], strides = [1, 1]} : vector<2x128xf32> to vector<2x32xf32>
    %791 = math.tanh %790 : vector<2x32xf32>
    %792 = vector.extract_strided_slice %773 {offsets = [0, 96], sizes = [2, 32], strides = [1, 1]} : vector<2x128xf32> to vector<2x32xf32>
    %cst_211 = arith.constant 5.000000e-01 : f32
    %793 = vector.broadcast %cst_211 : f32 to vector<2x32xf32>
    %794 = arith.mulf %793, %792 : vector<2x32xf32>
    %795 = math.tanh %794 : vector<2x32xf32>
    %cst_212 = arith.constant 5.000000e-01 : f32
    %796 = vector.broadcast %cst_212 : f32 to vector<2x32xf32>
    %797 = arith.mulf %796, %795 : vector<2x32xf32>
    %cst_213 = arith.constant 5.000000e-01 : f32
    %798 = vector.broadcast %cst_213 : f32 to vector<2x32xf32>
    %799 = arith.addf %797, %798 : vector<2x32xf32>
    %800 = arith.mulf %789, %739 : vector<2x32xf32>
    %801 = arith.mulf %781, %791 : vector<2x32xf32>
    %802 = arith.addf %800, %801 : vector<2x32xf32>
    %803 = math.tanh %802 : vector<2x32xf32>
    %804 = arith.mulf %799, %803 : vector<2x32xf32>
    %805 = vector.shape_cast %804 : vector<2x32xf32> to vector<2x1x32xf32>
    %806 = vector.broadcast %805 : vector<2x1x32xf32> to vector<2x8x32xf32>
    %807 = arith.mulf %317, %806 : vector<2x8x32xf32>
    %cst_214 = arith.constant dense<0.000000e+00> : vector<2x8xf32>
    %808 = vector.multi_reduction <add>, %807, %cst_214 [2] : vector<2x8x32xf32> to vector<2x8xf32>
    %cst_215 = arith.constant dense<0xFF800000> : vector<2xf32>
    %809 = vector.multi_reduction <maximumf>, %808, %cst_215 [1] : vector<2x8xf32> to vector<2xf32>
    %810 = vector.shape_cast %809 : vector<2xf32> to vector<2x1xf32>
    %811 = vector.broadcast %810 : vector<2x1xf32> to vector<2x8xf32>
    %812 = arith.subf %808, %811 : vector<2x8xf32>
    %813 = math.exp %812 : vector<2x8xf32>
    %cst_216 = arith.constant dense<0.000000e+00> : vector<2xf32>
    %814 = vector.multi_reduction <add>, %813, %cst_216 [1] : vector<2x8xf32> to vector<2xf32>
    %815 = vector.shape_cast %814 : vector<2xf32> to vector<2x1xf32>
    %816 = tpu.reciprocal %815 {approx = true} : vector<2x1xf32> -> vector<2x1xf32>
    %817 = vector.broadcast %816 : vector<2x1xf32> to vector<2x8xf32>
    %818 = arith.mulf %813, %817 : vector<2x8xf32>
    %819 = vector.broadcast %319 : vector<1x32xf32> to vector<2x32xf32>
    %820 = arith.mulf %804, %819 : vector<2x32xf32>
    %cst_217 = arith.constant dense<0.000000e+00> : vector<2xf32>
    %821 = vector.multi_reduction <add>, %820, %cst_217 [1] : vector<2x32xf32> to vector<2xf32>
    %822 = vector.shape_cast %821 : vector<2xf32> to vector<2x1xf32>
    %823 = arith.mulf %818, %324 : vector<2x8xf32>
    %cst_218 = arith.constant dense<0.000000e+00> : vector<2xf32>
    %824 = vector.multi_reduction <add>, %823, %cst_218 [1] : vector<2x8xf32> to vector<2xf32>
    %825 = vector.shape_cast %824 : vector<2xf32> to vector<2x1xf32>
    %826 = arith.addf %822, %825 : vector<2x1xf32>
    %827 = vector.broadcast %10 : vector<1x1xf32> to vector<2x1xf32>
    %828 = arith.addf %826, %827 : vector<2x1xf32>
    %829 = tpu.concatenate %387, %450, %513, %576, %639, %702, %765, %828 in 1 : vector<2x1xf32>, vector<2x1xf32>, vector<2x1xf32>, vector<2x1xf32>, vector<2x1xf32>, vector<2x1xf32>, vector<2x1xf32>, vector<2x1xf32> -> vector<2x8xf32>
    %c0_219 = arith.constant 0 : index
    %c0_220 = arith.constant 0 : index
    %830 = vector.load %arg9[%c0_219, %c0_220] : memref<2x8xf32, #tpu.memory_space<vmem>>, vector<2x8xf32>
    tpu.vector_store %arg9[%c0_219, %c0_220], %829 {strides = array<i32>} : memref<2x8xf32, #tpu.memory_space<vmem>>, vector<2x8xf32>,
    %831 = vector.shape_cast %377 : vector<2x8xf32> to vector<2x1x8xf32>
    %832 = vector.shape_cast %440 : vector<2x8xf32> to vector<2x1x8xf32>
    %833 = vector.shape_cast %503 : vector<2x8xf32> to vector<2x1x8xf32>
    %834 = vector.shape_cast %566 : vector<2x8xf32> to vector<2x1x8xf32>
    %835 = vector.shape_cast %629 : vector<2x8xf32> to vector<2x1x8xf32>
    %836 = vector.shape_cast %692 : vector<2x8xf32> to vector<2x1x8xf32>
    %837 = vector.shape_cast %755 : vector<2x8xf32> to vector<2x1x8xf32>
    %838 = vector.shape_cast %818 : vector<2x8xf32> to vector<2x1x8xf32>
    %839 = tpu.concatenate %831, %832, %833, %834, %835, %836, %837, %838 in 1 : vector<2x1x8xf32>, vector<2x1x8xf32>, vector<2x1x8xf32>, vector<2x1x8xf32>, vector<2x1x8xf32>, vector<2x1x8xf32>, vector<2x1x8xf32>, vector<2x1x8xf32> -> vector<2x8x8xf32>
    %c0_221 = arith.constant 0 : index
    %c0_222 = arith.constant 0 : index
    %c0_223 = arith.constant 0 : index
    %840 = vector.load %arg10[%c0_221, %c0_222, %c0_223] : memref<2x8x8xf32, #tpu.memory_space<vmem>>, vector<2x8x8xf32>
    tpu.vector_store %arg10[%c0_221, %c0_222, %c0_223], %839 {strides = array<i32>} : memref<2x8x8xf32, #tpu.memory_space<vmem>>, vector<2x8x8xf32>,
    return
  }
}

</mosaic_0001>

<bundles_post_ra>
// kernel: tpu_custom_call.1
= control target key start
LH: loop header
LB: loop body
LE: loop exit
PB: predicated region body
PF: predicated region fallthrough
CT: control target
= control target key end

     0   :  { %s3253_s0 = inlined_call_operand.vmem [shape: f32[2,8], index: 0, kind: input, shape index: {}]   ;;  %s3254_s1 = inlined_call_operand.hbm [shape: f32[1,128], index: 1, kind: input, shape index: {}]   ;;  %s3255_s2 = inlined_call_operand.hbm [shape: f32[32,128], index: 2, kind: input, shape index: {}]   ;;  %s3256_s3 = inlined_call_operand.vmem [shape: f32[1,128], index: 3, kind: input, shape index: {}]   ;;  %s3257_s4 = inlined_call_operand.vmem [shape: f32[1,128], index: 4, kind: input, shape index: {}]   ;;  %s3258_s5 = inlined_call_operand.hbm [shape: f32[32,128], index: 5, kind: input, shape index: {}]   ;;  %s3259_s6 = inlined_call_operand.vmem [shape: f32[1,128], index: 6, kind: input, shape index: {}]   ;;  %s3260_s7 = inlined_call_operand.vmem [shape: f32[1,64], index: 7, kind: input, shape index: {}]   ;;  %s3261_s8 = inlined_call_operand.<no memory space> [shape: f32[1,1], index: 8, kind: input, shape index: {}]   ;;  %s3262_s9 = inlined_call_operand.hbm [shape: f32[2,8], index: 9, kind: output, shape index: {0}]   ;;  %s3263_s10 = inlined_call_operand.hbm [shape: f32[2,8,8], index: 10, kind: output, shape index: {1}]  }
   0x1   :  { %v16_v0 = vstv %s3261_s8 }
   0x2   :  { %17 = vst [vmem:[#allocation2] sm:$0x1] %v16_v0 }
   0x3   :  { %18 = vsyncpa [#allocation4], 0 }
   0x4   :  { %19 = vsyncpa [#allocation7], 0 }
   0x5   :  { %20 = vsyncpa [#allocation5], 0  ;;  %s39_s17 = sshll.u32 %s3255_s2, 4  ;;  %s40_s17 = int_to_ptr.hbm [resolvable:$true] %s39_s17 }
   0x6   :  { %21 = vsyncpa [#allocation11], 0  ;;  %s2550_s18 = smov [#allocation6]   ;;  %s29_s22 = sshll.u32 %s3254_s1, 4  ;;  %s30_s22 = int_to_ptr.hbm [resolvable:$true] %s29_s22 }
   0x7   :  { %s41_s19 = sshll.u32 %s2550_s18, 4  ;;  %s2551_s23 = smov 128   ;;  %s42_s19 = int_to_ptr.vmem [resolvable:$true] %s41_s19 }
   0x8   :  { %s2552_s24 = smov 8   ;;  %s2553_s8 = smov [#allocation3]  }
   0x9   :  { %47 = dma.hbm_to_vmem [thread:$0]  %s40_s17, 512, %s42_s19, [#allocation7], %s2551_s23, %s2551_s23, %s2552_s24  }
   0xa   :  { %s31_s25 = sshll.u32 %s2553_s8, 4  ;;  %s56_s27 = sshll.u32 %s3258_s5, 4  ;;  %s32_s25 = int_to_ptr.vmem [resolvable:$true] %s31_s25  ;;  %s57_s27 = int_to_ptr.hbm [resolvable:$true] %s56_s27 }
   0xb   :  { %34 = dma.hbm_to_vmem [thread:$0]  %s30_s22, 16, %s32_s25, [#allocation4]  }
   0xc   :  { %s2554_s28 = smov [#allocation8]  }
   0xd   :  { %s58_s29 = sshll.u32 %s2554_s28, 4  ;;  %s59_s29 = int_to_ptr.vmem [resolvable:$true] %s58_s29 }
   0xe   :  { %64 = dma.hbm_to_vmem [thread:$0]  %s57_s27, 512, %s59_s29, [#allocation7], %s2551_s23, %s2551_s23, %s2552_s24  }
   0xf   :  { %2542 = dma.done.wait [#allocation4], 16  }
  0x10   :  { %2543 = vsyncadd [#allocation4], 4294967280 }
  0x11   :  { %2544 = dma.done.wait [#allocation7], 1024  }
  0x12   :  { %2545 = vsyncadd [#allocation7], 4294966272  ;;  %v104_v1 = vlaneseq  ;;  %v2555_v2 = vmov 0   ;;  %v88_v4 = vld [vmem:[#allocation6 + $0x10] sm:$0xff]  ;;  %v89_v5 = vld [vmem:[#allocation6 + $0x18] sm:$0xff]  ;;  %s2556_s12 = smov 64  }
  0x13   :  { %2219 = vset.pattern.permute.xlu2 %v2555_v2  ;;  %v86_v6 = vld [vmem:[#allocation6] sm:$0xff]  ;;  %v91_v7 = vpack.c.bf16 %v89_v5, %v88_v4  ;;  %v87_v8 = vld [vmem:[#allocation6 + $0x8] sm:$0xff]  ;;  %v84_v9 = vld [vmem:[%s3253_s0] sm:$0x3]  ;;  %vm201_vm0 = vcmask 1041409   ;;  %vm127_vm1 = vcmask 261120  }
  0x14   :  { %v105_v3 = vshrl.u32 %v104_v1, 7  ;;  %v110_v10 = vperm.slane %v84_v9, 1  ;;  %v90_v11 = vpack.c.bf16 %v87_v8, %v86_v6  ;;  %v103_v12 = vperm.slane %v84_v9, 0  ;;  %v2220_v14 = vld [vmem:[#allocation3] ss:$0 sm:$0xff]  ;;  %s2561_s8 = smov 2  }
  0x15   :  { %137 = vmatpush.bf16.msra.mxu0 %v91_v7  ;;  %215 = vmatpush.bf16.msra.mxu1 %v91_v7  ;;  %v2221_v16 = vld [vmem:[%s3256_s3] ss:$0 sm:$0xff]  ;;  %s2557_s3 = smov 32   ;;  %vm787_vm2 = vcmask 1040384   ;;  %vm790_vm3 = vcmask 1041408   ;;  %vm793_vm4 = vcmask 1042432  }
  0x16   :  { %2215 = vset.pattern.permute.xlu0 %v105_v3  ;;  %298 = vmatpush.bf16.msra.mxu2 %v91_v7  ;;  %vm796_vm5 = vcmask 1043456   ;;  %vm799_vm6 = vcmask 1044480   ;;  %vm802_vm7 = vcmask 1045504   ;;  %vm805_vm8 = vcmask 1046528   ;;  %s2562_s25 = smov 3   ;;  %s2563_s26 = smov 5  }
  0x17   :  { %383 = vmatpush.bf16.msra.mxu3 %v91_v7  ;;  %vm929_vm9 = vcmask 58368   ;;  %vm975_vm10 = vcmask 254976   ;;  %s2564_s2 = smov 4   ;;  %s2565_s27 = smov 6   ;;  %vm2017_vm11 = vcmask 7168   ;;  %vm2019_vm12 = vcmask 15360  }
  0x18   :  { %vm2021_vm13 = vcmask 23552   ;;  %vm2023_vm14 = vcmask 31744   ;;  %vm2025_vm15 = vcmask 39936   ;;  %s2566_s28 = smov 7   ;;  %s2567_s29 = smov [#allocation9]  }
  0x19   :  { %138 = vmatpush.bf16.msra.mxu0 %v90_v11  ;;  %216 = vmatpush.bf16.msra.mxu1 %v90_v11  ;;  %s2150_s1 = sshll.u32 %s2567_s29, 4  ;;  %s2152_s11 = sshll.u32 %s3262_s9, 4  ;;  %s2151_s1 = int_to_ptr.vmem [resolvable:$true] %s2150_s1  ;;  %s2153_s11 = int_to_ptr.hbm [resolvable:$true] %s2152_s11 }
  0x1a   :  { %299 = vmatpush.bf16.msra.mxu2 %v90_v11  ;;  %s2162_s15 = sshll.u32 %s3263_s10, 4  ;;  %s2163_s15 = int_to_ptr.hbm [resolvable:$true] %s2162_s15 }
  0x1b   :  { %384 = vmatpush.bf16.msra.mxu3 %v90_v11 }
  0x1c   :  { %139 = vmatmul.bf16.vlgmr.msra.gmra.mxu0 %v2555_v2 }
  0x1d   :  { %468 = vmatpush.bf16.msrb.mxu0 %v91_v7  ;;  %553 = vmatpush.bf16.msrb.mxu1 %v91_v7 }
  0x1e   :  { %115 = vperm.xlu0 %2215, %v110_v10   ;;  %638 = vmatpush.bf16.msrb.mxu2 %v91_v7 }
  0x1f   :  { %723 = vmatpush.bf16.msrb.mxu3 %v91_v7 }
  0x21   :  { %469 = vmatpush.bf16.msrb.mxu0 %v90_v11  ;;  %554 = vmatpush.bf16.msrb.mxu1 %v90_v11 }
  0x22   :  { %639 = vmatpush.bf16.msrb.mxu2 %v90_v11 }
  0x23   :  { %724 = vmatpush.bf16.msrb.mxu3 %v90_v11 }
  0x26   :  { %108 = vperm.xlu0 %2215, %v103_v12  }
  0x2e   :  { %2218 = vset.pattern.permute.xlu0 %v2555_v2 }
  0x90   :  { %v116_v13 = vpop.permute.xlu0 %115 }
  0x91   :  { %v121_v15 = vmul.f32 %v2220_v14, %v116_v13 }
  0x93   :  { %v2652_v17 = vadd.f32 %v2221_v16, %v121_v15 }
  0x98   :  { %v109_v18 = vpop.permute.xlu0 %108 }
  0x99   :  { %v140_v19 = vpop.f32.mrf.mxu0  ;;  %v120_v21 = vmul.f32 %v2220_v14, %v109_v18 }
  0x9a   :  { %v145_v20 = vrot.slane %v140_v19, 1 }
  0x9b   :  { %v2655_v23 = vadd.f32 %v2221_v16, %v120_v21 }
  0x9c   :  { %v149_v22 = vadd.f32 %v145_v20, %v2652_v17 }
  0x9d   :  { %v148_v25 = vadd.f32 %v140_v19, %v2655_v23 }
  0x9e   :  { %2226 = vtanh.f32 %v149_v22  ;;  %v151_v28 = vmul.f32 0.5, %v149_v22 }
  0x9f   :  { %2228 = vtanh.f32 %v148_v25  ;;  %v150_v29 = vmul.f32 0.5, %v148_v25 }
  0xa0   :  { %2230 = vtanh.f32 %v151_v28 }
  0xa1   :  { %v142_v24 = vpop.f32.mrf.mxu0  ;;  %2232 = vtanh.f32 %v150_v29 }
  0xa4   :  { %v2227_v26 = vpop.eup %2226 }
  0xa5   :  { %166 = vrot.lane.b32.xlu1 %v2227_v26, %s2556_s12  ;;  %v2229_v27 = vpop.eup %2228 }
  0xa6   :  { %v2231_v30 = vpop.eup %2230 }
  0xa7   :  { %v155_v31 = vmul.f32 0.5, %v2231_v30  ;;  %v2233_v33 = vpop.eup %2232 }
  0xa8   :  { %v154_v36 = vmul.f32 0.5, %v2233_v33 }
  0xa9   :  { %v157_v32 = vadd.f32 0.5, %v155_v31 }
  0xaa   :  { %v156_v37 = vadd.f32 0.5, %v154_v36 }
  0xab   :  { %v161_v40 = vmul.f32 0.0, %v157_v32 }
  0xac   :  { %v160_v43 = vmul.f32 0.0, %v156_v37 }
  0xad   :  { %164 = vrot.lane.b32.xlu1 %v2229_v27, %s2556_s12 }
 0x117   :  { %v167_v34 = vpop.permute.xlu1 %166 }
 0x118   :  { %v171_v35 = vmul.f32 %v167_v34, %v157_v32 }
 0x11a   :  { %176 = vrot.lane.b32.xlu2 %v171_v35, %s2557_s3 }
 0x11f   :  { %v165_v38 = vpop.permute.xlu1 %164 }
 0x120   :  { %v170_v39 = vmul.f32 %v165_v38, %v156_v37 }
 0x122   :  { %174 = vrot.lane.b32.xlu2 %v170_v39, %s2557_s3 }
 0x174   :  { %v177_v41 = vpop.permute.xlu2 %176 }
 0x175   :  { %v181_v42 = vadd.f32 %v177_v41, %v161_v40 }
 0x177   :  { %2234 = vtanh.f32 %v181_v42  ;;  %v241_v24 = vrot.slane %v181_v42, 7 }
 0x17c   :  { %v175_v44 = vpop.permute.xlu2 %174 }
 0x17d   :  { %v2235_v45 = vpop.eup %2234  ;;  %v180_v46 = vadd.f32 %v175_v44, %v160_v43 }
 0x17e   :  { %188 = vrot.lane.b32.xlu0 %v2235_v45, %s2556_s12 }
 0x17f   :  { %2236 = vtanh.f32 %v180_v46  ;;  %v240_v18 = vrot.slane %v180_v46, 7 }
 0x185   :  { %v2237_v47 = vpop.eup %2236 }
 0x186   :  { %186 = vrot.lane.b32.xlu1 %v2237_v47, %s2556_s12 }
 0x1f0   :  { %v189_v48 = vpop.permute.xlu0 %188 }
 0x1f1   :  { %v2664_v49 = vmul.f32 %v189_v48, %v157_v32 }
 0x1f3   :  { %v195_v50 = vpack.c.bf16 %v2664_v49, %v2664_v49 }
 0x1f5   :  { %v199_v52 = vunpack.c.l.b16 %v195_v50 }
 0x1f7   :  { %v200_v55 = vrot.slane %v199_v52, 7 }
 0x1f8   :  { %v187_v51 = vpop.permute.xlu1 %186 }
 0x1f9   :  { %v2668_v53 = vmul.f32 %v187_v51, %v156_v37 }
 0x1fb   :  { %v194_v54 = vpack.c.bf16 %v2668_v53, %v2668_v53 }
 0x1fd   :  { %v198_v56 = vunpack.c.l.b16 %v194_v54 }
 0x1ff   :  { %v202_v57 = vsel %vm201_vm0, %v200_v55, %v198_v56 }
 0x200   :  { %v203_v58 = vpack.c.b16 %v202_v57, %v202_v57 }
 0x202   :  { %204 = vrot.lane.b32.xlu2 %v203_v58, %s2557_s3 }
 0x25c   :  { %v205_v59 = vpop.permute.xlu2 %204 }
 0x25d   :  { %2181 = vmatmul.msk.bf16.vlgmr.msra.gmra.mxu1 %vm127_vm1, %v205_v59 }
 0x2da   :  { %v218_v60 = vpop.f32.mrf.mxu1 }
 0x2db   :  { %v223_v61 = vrot.slane %v218_v60, 7  ;;  %v227_v62 = vadd.f32 %v218_v60, %v2652_v17 }
 0x2dd   :  { %v226_v63 = vadd.f32 %v223_v61, %v2655_v23  ;;  %2238 = vtanh.f32 %v227_v62  ;;  %v229_v5 = vmul.f32 0.5, %v227_v62 }
 0x2df   :  { %2240 = vtanh.f32 %v226_v63  ;;  %v228_v6 = vmul.f32 0.5, %v226_v63 }
 0x2e0   :  { %2242 = vtanh.f32 %v229_v5 }
 0x2e1   :  { %2244 = vtanh.f32 %v228_v6 }
 0x2e2   :  { %v220_v0 = vpop.f32.mrf.mxu1 }
 0x2e3   :  { %v2239_v3 = vpop.eup %2238 }
 0x2e4   :  { %250 = vrot.lane.b32.xlu1 %v2239_v3, %s2556_s12 }
 0x2e5   :  { %v2241_v4 = vpop.eup %2240 }
 0x2e6   :  { %248 = vrot.lane.b32.xlu0 %v2241_v4, %s2556_s12  ;;  %v2243_v7 = vpop.eup %2242 }
 0x2e7   :  { %v2245_v8 = vpop.eup %2244  ;;  %v233_v9 = vmul.f32 0.5, %v2243_v7 }
 0x2e8   :  { %v232_v10 = vmul.f32 0.5, %v2245_v8 }
 0x2e9   :  { %v235_v11 = vadd.f32 0.5, %v233_v9 }
 0x2ea   :  { %v234_v14 = vadd.f32 0.5, %v232_v10 }
 0x2eb   :  { %v245_v25 = vmul.f32 %v241_v24, %v235_v11 }
 0x2ec   :  { %v244_v19 = vmul.f32 %v240_v18, %v234_v14 }
 0x356   :  { %v251_v12 = vpop.permute.xlu1 %250 }
 0x357   :  { %v255_v13 = vmul.f32 %v251_v12, %v235_v11 }
 0x358   :  { %v249_v15 = vpop.permute.xlu0 %248 }
 0x359   :  { %260 = vrot.lane.b32.xlu0 %v255_v13, %s2557_s3  ;;  %v254_v16 = vmul.f32 %v249_v15, %v234_v14 }
 0x35b   :  { %258 = vrot.lane.b32.xlu2 %v254_v16, %s2557_s3 }
 0x3b5   :  { %v259_v20 = vpop.permute.xlu2 %258 }
 0x3b6   :  { %v264_v21 = vadd.f32 %v259_v20, %v244_v19 }
 0x3b8   :  { %2246 = vtanh.f32 %v264_v21  ;;  %v324_v6 = vrot.slane %v264_v21, 7 }
 0x3be   :  { %v2247_v22 = vpop.eup %2246 }
 0x3bf   :  { %270 = vrot.lane.b32.xlu1 %v2247_v22, %s2556_s12 }
 0x3cb   :  { %v261_v26 = vpop.permute.xlu0 %260 }
 0x3cc   :  { %v265_v27 = vadd.f32 %v261_v26, %v245_v25 }
 0x3ce   :  { %2248 = vtanh.f32 %v265_v27  ;;  %v325_v63 = vrot.slane %v265_v27, 7 }
 0x3d4   :  { %v2249_v28 = vpop.eup %2248 }
 0x3d5   :  { %272 = vrot.lane.b32.xlu2 %v2249_v28, %s2556_s12 }
 0x42f   :  { %v273_v29 = vpop.permute.xlu2 %272 }
 0x430   :  { %v2683_v30 = vmul.f32 %v273_v29, %v235_v11 }
 0x431   :  { %v271_v31 = vpop.permute.xlu1 %270 }
 0x432   :  { %v276_v32 = vmul.f32 %v271_v31, %v234_v14  ;;  %v279_v33 = vpack.c.bf16 %v2683_v30, %v2683_v30  ;;  %v789_v16 = vsel %vm787_vm2, %v2664_v49, %v2683_v30 }
 0x434   :  { %v278_v34 = vpack.c.bf16 %v276_v32, %v276_v32  ;;  %v283_v36 = vunpack.c.l.b16 %v279_v33  ;;  %v788_v14 = vsel %vm787_vm2, %v2668_v53, %v276_v32 }
 0x436   :  { %v282_v35 = vunpack.c.l.b16 %v278_v34 }
 0x438   :  { %v284_v37 = vrot.slane %v282_v35, 1 }
 0x43a   :  { %v285_v38 = vsel %vm201_vm0, %v283_v36, %v284_v37 }
 0x43b   :  { %v286_v39 = vpack.c.b16 %v285_v38, %v285_v38 }
 0x43d   :  { %287 = vrot.lane.b32.xlu0 %v286_v39, %s2557_s3 }
 0x4af   :  { %v288_v40 = vpop.permute.xlu0 %287 }
 0x4b0   :  { %2182 = vmatmul.msk.bf16.vlgmr.msra.gmra.mxu2 %vm127_vm1, %v288_v40 }
 0x533   :  { %v301_v41 = vpop.f32.mrf.mxu2 }
 0x534   :  { %v306_v42 = vrot.slane %v301_v41, 6  ;;  %v307_v43 = vrot.slane %v301_v41, 7 }
 0x536   :  { %v310_v44 = vadd.f32 %v306_v42, %v2655_v23  ;;  %v311_v45 = vadd.f32 %v307_v43, %v2652_v17 }
 0x538   :  { %2250 = vtanh.f32 %v310_v44  ;;  %v313_v50 = vmul.f32 0.5, %v311_v45  ;;  %v312_v57 = vmul.f32 0.5, %v310_v44 }
 0x539   :  { %2252 = vtanh.f32 %v311_v45 }
 0x53a   :  { %2254 = vtanh.f32 %v313_v50 }
 0x53b   :  { %v303_v46 = vpop.f32.mrf.mxu2  ;;  %2256 = vtanh.f32 %v312_v57 }
 0x53e   :  { %v2251_v47 = vpop.eup %2250 }
 0x53f   :  { %v2253_v48 = vpop.eup %2252  ;;  %332 = vrot.lane.b32.xlu1 %v2251_v47, %s2556_s12 }
 0x540   :  { %334 = vrot.lane.b32.xlu2 %v2253_v48, %s2556_s12  ;;  %v2255_v51 = vpop.eup %2254 }
 0x541   :  { %v317_v52 = vmul.f32 0.5, %v2255_v51  ;;  %v2257_v58 = vpop.eup %2256 }
 0x542   :  { %v316_v59 = vmul.f32 0.5, %v2257_v58 }
 0x543   :  { %v319_v54 = vadd.f32 0.5, %v317_v52 }
 0x544   :  { %v318_v60 = vadd.f32 0.5, %v316_v59 }
 0x545   :  { %v329_v0 = vmul.f32 %v325_v63, %v319_v54 }
 0x546   :  { %v328_v7 = vmul.f32 %v324_v6, %v318_v60 }
 0x59a   :  { %v335_v55 = vpop.permute.xlu2 %334 }
 0x59b   :  { %v339_v56 = vmul.f32 %v335_v55, %v319_v54 }
 0x59d   :  { %344 = vrot.lane.b32.xlu1 %v339_v56, %s2557_s3 }
 0x5b1   :  { %v333_v61 = vpop.permute.xlu1 %332 }
 0x5b2   :  { %v338_v62 = vmul.f32 %v333_v61, %v318_v60 }
 0x5b4   :  { %342 = vrot.lane.b32.xlu0 %v338_v62, %s2557_s3 }
 0x60f   :  { %v345_v3 = vpop.permute.xlu1 %344 }
 0x610   :  { %v2696_v4 = vadd.f32 %v345_v3, %v329_v0 }
 0x612   :  { %2258 = vtanh.f32 %v2696_v4  ;;  %v410_v50 = vrot.slane %v2696_v4, 7 }
 0x618   :  { %v2259_v5 = vpop.eup %2258 }
 0x619   :  { %356 = vrot.lane.b32.xlu0 %v2259_v5, %s2556_s12 }
 0x626   :  { %v343_v8 = vpop.permute.xlu0 %342 }
 0x627   :  { %v348_v9 = vadd.f32 %v343_v8, %v328_v7 }
 0x629   :  { %2260 = vtanh.f32 %v348_v9  ;;  %v409_v48 = vrot.slane %v348_v9, 7 }
 0x62f   :  { %v2261_v10 = vpop.eup %2260 }
 0x630   :  { %354 = vrot.lane.b32.xlu2 %v2261_v10, %s2556_s12 }
 0x68a   :  { %v355_v11 = vpop.permute.xlu2 %354 }
 0x68b   :  { %v357_v12 = vpop.permute.xlu0 %356  ;;  %v360_v13 = vmul.f32 %v355_v11, %v318_v60 }
 0x68c   :  { %v361_v15 = vmul.f32 %v357_v12, %v319_v54 }
 0x68d   :  { %v362_v18 = vpack.c.bf16 %v360_v13, %v360_v13  ;;  %v791_v19 = vsel %vm790_vm3, %v788_v14, %v360_v13 }
 0x68e   :  { %v363_v20 = vpack.c.bf16 %v361_v15, %v361_v15  ;;  %v792_v21 = vsel %vm790_vm3, %v789_v16, %v361_v15 }
 0x68f   :  { %v366_v22 = vunpack.c.l.b16 %v362_v18 }
 0x690   :  { %v367_v24 = vunpack.c.l.b16 %v363_v20 }
 0x691   :  { %v368_v25 = vrot.slane %v366_v22, 2 }
 0x692   :  { %v369_v26 = vrot.slane %v367_v24, 1 }
 0x694   :  { %v370_v27 = vsel %vm201_vm0, %v369_v26, %v368_v25 }
 0x695   :  { %v371_v28 = vpack.c.b16 %v370_v27, %v370_v27 }
 0x697   :  { %372 = vrot.lane.b32.xlu1 %v371_v28, %s2557_s3 }
 0x709   :  { %v373_v53 = vpop.permute.xlu1 %372 }
 0x70a   :  { %2183 = vmatmul.msk.bf16.vlgmr.msra.gmra.mxu3 %vm127_vm1, %v373_v53 }
 0x78d   :  { %v386_v29 = vpop.f32.mrf.mxu3 }
 0x78e   :  { %v391_v49 = vrot.slane %v386_v29, 5  ;;  %v392_v30 = vrot.slane %v386_v29, 6 }
 0x790   :  { %v395_v31 = vadd.f32 %v391_v49, %v2655_v23  ;;  %v396_v32 = vadd.f32 %v392_v30, %v2652_v17 }
 0x792   :  { %2262 = vtanh.f32 %v395_v31  ;;  %v397_v36 = vmul.f32 0.5, %v395_v31  ;;  %v398_v42 = vmul.f32 0.5, %v396_v32 }
 0x793   :  { %2264 = vtanh.f32 %v396_v32 }
 0x794   :  { %2266 = vtanh.f32 %v397_v36 }
 0x795   :  { %v388_v33 = vpop.f32.mrf.mxu3  ;;  %2268 = vtanh.f32 %v398_v42 }
 0x798   :  { %v2263_v34 = vpop.eup %2262 }
 0x799   :  { %v2265_v35 = vpop.eup %2264  ;;  %417 = vrot.lane.b32.xlu2 %v2263_v34, %s2556_s12 }
 0x79a   :  { %419 = vrot.lane.b32.xlu0 %v2265_v35, %s2556_s12  ;;  %v2267_v37 = vpop.eup %2266 }
 0x79b   :  { %v401_v38 = vmul.f32 0.5, %v2267_v37  ;;  %v2269_v43 = vpop.eup %2268 }
 0x79c   :  { %v402_v44 = vmul.f32 0.5, %v2269_v43 }
 0x79d   :  { %v403_v39 = vadd.f32 0.5, %v401_v38 }
 0x79e   :  { %v404_v45 = vadd.f32 0.5, %v402_v44 }
 0x79f   :  { %v413_v51 = vmul.f32 %v409_v48, %v403_v39 }
 0x7a0   :  { %v414_v52 = vmul.f32 %v410_v50, %v404_v45 }
 0x7f3   :  { %v418_v40 = vpop.permute.xlu2 %417 }
 0x7f4   :  { %v423_v41 = vmul.f32 %v418_v40, %v403_v39 }
 0x7f6   :  { %427 = vrot.lane.b32.xlu1 %v423_v41, %s2557_s3 }
 0x80c   :  { %v420_v46 = vpop.permute.xlu0 %419 }
 0x80d   :  { %v424_v47 = vmul.f32 %v420_v46, %v404_v45 }
 0x80f   :  { %429 = vrot.lane.b32.xlu2 %v424_v47, %s2557_s3 }
 0x868   :  { %v428_v54 = vpop.permute.xlu1 %427 }
 0x869   :  { %v430_v55 = vpop.permute.xlu2 %429  ;;  %v433_v56 = vadd.f32 %v428_v54, %v413_v51 }
 0x86a   :  { %v434_v57 = vadd.f32 %v430_v55, %v414_v52 }
 0x86b   :  { %2270 = vtanh.f32 %v433_v56  ;;  %v494_v33 = vrot.slane %v433_v56, 7 }
 0x86c   :  { %2272 = vtanh.f32 %v434_v57  ;;  %v495_v38 = vrot.slane %v434_v57, 7 }
 0x871   :  { %v2271_v58 = vpop.eup %2270 }
 0x872   :  { %v2273_v59 = vpop.eup %2272  ;;  %439 = vrot.lane.b32.xlu0 %v2271_v58, %s2556_s12 }
 0x873   :  { %441 = vrot.lane.b32.xlu1 %v2273_v59, %s2556_s12 }
 0x8e4   :  { %v440_v60 = vpop.permute.xlu0 %439 }
 0x8e5   :  { %v442_v61 = vpop.permute.xlu1 %441  ;;  %v445_v62 = vmul.f32 %v440_v60, %v403_v39 }
 0x8e6   :  { %v446_v63 = vmul.f32 %v442_v61, %v404_v45 }
 0x8e7   :  { %v447_v0 = vpack.c.bf16 %v445_v62, %v445_v62  ;;  %v794_v3 = vsel %vm793_vm4, %v791_v19, %v445_v62 }
 0x8e8   :  { %v448_v4 = vpack.c.bf16 %v446_v63, %v446_v63  ;;  %v795_v5 = vsel %vm793_vm4, %v792_v21, %v446_v63 }
 0x8e9   :  { %v451_v6 = vunpack.c.l.b16 %v447_v0 }
 0x8ea   :  { %v452_v7 = vunpack.c.l.b16 %v448_v4 }
 0x8eb   :  { %v453_v8 = vrot.slane %v451_v6, 3 }
 0x8ec   :  { %v454_v9 = vrot.slane %v452_v7, 2 }
 0x8ee   :  { %v455_v10 = vsel %vm201_vm0, %v454_v9, %v453_v8 }
 0x8ef   :  { %v456_v11 = vpack.c.b16 %v455_v10, %v455_v10 }
 0x8f1   :  { %457 = vrot.lane.b32.xlu2 %v456_v11, %s2557_s3 }
 0x94b   :  { %v458_v12 = vpop.permute.xlu2 %457 }
 0x94c   :  { %2184 = vmatmul.msk.bf16.vlgmr.msrb.gmra.mxu0 %vm127_vm1, %v458_v12 }
 0x9c9   :  { %v471_v13 = vpop.f32.mrf.mxu0 }
 0x9ca   :  { %v476_v14 = vrot.slane %v471_v13, 4  ;;  %v477_v15 = vrot.slane %v471_v13, 5 }
 0x9cc   :  { %v480_v16 = vadd.f32 %v476_v14, %v2655_v23  ;;  %v481_v18 = vadd.f32 %v477_v15, %v2652_v17 }
 0x9ce   :  { %2274 = vtanh.f32 %v480_v16  ;;  %v482_v22 = vmul.f32 0.5, %v480_v16  ;;  %v483_v24 = vmul.f32 0.5, %v481_v18 }
 0x9cf   :  { %2276 = vtanh.f32 %v481_v18 }
 0x9d0   :  { %2278 = vtanh.f32 %v482_v22 }
 0x9d1   :  { %v473_v19 = vpop.f32.mrf.mxu0  ;;  %2280 = vtanh.f32 %v483_v24 }
 0x9d4   :  { %v2275_v20 = vpop.eup %2274 }
 0x9d5   :  { %v2277_v21 = vpop.eup %2276  ;;  %502 = vrot.lane.b32.xlu0 %v2275_v20, %s2556_s12 }
 0x9d6   :  { %504 = vrot.lane.b32.xlu1 %v2277_v21, %s2556_s12  ;;  %v2279_v25 = vpop.eup %2278 }
 0x9d7   :  { %v2281_v26 = vpop.eup %2280  ;;  %v486_v27 = vmul.f32 0.5, %v2279_v25 }
 0x9d8   :  { %v487_v28 = vmul.f32 0.5, %v2281_v26 }
 0x9d9   :  { %v488_v53 = vadd.f32 0.5, %v486_v27 }
 0x9da   :  { %v489_v29 = vadd.f32 0.5, %v487_v28 }
 0x9db   :  { %v498_v34 = vmul.f32 %v494_v33, %v488_v53 }
 0x9dc   :  { %v499_v39 = vmul.f32 %v495_v38, %v489_v29 }
 0xa47   :  { %v503_v49 = vpop.permute.xlu0 %502 }
 0xa48   :  { %v505_v30 = vpop.permute.xlu1 %504  ;;  %v508_v31 = vmul.f32 %v503_v49, %v488_v53 }
 0xa49   :  { %v509_v32 = vmul.f32 %v505_v30, %v489_v29 }
 0xa4a   :  { %512 = vrot.lane.b32.xlu2 %v508_v31, %s2557_s3 }
 0xa4b   :  { %514 = vrot.lane.b32.xlu0 %v509_v32, %s2557_s3 }
 0xaa4   :  { %v513_v35 = vpop.permute.xlu2 %512 }
 0xaa5   :  { %v2731_v36 = vadd.f32 %v513_v35, %v498_v34 }
 0xaa7   :  { %2282 = vtanh.f32 %v2731_v36  ;;  %v579_v25 = vrot.slane %v2731_v36, 7 }
 0xaad   :  { %v2283_v37 = vpop.eup %2282 }
 0xaae   :  { %524 = vrot.lane.b32.xlu1 %v2283_v37, %s2556_s12 }
 0xabd   :  { %v515_v40 = vpop.permute.xlu0 %514 }
 0xabe   :  { %v519_v41 = vadd.f32 %v515_v40, %v499_v39 }
 0xac0   :  { %2284 = vtanh.f32 %v519_v41  ;;  %v580_v19 = vrot.slane %v519_v41, 7 }
 0xac6   :  { %v2285_v42 = vpop.eup %2284 }
 0xac7   :  { %526 = vrot.lane.b32.xlu2 %v2285_v42, %s2556_s12 }
 0xb20   :  { %v525_v43 = vpop.permute.xlu1 %524 }
 0xb21   :  { %v527_v44 = vpop.permute.xlu2 %526  ;;  %v530_v45 = vmul.f32 %v525_v43, %v488_v53 }
 0xb22   :  { %v531_v46 = vmul.f32 %v527_v44, %v489_v29 }
 0xb23   :  { %v532_v47 = vpack.c.bf16 %v530_v45, %v530_v45  ;;  %v797_v48 = vsel %vm796_vm5, %v794_v3, %v530_v45 }
 0xb24   :  { %v533_v50 = vpack.c.bf16 %v531_v46, %v531_v46  ;;  %v798_v51 = vsel %vm796_vm5, %v795_v5, %v531_v46 }
 0xb25   :  { %v536_v52 = vunpack.c.l.b16 %v532_v47 }
 0xb26   :  { %v537_v54 = vunpack.c.l.b16 %v533_v50 }
 0xb27   :  { %v538_v55 = vrot.slane %v536_v52, 4 }
 0xb28   :  { %v539_v56 = vrot.slane %v537_v54, 3 }
 0xb2a   :  { %v540_v57 = vsel %vm201_vm0, %v539_v56, %v538_v55 }
 0xb2b   :  { %v541_v58 = vpack.c.b16 %v540_v57, %v540_v57 }
 0xb2d   :  { %542 = vrot.lane.b32.xlu0 %v541_v58, %s2557_s3 }
 0xb9f   :  { %v543_v59 = vpop.permute.xlu0 %542 }
 0xba0   :  { %2185 = vmatmul.msk.bf16.vlgmr.msrb.gmra.mxu1 %vm127_vm1, %v543_v59 }
 0xc1d   :  { %v556_v60 = vpop.f32.mrf.mxu1 }
 0xc1e   :  { %v561_v61 = vrot.slane %v556_v60, 3  ;;  %v562_v62 = vrot.slane %v556_v60, 4 }
 0xc20   :  { %v565_v63 = vadd.f32 %v561_v61, %v2655_v23  ;;  %v566_v0 = vadd.f32 %v562_v62, %v2652_v17 }
 0xc22   :  { %2286 = vtanh.f32 %v565_v63  ;;  %v568_v6 = vmul.f32 0.5, %v566_v0  ;;  %v567_v12 = vmul.f32 0.5, %v565_v63 }
 0xc23   :  { %2288 = vtanh.f32 %v566_v0 }
 0xc24   :  { %2290 = vtanh.f32 %v568_v6 }
 0xc25   :  { %v558_v3 = vpop.f32.mrf.mxu1  ;;  %2292 = vtanh.f32 %v567_v12 }
 0xc28   :  { %v2287_v4 = vpop.eup %2286 }
 0xc29   :  { %v2289_v5 = vpop.eup %2288  ;;  %587 = vrot.lane.b32.xlu1 %v2287_v4, %s2556_s12 }
 0xc2a   :  { %589 = vrot.lane.b32.xlu2 %v2289_v5, %s2556_s12  ;;  %v2291_v7 = vpop.eup %2290 }
 0xc2b   :  { %v572_v8 = vmul.f32 0.5, %v2291_v7  ;;  %v2293_v13 = vpop.eup %2292 }
 0xc2c   :  { %v571_v14 = vmul.f32 0.5, %v2293_v13 }
 0xc2d   :  { %v574_v9 = vadd.f32 0.5, %v572_v8 }
 0xc2e   :  { %v573_v15 = vadd.f32 0.5, %v571_v14 }
 0xc2f   :  { %v584_v20 = vmul.f32 %v580_v19, %v574_v9 }
 0xc30   :  { %v583_v26 = vmul.f32 %v579_v25, %v573_v15 }
 0xc84   :  { %v590_v10 = vpop.permute.xlu2 %589 }
 0xc85   :  { %v594_v11 = vmul.f32 %v590_v10, %v574_v9 }
 0xc87   :  { %599 = vrot.lane.b32.xlu1 %v594_v11, %s2557_s3 }
 0xc9b   :  { %v588_v16 = vpop.permute.xlu1 %587 }
 0xc9c   :  { %v593_v18 = vmul.f32 %v588_v16, %v573_v15 }
 0xc9e   :  { %597 = vrot.lane.b32.xlu0 %v593_v18, %s2557_s3 }
 0xcf9   :  { %v600_v21 = vpop.permute.xlu1 %599 }
 0xcfa   :  { %v604_v22 = vadd.f32 %v600_v21, %v584_v20 }
 0xcfc   :  { %2294 = vtanh.f32 %v604_v22  ;;  %v665_v4 = vrot.slane %v604_v22, 7 }
 0xd02   :  { %v2295_v24 = vpop.eup %2294 }
 0xd03   :  { %611 = vrot.lane.b32.xlu0 %v2295_v24, %s2556_s12 }
 0xd10   :  { %v598_v27 = vpop.permute.xlu0 %597 }
 0xd11   :  { %v603_v28 = vadd.f32 %v598_v27, %v583_v26 }
 0xd13   :  { %2296 = vtanh.f32 %v603_v28  ;;  %v664_v3 = vrot.slane %v603_v28, 7 }
 0xd19   :  { %v2297_v53 = vpop.eup %2296 }
 0xd1a   :  { %609 = vrot.lane.b32.xlu2 %v2297_v53, %s2556_s12 }
 0xd74   :  { %v610_v29 = vpop.permute.xlu2 %609 }
 0xd75   :  { %v612_v49 = vpop.permute.xlu0 %611  ;;  %v615_v30 = vmul.f32 %v610_v29, %v573_v15 }
 0xd76   :  { %v616_v31 = vmul.f32 %v612_v49, %v574_v9 }
 0xd77   :  { %v617_v32 = vpack.c.bf16 %v615_v30, %v615_v30  ;;  %v800_v33 = vsel %vm799_vm6, %v797_v48, %v615_v30 }
 0xd78   :  { %v618_v34 = vpack.c.bf16 %v616_v31, %v616_v31  ;;  %v801_v35 = vsel %vm799_vm6, %v798_v51, %v616_v31 }
 0xd79   :  { %v621_v37 = vunpack.c.l.b16 %v617_v32 }
 0xd7a   :  { %v622_v36 = vunpack.c.l.b16 %v618_v34 }
 0xd7b   :  { %v623_v38 = vrot.slane %v621_v37, 5 }
 0xd7c   :  { %v624_v39 = vrot.slane %v622_v36, 4 }
 0xd7e   :  { %v625_v40 = vsel %vm201_vm0, %v624_v39, %v623_v38 }
 0xd7f   :  { %v626_v41 = vpack.c.b16 %v625_v40, %v625_v40 }
 0xd81   :  { %627 = vrot.lane.b32.xlu1 %v626_v41, %s2557_s3 }
 0xdf3   :  { %v628_v42 = vpop.permute.xlu1 %627 }
 0xdf4   :  { %2186 = vmatmul.msk.bf16.vlgmr.msrb.gmra.mxu2 %vm127_vm1, %v628_v42 }
 0xe77   :  { %v641_v43 = vpop.f32.mrf.mxu2 }
 0xe78   :  { %v646_v44 = vrot.slane %v641_v43, 2  ;;  %v647_v45 = vrot.slane %v641_v43, 3 }
 0xe7a   :  { %v650_v46 = vadd.f32 %v646_v44, %v2655_v23  ;;  %v651_v47 = vadd.f32 %v647_v45, %v2652_v17 }
 0xe7c   :  { %2298 = vtanh.f32 %v650_v46  ;;  %v652_v52 = vmul.f32 0.5, %v650_v46  ;;  %v653_v59 = vmul.f32 0.5, %v651_v47 }
 0xe7d   :  { %2300 = vtanh.f32 %v651_v47 }
 0xe7e   :  { %2302 = vtanh.f32 %v652_v52 }
 0xe7f   :  { %v643_v48 = vpop.f32.mrf.mxu2  ;;  %2304 = vtanh.f32 %v653_v59 }
 0xe82   :  { %v2299_v50 = vpop.eup %2298 }
 0xe83   :  { %v2301_v51 = vpop.eup %2300  ;;  %672 = vrot.lane.b32.xlu2 %v2299_v50, %s2556_s12 }
 0xe84   :  { %674 = vrot.lane.b32.xlu0 %v2301_v51, %s2556_s12  ;;  %v2303_v54 = vpop.eup %2302 }
 0xe85   :  { %v656_v55 = vmul.f32 0.5, %v2303_v54  ;;  %v2305_v60 = vpop.eup %2304 }
 0xe86   :  { %v657_v61 = vmul.f32 0.5, %v2305_v60 }
 0xe87   :  { %v658_v56 = vadd.f32 0.5, %v656_v55 }
 0xe88   :  { %v659_v62 = vadd.f32 0.5, %v657_v61  ;;  %v96_v61 = vld [vmem:[#allocation8 + $0x10] sm:$0xff] }
 0xe89   :  { %v668_v5 = vmul.f32 %v664_v3, %v658_v56  ;;  %v95_v3 = vld [vmem:[#allocation8 + $0x8] sm:$0xff] }
 0xe8a   :  { %v669_v6 = vmul.f32 %v665_v4, %v659_v62 }
 0xedd   :  { %v673_v57 = vpop.permute.xlu2 %672 }
 0xede   :  { %v678_v58 = vmul.f32 %v673_v57, %v658_v56 }
 0xee0   :  { %682 = vrot.lane.b32.xlu1 %v678_v58, %s2557_s3 }
 0xef6   :  { %v675_v63 = vpop.permute.xlu0 %674 }
 0xef7   :  { %v679_v0 = vmul.f32 %v675_v63, %v659_v62  ;;  %v94_v63 = vld [vmem:[#allocation8] sm:$0xff] }
 0xef8   :  { %v98_v4 = vpack.c.bf16 %v95_v3, %v94_v63 }
 0xef9   :  { %684 = vrot.lane.b32.xlu2 %v679_v0, %s2557_s3 }
 0xf52   :  { %v683_v7 = vpop.permute.xlu1 %682 }
 0xf53   :  { %v685_v8 = vpop.permute.xlu2 %684  ;;  %v688_v9 = vadd.f32 %v683_v7, %v668_v5 }
 0xf54   :  { %v689_v10 = vadd.f32 %v685_v8, %v669_v6 }
 0xf55   :  { %2306 = vtanh.f32 %v688_v9  ;;  %v749_v46 = vrot.slane %v688_v9, 7 }
 0xf56   :  { %2308 = vtanh.f32 %v689_v10  ;;  %v750_v52 = vrot.slane %v689_v10, 7 }
 0xf5b   :  { %v2307_v11 = vpop.eup %2306 }
 0xf5c   :  { %v2309_v12 = vpop.eup %2308  ;;  %694 = vrot.lane.b32.xlu0 %v2307_v11, %s2556_s12 }
 0xf5d   :  { %696 = vrot.lane.b32.xlu1 %v2309_v12, %s2556_s12 }
 0xfce   :  { %v695_v13 = vpop.permute.xlu0 %694 }
 0xfcf   :  { %v697_v14 = vpop.permute.xlu1 %696  ;;  %v700_v15 = vmul.f32 %v695_v13, %v658_v56 }
 0xfd0   :  { %v701_v16 = vmul.f32 %v697_v14, %v659_v62  ;;  %v97_v62 = vld [vmem:[#allocation8 + $0x18] sm:$0xff] }
 0xfd1   :  { %v702_v18 = vpack.c.bf16 %v700_v15, %v700_v15  ;;  %v2764_v19 = vsel %vm802_vm7, %v800_v33, %v700_v15  ;;  %v99_v0 = vpack.c.bf16 %v97_v62, %v96_v61 }
 0xfd2   :  { %v703_v20 = vpack.c.bf16 %v701_v16, %v701_v16  ;;  %v2767_v21 = vsel %vm802_vm7, %v801_v35, %v701_v16 }
 0xfd3   :  { %v706_v22 = vunpack.c.l.b16 %v702_v18  ;;  %863 = vmatpush.bf16.msra.mxu0 %v99_v0  ;;  %1021 = vmatpush.bf16.msra.mxu1 %v99_v0 }
 0xfd4   :  { %v707_v24 = vunpack.c.l.b16 %v703_v20  ;;  %1163 = vmatpush.bf16.msra.mxu2 %v99_v0  ;;  %1305 = vmatpush.bf16.msra.mxu3 %v99_v0 }
 0xfd5   :  { %v708_v25 = vrot.slane %v706_v22, 6  ;;  %v2558_v22 = vmov 7  }
 0xfd6   :  { %v709_v26 = vrot.slane %v707_v24, 5  ;;  %2216 = vset.pattern.permute.xlu1 %v2558_v22  ;;  %v2801_v24 = vld [vmem:[%s3257_s4] ss:$0 sm:$0xff] }
 0xfd7   :  { %864 = vmatpush.bf16.msra.mxu0 %v98_v4  ;;  %1022 = vmatpush.bf16.msra.mxu1 %v98_v4 }
 0xfd8   :  { %v710_v27 = vsel %vm201_vm0, %v709_v26, %v708_v25  ;;  %1164 = vmatpush.bf16.msra.mxu2 %v98_v4  ;;  %1306 = vmatpush.bf16.msra.mxu3 %v98_v4 }
 0xfd9   :  { %v711_v28 = vpack.c.b16 %v710_v27, %v710_v27  ;;  %v2807_v27 = vld [vmem:[%s3259_s6] ss:$0 sm:$0xff] }
 0xfdb   :  { %712 = vrot.lane.b32.xlu2 %v711_v28, %s2557_s3  ;;  %1447 = vmatpush.bf16.msrb.mxu0 %v99_v0 }
 0xfdc   :  { %1589 = vmatpush.bf16.msrb.mxu1 %v99_v0  ;;  %1731 = vmatpush.bf16.msrb.mxu2 %v99_v0 }
 0xfdf   :  { %1448 = vmatpush.bf16.msrb.mxu0 %v98_v4 }
 0xfe0   :  { %1590 = vmatpush.bf16.msrb.mxu1 %v98_v4  ;;  %1732 = vmatpush.bf16.msrb.mxu2 %v98_v4 }
0x1035   :  { %v713_v53 = vpop.permute.xlu2 %712 }
0x1036   :  { %2187 = vmatmul.msk.bf16.vlgmr.msrb.gmra.mxu3 %vm127_vm1, %v713_v53 }
0x1037   :  { %1873 = vmatpush.bf16.msrb.mxu3 %v99_v0 }
0x103b   :  { %1874 = vmatpush.bf16.msrb.mxu3 %v98_v4 }
0x10b9   :  { %v726_v29 = vpop.f32.mrf.mxu3 }
0x10ba   :  { %v731_v49 = vrot.slane %v726_v29, 1  ;;  %v732_v30 = vrot.slane %v726_v29, 2 }
0x10bc   :  { %v735_v31 = vadd.f32 %v731_v49, %v2655_v23  ;;  %v736_v32 = vadd.f32 %v732_v30, %v2652_v17 }
0x10be   :  { %2310 = vtanh.f32 %v735_v31  ;;  %v737_v37 = vmul.f32 0.5, %v735_v31  ;;  %v738_v36 = vmul.f32 0.5, %v736_v32 }
0x10bf   :  { %2312 = vtanh.f32 %v736_v32 }
0x10c0   :  { %2314 = vtanh.f32 %v737_v37 }
0x10c1   :  { %v728_v33 = vpop.f32.mrf.mxu3  ;;  %2316 = vtanh.f32 %v738_v36 }
0x10c4   :  { %v2311_v34 = vpop.eup %2310 }
0x10c5   :  { %v2313_v35 = vpop.eup %2312  ;;  %757 = vrot.lane.b32.xlu0 %v2311_v34, %s2556_s12 }
0x10c6   :  { %759 = vrot.lane.b32.xlu1 %v2313_v35, %s2556_s12  ;;  %v2315_v38 = vpop.eup %2314 }
0x10c7   :  { %v2317_v39 = vpop.eup %2316  ;;  %v741_v40 = vmul.f32 0.5, %v2315_v38 }
0x10c8   :  { %v742_v41 = vmul.f32 0.5, %v2317_v39 }
0x10c9   :  { %v743_v23 = vadd.f32 0.5, %v741_v40 }
0x10ca   :  { %v744_v42 = vadd.f32 0.5, %v742_v41 }
0x10cb   :  { %v753_v47 = vmul.f32 %v749_v46, %v743_v23 }
0x10cc   :  { %v754_v54 = vmul.f32 %v750_v52, %v744_v42 }
0x1137   :  { %v758_v17 = vpop.permute.xlu0 %757 }
0x1138   :  { %v760_v43 = vpop.permute.xlu1 %759  ;;  %v763_v44 = vmul.f32 %v758_v17, %v743_v23 }
0x1139   :  { %v764_v45 = vmul.f32 %v760_v43, %v744_v42 }
0x113a   :  { %767 = vrot.lane.b32.xlu2 %v763_v44, %s2557_s3 }
0x113b   :  { %769 = vrot.lane.b32.xlu0 %v764_v45, %s2557_s3 }
0x1194   :  { %v768_v48 = vpop.permute.xlu2 %767 }
0x1195   :  { %v773_v50 = vadd.f32 %v768_v48, %v753_v47 }
0x1197   :  { %2318 = vtanh.f32 %v773_v50  ;;  %v878_v57 = vrot.slane %v773_v50, 7  ;;  %v2224_v50 = vld [vmem:[%s3260_s7] ss:$0 sm:$0xff]  ;;  %s2559_s7 = smov 96  }
0x119d   :  { %v2319_v51 = vpop.eup %2318 }
0x119e   :  { %779 = vrot.lane.b32.xlu1 %v2319_v51, %s2556_s12  ;;  %v2832_v51 = vand.u32 127, %v104_v1 }
0x11ad   :  { %v770_v55 = vpop.permute.xlu0 %769 }
0x11ae   :  { %v774_v56 = vadd.f32 %v770_v55, %v754_v54 }
0x11b0   :  { %2320 = vtanh.f32 %v774_v56  ;;  %v879_v58 = vrot.slane %v774_v56, 6 }
0x11b2   :  { %v2780_v59 = vsel %vm201_vm0, %v879_v58, %v878_v57 }
0x11b6   :  { %v2321_v60 = vpop.eup %2320 }
0x11b7   :  { %781 = vrot.lane.b32.xlu2 %v2321_v60, %s2556_s12 }
0x1210   :  { %v780_v5 = vpop.permute.xlu1 %779 }
0x1211   :  { %v782_v6 = vpop.permute.xlu2 %781  ;;  %v785_v7 = vmul.f32 %v780_v5, %v743_v23 }
0x1212   :  { %v786_v8 = vmul.f32 %v782_v6, %v744_v42 }
0x1213   :  { %v2785_v9 = vsel %vm805_vm8, %v2764_v19, %v785_v7  ;;  %v842_v10 = vpack.c.bf16 %v785_v7, %v785_v7  ;;  %v2418_v19 = vld [vmem:[%s3253_s0] sm:$0x3] }
0x1214   :  { %v2789_v11 = vsel %vm805_vm8, %v2767_v21, %v786_v8  ;;  %v843_v12 = vpack.c.bf16 %v786_v8, %v786_v8  ;;  %831 = vperm.xlu1 %2216, %v2418_v19  }
0x1215   :  { %v846_v13 = vunpack.c.l.b16 %v842_v10 }
0x1216   :  { %v847_v14 = vunpack.c.l.b16 %v843_v12 }
0x1217   :  { %v848_v15 = vrot.slane %v846_v13, 7 }
0x1218   :  { %v849_v16 = vrot.slane %v847_v14, 6 }
0x121a   :  { %v850_v18 = vsel %vm201_vm0, %v849_v16, %v848_v15 }
0x121b   :  { %v851_v20 = vpack.c.b16 %v850_v18, %v850_v18 }
0x121c   :  { %2217 = vset.pattern.permute.xlu1 %v2555_v2 }
0x121d   :  { %852 = vrot.lane.b32.xlu0 %v851_v20, %s2557_s3 }
0x1286   :  { %v832_v25 = vpop.permute.xlu1 %831 }
0x1287   :  { %v837_v26 = vmul.f32 %v2801_v24, %v832_v25 }
0x1289   :  { %v841_v28 = vadd.f32 %v2807_v27, %v837_v26 }
0x128f   :  { %v853_v21 = vpop.permute.xlu0 %852 }
0x1290   :  { %2188 = vmatmul.msk.bf16.vlgmr.msra.gmra.mxu0 %vm127_vm1, %v853_v21 }
0x130d   :  { %v866_v53 = vpop.f32.mrf.mxu0 }
0x130e   :  { %v870_v2 = vadd.f32 %v866_v53, %v841_v28 }
0x1310   :  { %2322 = vtanh.f32 %v870_v2  ;;  %v871_v30 = vmul.f32 0.5, %v870_v2 }
0x1312   :  { %2324 = vtanh.f32 %v871_v30 }
0x1315   :  { %v868_v29 = vpop.f32.mrf.mxu0 }
0x1316   :  { %v2323_v49 = vpop.eup %2322 }
0x1317   :  { %884 = vrot.lane.b32.xlu2 %v2323_v49, %s2556_s12 }
0x1318   :  { %v2325_v31 = vpop.eup %2324 }
0x1319   :  { %v873_v32 = vmul.f32 0.5, %v2325_v31 }
0x131b   :  { %v874_v33 = vadd.f32 0.5, %v873_v32 }
0x131d   :  { %v882_v37 = vmul.f32 %v2780_v59, %v874_v33 }
0x1371   :  { %v885_v34 = vpop.permute.xlu2 %884 }
0x1372   :  { %v887_v35 = vmul.f32 %v885_v34, %v874_v33 }
0x1374   :  { %889 = vrot.lane.b32.xlu0 %v887_v35, %s2557_s3 }
0x13e6   :  { %v890_v36 = vpop.permute.xlu0 %889 }
0x13e7   :  { %v2813_v38 = vadd.f32 %v890_v36, %v882_v37 }
0x13e9   :  { %2326 = vtanh.f32 %v2813_v38 }
0x13ef   :  { %v2327_v39 = vpop.eup %2326 }
0x13f0   :  { %895 = vrot.lane.b32.xlu1 %v2327_v39, %s2556_s12 }
0x1462   :  { %v896_v40 = vpop.permute.xlu1 %895 }
0x1463   :  { %v2817_v41 = vmul.f32 %v896_v40, %v874_v33 }
0x1465   :  { %v901_v23 = vperm.slane %v2817_v41, 0  ;;  %v900_v42 = vrot.slane %v2817_v41, 1  ;;  %v1008_v12 = vpack.c.bf16 %v2817_v41, %v2817_v41 }
0x1467   :  { %v905_v17 = vmul.f32 %v901_v23, %v2785_v9  ;;  %v902_v43 = vperm.slane %v900_v42, 0 }
0x1469   :  { %909 = vrot.lane.b32.xlu2 %v905_v17, %s2557_s3  ;;  %v906_v44 = vmul.f32 %v902_v43, %v2789_v11 }
0x146b   :  { %911 = vrot.lane.b32.xlu0 %v906_v44, %s2557_s3  ;;  %v2874_v44 = vld [vmem:[#allocation2] ss:$0 sm:$0xff] }
0x14c3   :  { %v910_v45 = vpop.permute.xlu2 %909 }
0x14c4   :  { %v915_v46 = vsel %vm127_vm1, %v910_v45, 0.0 }
0x14c5   :  { %916 = vadd.xlane.f32.xlu1 %v915_v46 }
0x14dd   :  { %v912_v47 = vpop.permute.xlu0 %911 }
0x14de   :  { %v918_v48 = vsel %vm127_vm1, %v912_v47, 0.0 }
0x14df   :  { %919 = vadd.xlane.f32.xlu2 %v918_v48 }
0x14f7   :  { %810 = vrot.lane.b32.xlu2 %v2224_v50, %s2556_s12 }
0x1538   :  { %v917_v52 = vpop.xlane.xlu1 %916 }
0x1539   :  { %v925_v55 = vperm.slane %v917_v52, %v2832_v51 }
0x1552   :  { %v920_v54 = vpop.xlane.xlu2 %919 }
0x1553   :  { %v926_v56 = vperm.slane %v920_v54, %v2832_v51 }
0x1555   :  { %v927_v57 = vsel %vm201_vm0, %v926_v56, %v925_v55 }
0x1556   :  { %v930_v58 = vsel %vm929_vm9, %v927_v57, -inf }
0x1557   :  { %931 = vmax.xlane.f32.xlu0 %v930_v58 }
0x155a   :  { %v811_v59 = vpop.permute.xlu2 %810 }
0x155b   :  { %v813_v60 = vmul.f32 %v811_v59, %v2785_v9  ;;  %v814_v7 = vmul.f32 %v811_v59, %v2789_v11 }
0x155d   :  { %817 = vrot.lane.b32.xlu2 %v813_v60, %s2557_s3 }
0x15b7   :  { %v818_v8 = vpop.permute.xlu2 %817 }
0x15b8   :  { %v823_v10 = vsel %vm127_vm1, %v818_v8, 0.0 }
0x15ca   :  { %v932_v61 = vpop.xlane.xlu0 %931 }
0x15cb   :  { %v934_v1 = vperm.slane %v932_v61, 0  ;;  %v935_v62 = vperm.slane %v932_v61, 1 }
0x15cd   :  { %v938_v63 = vsub.f32 %v917_v52, %v934_v1  ;;  %v939_v0 = vsub.f32 %v920_v54, %v935_v62 }
0x15cf   :  { %v940_v3 = vmul.f32 1.442695, %v938_v63  ;;  %v942_v4 = vmul.f32 1.442695, %v939_v0 }
0x15d1   :  { %2328 = vpow2.f32 %v940_v3 }
0x15d2   :  { %2330 = vpow2.f32 %v942_v4 }
0x15d7   :  { %v2329_v5 = vpop.eup %2328 }
0x15d8   :  { %v2331_v6 = vpop.eup %2330  ;;  %947 = vperm.xlu1 %2217, %v2329_v5  }
0x15d9   :  { %950 = vperm.xlu0 %2218, %v2331_v6  }
0x15e0   :  { %819 = vrot.lane.b32.xlu1 %v814_v7, %s2557_s3 }
0x160a   :  { %824 = vadd.xlane.f32.xlu1 %v823_v10 }
0x1623   :  { %1010 = vrot.lane.b32.xlu1 %v1008_v12, %s2557_s3 }
0x164a   :  { %v948_v13 = vpop.permute.xlu1 %947 }
0x164b   :  { %v951_v14 = vpop.permute.xlu0 %950  ;;  %v952_v15 = vperm.slane %v948_v13, %v2832_v51 }
0x164c   :  { %v953_v16 = vperm.slane %v951_v14, %v2832_v51 }
0x164e   :  { %v954_v18 = vsel %vm201_vm0, %v953_v16, %v952_v15 }
0x164f   :  { %v956_v20 = vsel %vm929_vm9, %v954_v18, 0.0 }
0x1650   :  { %957 = vadd.xlane.f32.xlu2 %v956_v20 }
0x1652   :  { %v820_v22 = vpop.permute.xlu1 %819 }
0x1653   :  { %v826_v19 = vsel %vm127_vm1, %v820_v22, 0.0 }
0x1654   :  { %827 = vadd.xlane.f32.xlu0 %v826_v19 }
0x1668   :  { %967 = vrot.lane.b32.xlu2 %v2224_v50, %s2559_s7 }
0x167d   :  { %v2851_v21 = vpop.xlane.xlu1 %824 }
0x1695   :  { %v1011_v25 = vpop.permute.xlu1 %1010 }
0x1696   :  { %2189 = vmatmul.msk.bf16.vlgmr.msra.gmra.mxu1 %vm127_vm1, %v1011_v25 }
0x16c3   :  { %v958_v26 = vpop.xlane.xlu2 %957 }
0x16c4   :  { %2332 = vrcp.f32 %v958_v26 }
0x16c7   :  { %v2862_v32 = vpop.xlane.xlu0 %827 }
0x16ca   :  { %v2333_v28 = vpop.eup %2332 }
0x16cb   :  { %v2854_v53 = vpop.permute.xlu2 %967  ;;  %v962_v2 = vperm.slane %v2333_v28, 1  ;;  %v961_v29 = vperm.slane %v2333_v28, 0 }
0x16cc   :  { %v970_v49 = vmul.f32 %v2854_v53, %v2817_v41 }
0x16cd   :  { %v2858_v30 = vmul.f32 %v2331_v6, %v962_v2  ;;  %v2860_v31 = vmul.f32 %v2329_v5, %v961_v29 }
0x16ce   :  { %972 = vrot.lane.b32.xlu1 %v970_v49, %s2557_s3 }
0x16cf   :  { %v980_v33 = vmul.f32 %v2858_v30, %v2862_v32  ;;  %v979_v34 = vmul.f32 %v2860_v31, %v2851_v21 }
0x16d1   :  { %987 = vperm.xlu2 %2219, %v980_v33   ;;  %984 = vperm.xlu0 %2218, %v979_v34  }
0x1713   :  { %v1024_v35 = vpop.f32.mrf.mxu1 }
0x171b   :  { %v1026_v37 = vpop.f32.mrf.mxu1 }
0x172b   :  { %v988_v39 = vpop.permute.xlu2 %987 }
0x172c   :  { %v990_v23 = vperm.slane %v988_v39, %v2832_v51 }
0x1740   :  { %v973_v36 = vpop.permute.xlu1 %972 }
0x1741   :  { %v976_v40 = vsel %vm975_vm10, %v973_v36, 0.0 }
0x1742   :  { %977 = vadd.xlane.f32.xlu2 %v976_v40 }
0x1743   :  { %v985_v41 = vpop.permute.xlu0 %984 }
0x1744   :  { %v989_v42 = vperm.slane %v985_v41, %v2832_v51 }
0x1746   :  { %v991_v17 = vsel %vm201_vm0, %v990_v23, %v989_v42 }
0x1747   :  { %v993_v43 = vsel %vm929_vm9, %v991_v17, 0.0 }
0x1748   :  { %994 = vadd.xlane.f32.xlu1 %v993_v43 }
0x17b5   :  { %v978_v45 = vpop.xlane.xlu2 %977 }
0x17bb   :  { %v995_v46 = vpop.xlane.xlu1 %994 }
0x17bc   :  { %v996_v47 = vadd.f32 %v995_v46, %v978_v45 }
0x17be   :  { %v2877_v48 = vadd.f32 %v2874_v44, %v996_v47 }
0x17c0   :  { %1003 = vperm.xlu0 %2218, %v2877_v48  }
0x1832   :  { %v1004_v50 = vpop.permute.xlu0 %1003 }
0x1833   :  { %v1006_v52 = vmul.f32 %v2801_v24, %v1004_v50 }
0x1835   :  { %v1007_v54 = vadd.f32 %v2807_v27, %v1006_v52 }
0x1837   :  { %v1028_v55 = vadd.f32 %v1024_v35, %v1007_v54 }
0x1839   :  { %2334 = vtanh.f32 %v1028_v55  ;;  %v1029_v57 = vmul.f32 0.5, %v1028_v55 }
0x183b   :  { %2336 = vtanh.f32 %v1029_v57 }
0x183f   :  { %v2335_v56 = vpop.eup %2334 }
0x1840   :  { %1036 = vrot.lane.b32.xlu0 %v2335_v56, %s2556_s12 }
0x1841   :  { %v2337_v58 = vpop.eup %2336 }
0x1842   :  { %v1031_v59 = vmul.f32 0.5, %v2337_v58 }
0x1844   :  { %v1032_v60 = vadd.f32 0.5, %v1031_v59 }
0x1846   :  { %v1034_v62 = vmul.f32 %v1032_v60, %v2813_v38 }
0x18b2   :  { %v1037_v61 = vpop.permute.xlu0 %1036 }
0x18b3   :  { %v1039_v1 = vmul.f32 %v1037_v61, %v1032_v60 }
0x18b5   :  { %1041 = vrot.lane.b32.xlu0 %v1039_v1, %s2557_s3 }
0x1927   :  { %v1042_v63 = vpop.permute.xlu0 %1041 }
0x1928   :  { %v2885_v0 = vadd.f32 %v1042_v63, %v1034_v62 }
0x192a   :  { %2338 = vtanh.f32 %v2885_v0 }
0x1930   :  { %v2339_v3 = vpop.eup %2338 }
0x1931   :  { %1047 = vrot.lane.b32.xlu0 %v2339_v3, %s2556_s12 }
0x19a3   :  { %v1048_v4 = vpop.permute.xlu0 %1047 }
0x19a4   :  { %v1050_v5 = vmul.f32 %v1048_v4, %v1032_v60 }
0x19a6   :  { %v1053_v6 = vperm.slane %v1050_v5, 0  ;;  %v1052_v7 = vrot.slane %v1050_v5, 1  ;;  %v1150_v36 = vpack.c.bf16 %v1050_v5, %v1050_v5  ;;  %v1116_v58 = vmul.f32 %v1050_v5, %v2854_v53 }
0x19a8   :  { %v1057_v8 = vmul.f32 %v1053_v6, %v2785_v9  ;;  %v1054_v10 = vperm.slane %v1052_v7, 0 }
0x19aa   :  { %1061 = vrot.lane.b32.xlu0 %v1057_v8, %s2557_s3  ;;  %v1058_v12 = vmul.f32 %v1054_v10, %v2789_v11 }
0x19ac   :  { %1063 = vrot.lane.b32.xlu2 %v1058_v12, %s2557_s3 }
0x1a06   :  { %v1064_v38 = vpop.permute.xlu2 %1063 }
0x1a07   :  { %v1070_v13 = vsel %vm127_vm1, %v1064_v38, 0.0 }
0x1a08   :  { %1071 = vadd.xlane.f32.xlu1 %v1070_v13 }
0x1a1c   :  { %v1062_v14 = vpop.permute.xlu0 %1061 }
0x1a1d   :  { %v1067_v15 = vsel %vm127_vm1, %v1062_v14, 0.0 }
0x1a1e   :  { %1068 = vadd.xlane.f32.xlu0 %v1067_v15 }
0x1a7b   :  { %v1072_v16 = vpop.xlane.xlu1 %1071 }
0x1a7c   :  { %v1076_v20 = vperm.slane %v1072_v16, %v2832_v51 }
0x1a91   :  { %v1069_v18 = vpop.xlane.xlu0 %1068 }
0x1a92   :  { %v1075_v22 = vperm.slane %v1069_v18, %v2832_v51 }
0x1a94   :  { %v1077_v19 = vsel %vm201_vm0, %v1076_v20, %v1075_v22 }
0x1a95   :  { %v1079_v25 = vsel %vm929_vm9, %v1077_v19, -inf }
0x1a96   :  { %1080 = vmax.xlane.f32.xlu1 %v1079_v25 }
0x1b09   :  { %v1081_v26 = vpop.xlane.xlu1 %1080 }
0x1b0a   :  { %v1083_v28 = vperm.slane %v1081_v26, 0  ;;  %v1084_v2 = vperm.slane %v1081_v26, 1 }
0x1b0c   :  { %v1087_v29 = vsub.f32 %v1069_v18, %v1083_v28  ;;  %v1088_v49 = vsub.f32 %v1072_v16, %v1084_v2 }
0x1b0e   :  { %v1089_v33 = vmul.f32 1.442695, %v1087_v29  ;;  %v1091_v34 = vmul.f32 1.442695, %v1088_v49 }
0x1b10   :  { %2340 = vpow2.f32 %v1089_v33 }
0x1b11   :  { %2342 = vpow2.f32 %v1091_v34 }
0x1b16   :  { %v2341_v35 = vpop.eup %2340 }
0x1b17   :  { %v2343_v37 = vpop.eup %2342  ;;  %1096 = vperm.xlu1 %2217, %v2341_v35  }
0x1b18   :  { %1099 = vperm.xlu2 %2219, %v2343_v37  }
0x1b1f   :  { %1152 = vrot.lane.b32.xlu1 %v1150_v36, %s2557_s3 }
0x1b72   :  { %v1100_v39 = vpop.permute.xlu2 %1099 }
0x1b73   :  { %v1102_v41 = vperm.slane %v1100_v39, %v2832_v51 }
0x1b89   :  { %v1097_v40 = vpop.permute.xlu1 %1096 }
0x1b8a   :  { %v1101_v23 = vperm.slane %v1097_v40, %v2832_v51 }
0x1b8c   :  { %v1103_v42 = vsel %vm201_vm0, %v1102_v41, %v1101_v23 }
0x1b8d   :  { %v1105_v17 = vsel %vm929_vm9, %v1103_v42, 0.0 }
0x1b8e   :  { %1106 = vadd.xlane.f32.xlu2 %v1105_v17 }
0x1b91   :  { %v1153_v43 = vpop.permute.xlu1 %1152 }
0x1b92   :  { %2190 = vmatmul.msk.bf16.vlgmr.msra.gmra.mxu2 %vm127_vm1, %v1153_v43 }
0x1c01   :  { %v1107_v45 = vpop.xlane.xlu2 %1106 }
0x1c02   :  { %2344 = vrcp.f32 %v1107_v45 }
0x1c08   :  { %v2345_v46 = vpop.eup %2344 }
0x1c09   :  { %v1110_v47 = vperm.slane %v2345_v46, 0  ;;  %v1111_v50 = vperm.slane %v2345_v46, 1 }
0x1c0b   :  { %v2905_v52 = vmul.f32 %v2343_v37, %v1111_v50  ;;  %v2907_v54 = vmul.f32 %v2341_v35, %v1110_v47 }
0x1c0d   :  { %v1125_v55 = vmul.f32 %v2905_v52, %v2862_v32  ;;  %v1124_v56 = vmul.f32 %v2907_v54, %v2851_v21 }
0x1c0f   :  { %1132 = vperm.xlu1 %2217, %v1125_v55   ;;  %1129 = vperm.xlu0 %2218, %v1124_v56  }
0x1c15   :  { %v1166_v57 = vpop.f32.mrf.mxu2 }
0x1c17   :  { %1118 = vrot.lane.b32.xlu1 %v1116_v58, %s2557_s3 }
0x1c1d   :  { %v1168_v59 = vpop.f32.mrf.mxu2 }
0x1c81   :  { %v1130_v60 = vpop.permute.xlu0 %1129  ;;  %v1133_v61 = vpop.permute.xlu1 %1132 }
0x1c82   :  { %v1134_v1 = vperm.slane %v1130_v60, %v2832_v51  ;;  %v1135_v62 = vperm.slane %v1133_v61, %v2832_v51 }
0x1c84   :  { %v1136_v63 = vsel %vm201_vm0, %v1135_v62, %v1134_v1 }
0x1c85   :  { %v1138_v3 = vsel %vm929_vm9, %v1136_v63, 0.0 }
0x1c86   :  { %1139 = vadd.xlane.f32.xlu1 %v1138_v3 }
0x1c89   :  { %v1119_v4 = vpop.permute.xlu1 %1118 }
0x1c8a   :  { %v1121_v6 = vsel %vm975_vm10, %v1119_v4, 0.0 }
0x1c8b   :  { %1122 = vadd.xlane.f32.xlu0 %v1121_v6 }
0x1cf9   :  { %v1140_v7 = vpop.xlane.xlu1 %1139 }
0x1cfe   :  { %v1123_v5 = vpop.xlane.xlu0 %1122 }
0x1cff   :  { %v1141_v8 = vadd.f32 %v1140_v7, %v1123_v5 }
0x1d01   :  { %v2921_v10 = vadd.f32 %v2874_v44, %v1141_v8 }
0x1d03   :  { %1145 = vperm.xlu2 %2219, %v2921_v10  }
0x1d5d   :  { %v1146_v12 = vpop.permute.xlu2 %1145 }
0x1d5e   :  { %v1148_v38 = vmul.f32 %v2801_v24, %v1146_v12 }
0x1d60   :  { %v1149_v13 = vadd.f32 %v2807_v27, %v1148_v38 }
0x1d62   :  { %v1170_v14 = vadd.f32 %v1166_v57, %v1149_v13 }
0x1d64   :  { %2346 = vtanh.f32 %v1170_v14  ;;  %v1171_v16 = vmul.f32 0.5, %v1170_v14 }
0x1d66   :  { %2348 = vtanh.f32 %v1171_v16 }
0x1d6a   :  { %v2347_v15 = vpop.eup %2346 }
0x1d6b   :  { %1178 = vrot.lane.b32.xlu2 %v2347_v15, %s2556_s12 }
0x1d6c   :  { %v2349_v18 = vpop.eup %2348 }
0x1d6d   :  { %v1173_v20 = vmul.f32 0.5, %v2349_v18 }
0x1d6f   :  { %v1174_v22 = vadd.f32 0.5, %v1173_v20 }
0x1d71   :  { %v1176_v26 = vmul.f32 %v1174_v22, %v2885_v0 }
0x1dc5   :  { %v1179_v19 = vpop.permute.xlu2 %1178 }
0x1dc6   :  { %v1181_v25 = vmul.f32 %v1179_v19, %v1174_v22 }
0x1dc8   :  { %1183 = vrot.lane.b32.xlu2 %v1181_v25, %s2557_s3 }
0x1e22   :  { %v1184_v28 = vpop.permute.xlu2 %1183 }
0x1e23   :  { %v2929_v2 = vadd.f32 %v1184_v28, %v1176_v26 }
0x1e25   :  { %2350 = vtanh.f32 %v2929_v2 }
0x1e2b   :  { %v2351_v29 = vpop.eup %2350 }
0x1e2c   :  { %1189 = vrot.lane.b32.xlu0 %v2351_v29, %s2556_s12 }
0x1e9e   :  { %v1190_v49 = vpop.permute.xlu0 %1189 }
0x1e9f   :  { %v1192_v33 = vmul.f32 %v1190_v49, %v1174_v22 }
0x1ea1   :  { %v1195_v34 = vperm.slane %v1192_v33, 0  ;;  %v1194_v35 = vrot.slane %v1192_v33, 1  ;;  %v1292_v62 = vpack.c.bf16 %v1192_v33, %v1192_v33  ;;  %v1258_v63 = vmul.f32 %v1192_v33, %v2854_v53 }
0x1ea3   :  { %v1199_v37 = vmul.f32 %v1195_v34, %v2785_v9  ;;  %v1196_v36 = vperm.slane %v1194_v35, 0 }
0x1ea5   :  { %1203 = vrot.lane.b32.xlu1 %v1199_v37, %s2557_s3  ;;  %v1200_v39 = vmul.f32 %v1196_v36, %v2789_v11 }
0x1ea7   :  { %1205 = vrot.lane.b32.xlu2 %v1200_v39, %s2557_s3 }
0x1f01   :  { %v1206_v0 = vpop.permute.xlu2 %1205 }
0x1f02   :  { %v1212_v40 = vsel %vm127_vm1, %v1206_v0, 0.0 }
0x1f03   :  { %1213 = vadd.xlane.f32.xlu0 %v1212_v40 }
0x1f17   :  { %v1204_v41 = vpop.permute.xlu1 %1203 }
0x1f18   :  { %v1209_v23 = vsel %vm127_vm1, %v1204_v41, 0.0 }
0x1f19   :  { %1210 = vadd.xlane.f32.xlu2 %v1209_v23 }
0x1f76   :  { %v1214_v42 = vpop.xlane.xlu0 %1213 }
0x1f77   :  { %v1218_v43 = vperm.slane %v1214_v42, %v2832_v51 }
0x1f8c   :  { %v1211_v17 = vpop.xlane.xlu2 %1210 }
0x1f8d   :  { %v1217_v45 = vperm.slane %v1211_v17, %v2832_v51 }
0x1f8f   :  { %v1219_v46 = vsel %vm201_vm0, %v1218_v43, %v1217_v45 }
0x1f90   :  { %v1221_v47 = vsel %vm929_vm9, %v1219_v46, -inf }
0x1f91   :  { %1222 = vmax.xlane.f32.xlu1 %v1221_v47 }
0x2004   :  { %v1223_v50 = vpop.xlane.xlu1 %1222 }
0x2005   :  { %v1225_v55 = vperm.slane %v1223_v50, 0  ;;  %v1226_v56 = vperm.slane %v1223_v50, 1 }
0x2007   :  { %v1229_v57 = vsub.f32 %v1211_v17, %v1225_v55  ;;  %v1230_v58 = vsub.f32 %v1214_v42, %v1226_v56 }
0x2009   :  { %v1231_v59 = vmul.f32 1.442695, %v1229_v57  ;;  %v1233_v60 = vmul.f32 1.442695, %v1230_v58 }
0x200b   :  { %2352 = vpow2.f32 %v1231_v59 }
0x200c   :  { %2354 = vpow2.f32 %v1233_v60 }
0x2011   :  { %v2353_v61 = vpop.eup %2352 }
0x2012   :  { %v2355_v1 = vpop.eup %2354  ;;  %1238 = vperm.xlu2 %2219, %v2353_v61  }
0x2013   :  { %1241 = vperm.xlu0 %2218, %v2355_v1  }
0x201a   :  { %1294 = vrot.lane.b32.xlu2 %v1292_v62, %s2557_s3 }
0x2022   :  { %1260 = vrot.lane.b32.xlu2 %v1258_v63, %s2557_s3 }
0x206c   :  { %v1239_v3 = vpop.permute.xlu2 %1238 }
0x206d   :  { %v1243_v7 = vperm.slane %v1239_v3, %v2832_v51 }
0x2074   :  { %v1295_v4 = vpop.permute.xlu2 %1294 }
0x2075   :  { %2191 = vmatmul.msk.bf16.vlgmr.msra.gmra.mxu3 %vm127_vm1, %v1295_v4 }
0x207c   :  { %v1261_v26 = vpop.permute.xlu2 %1260 }
0x207d   :  { %v1263_v28 = vsel %vm975_vm10, %v1261_v26, 0.0 }
0x2085   :  { %v1242_v6 = vpop.permute.xlu0 %1241 }
0x2086   :  { %v1244_v5 = vperm.slane %v1242_v6, %v2832_v51 }
0x2088   :  { %v1245_v8 = vsel %vm201_vm0, %v1244_v5, %v1243_v7 }
0x2089   :  { %v1247_v12 = vsel %vm929_vm9, %v1245_v8, 0.0 }
0x208a   :  { %1248 = vadd.xlane.f32.xlu1 %v1247_v12 }
0x20f8   :  { %v1308_v38 = vpop.f32.mrf.mxu3 }
0x20fd   :  { %v1249_v13 = vpop.xlane.xlu1 %1248 }
0x20fe   :  { %2356 = vrcp.f32 %v1249_v13 }
0x2100   :  { %v1310_v14 = vpop.f32.mrf.mxu3 }
0x2104   :  { %v2357_v15 = vpop.eup %2356 }
0x2105   :  { %v1252_v16 = vperm.slane %v2357_v15, 0  ;;  %v1253_v18 = vperm.slane %v2357_v15, 1 }
0x2107   :  { %v2951_v20 = vmul.f32 %v2355_v1, %v1253_v18  ;;  %v2953_v22 = vmul.f32 %v2353_v61, %v1252_v16 }
0x2109   :  { %v1267_v19 = vmul.f32 %v2951_v20, %v2862_v32  ;;  %v1266_v25 = vmul.f32 %v2953_v22, %v2851_v21 }
0x210b   :  { %1274 = vperm.xlu0 %2218, %v1267_v19   ;;  %1271 = vperm.xlu1 %2217, %v1266_v25  }
0x2135   :  { %1264 = vadd.xlane.f32.xlu0 %v1263_v28 }
0x217d   :  { %v1275_v29 = vpop.permute.xlu0 %1274  ;;  %v1272_v49 = vpop.permute.xlu1 %1271 }
0x217e   :  { %v1277_v33 = vperm.slane %v1275_v29, %v2832_v51  ;;  %v1276_v34 = vperm.slane %v1272_v49, %v2832_v51 }
0x2180   :  { %v1278_v35 = vsel %vm201_vm0, %v1277_v33, %v1276_v34 }
0x2181   :  { %v1280_v37 = vsel %vm929_vm9, %v1278_v35, 0.0 }
0x2182   :  { %1281 = vadd.xlane.f32.xlu2 %v1280_v37 }
0x21a8   :  { %v1265_v36 = vpop.xlane.xlu0 %1264 }
0x21f5   :  { %v1282_v39 = vpop.xlane.xlu2 %1281 }
0x21f6   :  { %v1283_v0 = vadd.f32 %v1282_v39, %v1265_v36 }
0x21f8   :  { %v2965_v40 = vadd.f32 %v2874_v44, %v1283_v0 }
0x21fa   :  { %1287 = vperm.xlu1 %2217, %v2965_v40  }
0x226c   :  { %v1288_v41 = vpop.permute.xlu1 %1287 }
0x226d   :  { %v1290_v23 = vmul.f32 %v2801_v24, %v1288_v41 }
0x226f   :  { %v1291_v42 = vadd.f32 %v2807_v27, %v1290_v23 }
0x2271   :  { %v1312_v17 = vadd.f32 %v1308_v38, %v1291_v42 }
0x2273   :  { %2358 = vtanh.f32 %v1312_v17  ;;  %v1313_v45 = vmul.f32 0.5, %v1312_v17 }
0x2275   :  { %2360 = vtanh.f32 %v1313_v45 }
0x2279   :  { %v2359_v43 = vpop.eup %2358 }
0x227a   :  { %1320 = vrot.lane.b32.xlu1 %v2359_v43, %s2556_s12 }
0x227b   :  { %v2361_v46 = vpop.eup %2360 }
0x227c   :  { %v1315_v47 = vmul.f32 0.5, %v2361_v46 }
0x227e   :  { %v1316_v50 = vadd.f32 0.5, %v1315_v47 }
0x2280   :  { %v1318_v57 = vmul.f32 %v1316_v50, %v2929_v2 }
0x22ec   :  { %v1321_v55 = vpop.permute.xlu1 %1320 }
0x22ed   :  { %v1323_v56 = vmul.f32 %v1321_v55, %v1316_v50 }
0x22ef   :  { %1325 = vrot.lane.b32.xlu1 %v1323_v56, %s2557_s3 }
0x2361   :  { %v1326_v58 = vpop.permute.xlu1 %1325 }
0x2362   :  { %v2973_v59 = vadd.f32 %v1326_v58, %v1318_v57 }
0x2364   :  { %2362 = vtanh.f32 %v2973_v59 }
0x236a   :  { %v2363_v60 = vpop.eup %2362 }
0x236b   :  { %1331 = vrot.lane.b32.xlu1 %v2363_v60, %s2556_s12 }
0x23dd   :  { %v1332_v61 = vpop.permute.xlu1 %1331 }
0x23de   :  { %v1334_v1 = vmul.f32 %v1332_v61, %v1316_v50 }
0x23e0   :  { %v1337_v62 = vperm.slane %v1334_v1, 0  ;;  %v1336_v63 = vrot.slane %v1334_v1, 1  ;;  %v1434_v35 = vpack.c.bf16 %v1334_v1, %v1334_v1  ;;  %v1400_v37 = vmul.f32 %v1334_v1, %v2854_v53 }
0x23e2   :  { %v1341_v3 = vmul.f32 %v1337_v62, %v2785_v9  ;;  %v1338_v4 = vperm.slane %v1336_v63, 0 }
0x23e4   :  { %1345 = vrot.lane.b32.xlu0 %v1341_v3, %s2557_s3  ;;  %v1342_v6 = vmul.f32 %v1338_v4, %v2789_v11 }
0x23e6   :  { %1347 = vrot.lane.b32.xlu2 %v1342_v6, %s2557_s3 }
0x2440   :  { %v1348_v2 = vpop.permute.xlu2 %1347 }
0x2441   :  { %v1354_v7 = vsel %vm127_vm1, %v1348_v2, 0.0 }
0x2442   :  { %1355 = vadd.xlane.f32.xlu0 %v1354_v7 }
0x2456   :  { %v1346_v5 = vpop.permute.xlu0 %1345 }
0x2457   :  { %v1351_v8 = vsel %vm127_vm1, %v1346_v5, 0.0 }
0x2458   :  { %1352 = vadd.xlane.f32.xlu1 %v1351_v8 }
0x24b5   :  { %v1356_v12 = vpop.xlane.xlu0 %1355 }
0x24b6   :  { %v1360_v13 = vperm.slane %v1356_v12, %v2832_v51 }
0x24cb   :  { %v1353_v38 = vpop.xlane.xlu1 %1352 }
0x24cc   :  { %v1359_v14 = vperm.slane %v1353_v38, %v2832_v51 }
0x24ce   :  { %v1361_v15 = vsel %vm201_vm0, %v1360_v13, %v1359_v14 }
0x24cf   :  { %v1363_v16 = vsel %vm929_vm9, %v1361_v15, -inf }
0x24d0   :  { %1364 = vmax.xlane.f32.xlu2 %v1363_v16 }
0x2543   :  { %v1365_v18 = vpop.xlane.xlu2 %1364 }
0x2544   :  { %v1367_v19 = vperm.slane %v1365_v18, 0  ;;  %v1368_v25 = vperm.slane %v1365_v18, 1 }
0x2546   :  { %v1371_v26 = vsub.f32 %v1353_v38, %v1367_v19  ;;  %v1372_v28 = vsub.f32 %v1356_v12, %v1368_v25 }
0x2548   :  { %v1373_v29 = vmul.f32 1.442695, %v1371_v26  ;;  %v1375_v49 = vmul.f32 1.442695, %v1372_v28 }
0x254a   :  { %2364 = vpow2.f32 %v1373_v29 }
0x254b   :  { %2366 = vpow2.f32 %v1375_v49 }
0x2550   :  { %v2365_v33 = vpop.eup %2364 }
0x2551   :  { %v2367_v34 = vpop.eup %2366  ;;  %1380 = vperm.xlu1 %2217, %v2365_v33  }
0x2552   :  { %1383 = vperm.xlu0 %2218, %v2367_v34  }
0x2559   :  { %1436 = vrot.lane.b32.xlu1 %v1434_v35, %s2557_s3 }
0x255a   :  { %1402 = vrot.lane.b32.xlu0 %v1400_v37, %s2557_s3 }
0x25c3   :  { %v1381_v36 = vpop.permute.xlu1 %1380 }
0x25c4   :  { %v1384_v39 = vpop.permute.xlu0 %1383  ;;  %v1385_v0 = vperm.slane %v1381_v36, %v2832_v51 }
0x25c5   :  { %v1386_v41 = vperm.slane %v1384_v39, %v2832_v51 }
0x25c7   :  { %v1387_v23 = vsel %vm201_vm0, %v1386_v41, %v1385_v0 }
0x25c8   :  { %v1389_v42 = vsel %vm929_vm9, %v1387_v23, 0.0 }
0x25c9   :  { %1390 = vadd.xlane.f32.xlu2 %v1389_v42 }
0x25cb   :  { %v1437_v17 = vpop.permute.xlu1 %1436 }
0x25cc   :  { %2192 = vmatmul.msk.bf16.vlgmr.msrb.gmra.mxu0 %vm127_vm1, %v1437_v17  ;;  %v1403_v61 = vpop.permute.xlu0 %1402 }
0x25cd   :  { %v1405_v1 = vsel %vm975_vm10, %v1403_v61, 0.0 }
0x263c   :  { %v1391_v43 = vpop.xlane.xlu2 %1390 }
0x263d   :  { %2368 = vrcp.f32 %v1391_v43 }
0x2643   :  { %v2369_v45 = vpop.eup %2368 }
0x2644   :  { %v1394_v46 = vperm.slane %v2369_v45, 0  ;;  %v1395_v47 = vperm.slane %v2369_v45, 1 }
0x2646   :  { %v2995_v50 = vmul.f32 %v2367_v34, %v1395_v47  ;;  %v2997_v55 = vmul.f32 %v2365_v33, %v1394_v46 }
0x2648   :  { %v1409_v56 = vmul.f32 %v2995_v50, %v2862_v32  ;;  %v1408_v57 = vmul.f32 %v2997_v55, %v2851_v21 }
0x2649   :  { %v1450_v58 = vpop.f32.mrf.mxu0 }
0x264a   :  { %1416 = vperm.xlu1 %2217, %v1409_v56   ;;  %1413 = vperm.xlu2 %2219, %v1408_v57  }
0x2651   :  { %v1452_v60 = vpop.f32.mrf.mxu0 }
0x2674   :  { %1406 = vadd.xlane.f32.xlu1 %v1405_v1 }
0x26a4   :  { %v1414_v62 = vpop.permute.xlu2 %1413 }
0x26a5   :  { %v1418_v3 = vperm.slane %v1414_v62, %v2832_v51 }
0x26bc   :  { %v1417_v63 = vpop.permute.xlu1 %1416 }
0x26bd   :  { %v1419_v4 = vperm.slane %v1417_v63, %v2832_v51 }
0x26bf   :  { %v1420_v6 = vsel %vm201_vm0, %v1419_v4, %v1418_v3 }
0x26c0   :  { %v1422_v2 = vsel %vm929_vm9, %v1420_v6, 0.0 }
0x26c1   :  { %1423 = vadd.xlane.f32.xlu0 %v1422_v2 }
0x26e7   :  { %v1407_v7 = vpop.xlane.xlu1 %1406 }
0x2734   :  { %v1424_v5 = vpop.xlane.xlu0 %1423 }
0x2735   :  { %v1425_v8 = vadd.f32 %v1424_v5, %v1407_v7 }
0x2737   :  { %v3009_v12 = vadd.f32 %v2874_v44, %v1425_v8 }
0x2739   :  { %1429 = vperm.xlu2 %2219, %v3009_v12  }
0x2793   :  { %v1430_v38 = vpop.permute.xlu2 %1429 }
0x2794   :  { %v1432_v13 = vmul.f32 %v2801_v24, %v1430_v38 }
0x2796   :  { %v1433_v14 = vadd.f32 %v2807_v27, %v1432_v13 }
0x2798   :  { %v1454_v15 = vadd.f32 %v1450_v58, %v1433_v14 }
0x279a   :  { %2370 = vtanh.f32 %v1454_v15  ;;  %v1455_v18 = vmul.f32 0.5, %v1454_v15 }
0x279c   :  { %2372 = vtanh.f32 %v1455_v18 }
0x27a0   :  { %v2371_v16 = vpop.eup %2370 }
0x27a1   :  { %1462 = vrot.lane.b32.xlu2 %v2371_v16, %s2556_s12 }
0x27a2   :  { %v2373_v19 = vpop.eup %2372 }
0x27a3   :  { %v1457_v25 = vmul.f32 0.5, %v2373_v19 }
0x27a5   :  { %v1458_v26 = vadd.f32 0.5, %v1457_v25 }
0x27a7   :  { %v1460_v49 = vmul.f32 %v1458_v26, %v2973_v59 }
0x27fb   :  { %v1463_v28 = vpop.permute.xlu2 %1462 }
0x27fc   :  { %v1465_v29 = vmul.f32 %v1463_v28, %v1458_v26 }
0x27fe   :  { %1467 = vrot.lane.b32.xlu2 %v1465_v29, %s2557_s3 }
0x2858   :  { %v1468_v33 = vpop.permute.xlu2 %1467 }
0x2859   :  { %v3017_v24 = vadd.f32 %v1468_v33, %v1460_v49 }
0x285b   :  { %2374 = vtanh.f32 %v3017_v24 }
0x2861   :  { %v2375_v34 = vpop.eup %2374 }
0x2862   :  { %1473 = vrot.lane.b32.xlu2 %v2375_v34, %s2556_s12 }
0x28bc   :  { %v1474_v35 = vpop.permute.xlu2 %1473 }
0x28bd   :  { %v1476_v37 = vmul.f32 %v1474_v35, %v1458_v26 }
0x28bf   :  { %v1479_v36 = vperm.slane %v1476_v37, 0  ;;  %v1478_v39 = vrot.slane %v1476_v37, 1  ;;  %v1576_v7 = vpack.c.bf16 %v1476_v37, %v1476_v37  ;;  %v1542_v35 = vmul.f32 %v1476_v37, %v2854_v53 }
0x28c1   :  { %v1483_v0 = vmul.f32 %v1479_v36, %v2785_v9  ;;  %v1480_v41 = vperm.slane %v1478_v39, 0 }
0x28c3   :  { %1487 = vrot.lane.b32.xlu1 %v1483_v0, %s2557_s3  ;;  %v1484_v23 = vmul.f32 %v1480_v41, %v2789_v11 }
0x28c5   :  { %1489 = vrot.lane.b32.xlu2 %v1484_v23, %s2557_s3 }
0x291f   :  { %v1490_v59 = vpop.permute.xlu2 %1489 }
0x2920   :  { %v1496_v42 = vsel %vm127_vm1, %v1490_v59, 0.0 }
0x2921   :  { %1497 = vadd.xlane.f32.xlu2 %v1496_v42 }
0x2935   :  { %v1488_v17 = vpop.permute.xlu1 %1487 }
0x2936   :  { %v1493_v43 = vsel %vm127_vm1, %v1488_v17, 0.0 }
0x2937   :  { %1494 = vadd.xlane.f32.xlu0 %v1493_v43 }
0x2994   :  { %v1498_v45 = vpop.xlane.xlu2 %1497 }
0x2995   :  { %v1502_v47 = vperm.slane %v1498_v45, %v2832_v51 }
0x29aa   :  { %v1495_v46 = vpop.xlane.xlu0 %1494 }
0x29ab   :  { %v1501_v56 = vperm.slane %v1495_v46, %v2832_v51 }
0x29ad   :  { %v1503_v57 = vsel %vm201_vm0, %v1502_v47, %v1501_v56 }
0x29ae   :  { %v1505_v58 = vsel %vm929_vm9, %v1503_v57, -inf  ;;  %v3059_v57 = vld [vmem:[%s3257_s4] ss:$0 sm:$0xff] }
0x29af   :  { %1506 = vmax.xlane.f32.xlu0 %v1505_v58 }
0x2a22   :  { %v1507_v60 = vpop.xlane.xlu0 %1506 }
0x2a23   :  { %v1509_v61 = vperm.slane %v1507_v60, 0  ;;  %v1510_v1 = vperm.slane %v1507_v60, 1 }
0x2a25   :  { %v1513_v62 = vsub.f32 %v1495_v46, %v1509_v61  ;;  %v1514_v63 = vsub.f32 %v1498_v45, %v1510_v1 }
0x2a27   :  { %v1515_v3 = vmul.f32 1.442695, %v1513_v62  ;;  %v1517_v4 = vmul.f32 1.442695, %v1514_v63 }
0x2a29   :  { %2376 = vpow2.f32 %v1515_v3 }
0x2a2a   :  { %2378 = vpow2.f32 %v1517_v4 }
0x2a2f   :  { %v2377_v6 = vpop.eup %2376 }
0x2a30   :  { %v2379_v2 = vpop.eup %2378  ;;  %1522 = vperm.xlu0 %2218, %v2377_v6  }
0x2a31   :  { %1525 = vperm.xlu1 %2217, %v2379_v2  }
0x2a38   :  { %1578 = vrot.lane.b32.xlu0 %v1576_v7, %s2557_s3 }
0x2aa2   :  { %v1523_v5 = vpop.permute.xlu0 %1522 }
0x2aa3   :  { %v1526_v8 = vpop.permute.xlu1 %1525  ;;  %v1527_v38 = vperm.slane %v1523_v5, %v2832_v51 }
0x2aa4   :  { %v1528_v13 = vperm.slane %v1526_v8, %v2832_v51 }
0x2aa6   :  { %v1529_v14 = vsel %vm201_vm0, %v1528_v13, %v1527_v38 }
0x2aa7   :  { %v1531_v15 = vsel %vm929_vm9, %v1529_v14, 0.0 }
0x2aa8   :  { %1532 = vadd.xlane.f32.xlu1 %v1531_v15 }
0x2aaa   :  { %v1579_v16 = vpop.permute.xlu0 %1578 }
0x2aab   :  { %2193 = vmatmul.msk.bf16.vlgmr.msrb.gmra.mxu1 %vm127_vm1, %v1579_v16 }
0x2b1b   :  { %v1533_v18 = vpop.xlane.xlu1 %1532 }
0x2b1c   :  { %2380 = vrcp.f32 %v1533_v18 }
0x2b22   :  { %v2381_v19 = vpop.eup %2380 }
0x2b23   :  { %v1536_v25 = vperm.slane %v2381_v19, 0  ;;  %v1537_v26 = vperm.slane %v2381_v19, 1 }
0x2b25   :  { %v3037_v28 = vmul.f32 %v2379_v2, %v1537_v26  ;;  %v3039_v29 = vmul.f32 %v2377_v6, %v1536_v25 }
0x2b27   :  { %v1551_v49 = vmul.f32 %v3037_v28, %v2862_v32  ;;  %v1550_v33 = vmul.f32 %v3039_v29, %v2851_v21 }
0x2b28   :  { %v1592_v34 = vpop.f32.mrf.mxu1 }
0x2b29   :  { %1558 = vperm.xlu2 %2219, %v1551_v49   ;;  %1555 = vperm.xlu0 %2218, %v1550_v33  }
0x2b30   :  { %v1594_v36 = vpop.f32.mrf.mxu1 }
0x2b31   :  { %1544 = vrot.lane.b32.xlu0 %v1542_v35, %s2557_s3 }
0x2b83   :  { %v1559_v39 = vpop.permute.xlu2 %1558 }
0x2b84   :  { %v1561_v41 = vperm.slane %v1559_v39, %v2832_v51 }
0x2b9b   :  { %v1556_v0 = vpop.permute.xlu0 %1555 }
0x2b9c   :  { %v1560_v23 = vperm.slane %v1556_v0, %v2832_v51 }
0x2b9e   :  { %v1562_v59 = vsel %vm201_vm0, %v1561_v41, %v1560_v23 }
0x2b9f   :  { %v1564_v42 = vsel %vm929_vm9, %v1562_v59, 0.0 }
0x2ba0   :  { %1565 = vadd.xlane.f32.xlu1 %v1564_v42 }
0x2ba3   :  { %v1545_v17 = vpop.permute.xlu0 %1544 }
0x2ba4   :  { %v1547_v43 = vsel %vm975_vm10, %v1545_v17, 0.0 }
0x2ba5   :  { %1548 = vadd.xlane.f32.xlu0 %v1547_v43 }
0x2c13   :  { %v1566_v45 = vpop.xlane.xlu1 %1565 }
0x2c18   :  { %v1549_v37 = vpop.xlane.xlu0 %1548 }
0x2c19   :  { %v1567_v46 = vadd.f32 %v1566_v45, %v1549_v37 }
0x2c1b   :  { %v3053_v47 = vadd.f32 %v2874_v44, %v1567_v46 }
0x2c1d   :  { %1571 = vperm.xlu2 %2219, %v3053_v47  }
0x2c77   :  { %v1572_v56 = vpop.permute.xlu2 %1571 }
0x2c78   :  { %v1574_v58 = vmul.f32 %v3059_v57, %v1572_v56 }
0x2c7a   :  { %v1575_v60 = vadd.f32 %v2807_v27, %v1574_v58 }
0x2c7c   :  { %v1596_v61 = vadd.f32 %v1592_v34, %v1575_v60 }
0x2c7e   :  { %2382 = vtanh.f32 %v1596_v61  ;;  %v1597_v62 = vmul.f32 0.5, %v1596_v61 }
0x2c80   :  { %2384 = vtanh.f32 %v1597_v62 }
0x2c84   :  { %v2383_v1 = vpop.eup %2382 }
0x2c85   :  { %1604 = vrot.lane.b32.xlu1 %v2383_v1, %s2556_s12 }
0x2c86   :  { %v2385_v63 = vpop.eup %2384 }
0x2c87   :  { %v1599_v3 = vmul.f32 0.5, %v2385_v63 }
0x2c89   :  { %v1600_v4 = vadd.f32 0.5, %v1599_v3 }
0x2c8b   :  { %v1602_v7 = vmul.f32 %v1600_v4, %v3017_v24 }
0x2cf7   :  { %v1605_v6 = vpop.permute.xlu1 %1604 }
0x2cf8   :  { %v1607_v2 = vmul.f32 %v1605_v6, %v1600_v4 }
0x2cfa   :  { %1609 = vrot.lane.b32.xlu2 %v1607_v2, %s2557_s3 }
0x2d54   :  { %v1610_v5 = vpop.permute.xlu2 %1609 }
0x2d55   :  { %v3066_v8 = vadd.f32 %v1610_v5, %v1602_v7 }
0x2d57   :  { %2386 = vtanh.f32 %v3066_v8 }
0x2d5d   :  { %v2387_v27 = vpop.eup %2386 }
0x2d5e   :  { %1615 = vrot.lane.b32.xlu2 %v2387_v27, %s2556_s12 }
0x2db8   :  { %v1616_v38 = vpop.permute.xlu2 %1615 }
0x2db9   :  { %v1618_v13 = vmul.f32 %v1616_v38, %v1600_v4 }
0x2dbb   :  { %v1620_v14 = vrot.slane %v1618_v13, 1  ;;  %v1621_v15 = vperm.slane %v1618_v13, 0  ;;  %v1718_v56 = vpack.c.bf16 %v1618_v13, %v1618_v13  ;;  %v1684_v58 = vmul.f32 %v1618_v13, %v2854_v53 }
0x2dbd   :  { %v1622_v16 = vperm.slane %v1620_v14, 0  ;;  %v1625_v18 = vmul.f32 %v1621_v15, %v2785_v9 }
0x2dbf   :  { %1629 = vrot.lane.b32.xlu2 %v1625_v18, %s2557_s3  ;;  %v1626_v19 = vmul.f32 %v1622_v16, %v2789_v11 }
0x2dc1   :  { %1631 = vrot.lane.b32.xlu0 %v1626_v19, %s2557_s3 }
0x2e19   :  { %v1630_v24 = vpop.permute.xlu2 %1629 }
0x2e1a   :  { %v1635_v25 = vsel %vm127_vm1, %v1630_v24, 0.0 }
0x2e1b   :  { %1636 = vadd.xlane.f32.xlu1 %v1635_v25 }
0x2e33   :  { %v1632_v26 = vpop.permute.xlu0 %1631 }
0x2e34   :  { %v1638_v49 = vsel %vm127_vm1, %v1632_v26, 0.0 }
0x2e35   :  { %1639 = vadd.xlane.f32.xlu2 %v1638_v49 }
0x2e8e   :  { %v1637_v33 = vpop.xlane.xlu1 %1636 }
0x2e8f   :  { %v1643_v35 = vperm.slane %v1637_v33, %v2832_v51 }
0x2ea8   :  { %v1640_v34 = vpop.xlane.xlu2 %1639 }
0x2ea9   :  { %v1644_v36 = vperm.slane %v1640_v34, %v2832_v51 }
0x2eab   :  { %v1645_v39 = vsel %vm201_vm0, %v1644_v36, %v1643_v35 }
0x2eac   :  { %v1647_v0 = vsel %vm929_vm9, %v1645_v39, -inf }
0x2ead   :  { %1648 = vmax.xlane.f32.xlu0 %v1647_v0 }
0x2f20   :  { %v1649_v41 = vpop.xlane.xlu0 %1648 }
0x2f21   :  { %v1651_v23 = vperm.slane %v1649_v41, 0  ;;  %v1652_v59 = vperm.slane %v1649_v41, 1 }
0x2f23   :  { %v1655_v42 = vsub.f32 %v1637_v33, %v1651_v23  ;;  %v1656_v17 = vsub.f32 %v1640_v34, %v1652_v59  ;;  %v3109_v59 = vld [vmem:[%s3259_s6] ss:$0 sm:$0xff]  ;;  %s2560_s6 = smov 1  }
0x2f25   :  { %v1657_v43 = vmul.f32 1.442695, %v1655_v42  ;;  %v1659_v45 = vmul.f32 1.442695, %v1656_v17 }
0x2f27   :  { %2388 = vpow2.f32 %v1657_v43 }
0x2f28   :  { %2390 = vpow2.f32 %v1659_v45 }
0x2f2d   :  { %v2389_v37 = vpop.eup %2388 }
0x2f2e   :  { %v2391_v46 = vpop.eup %2390  ;;  %1664 = vperm.xlu2 %2219, %v2389_v37  }
0x2f2f   :  { %1667 = vperm.xlu1 %2217, %v2391_v46  }
0x2f36   :  { %1720 = vrot.lane.b32.xlu2 %v1718_v56, %s2557_s3 }
0x2f3e   :  { %1686 = vrot.lane.b32.xlu2 %v1684_v58, %s2557_s3 }
0x2f88   :  { %v1665_v60 = vpop.permute.xlu2 %1664 }
0x2f89   :  { %v1669_v62 = vperm.slane %v1665_v60, %v2832_v51 }
0x2f90   :  { %v1721_v61 = vpop.permute.xlu2 %1720 }
0x2f91   :  { %2194 = vmatmul.msk.bf16.vlgmr.msrb.gmra.mxu2 %vm127_vm1, %v1721_v61 }
0x2f98   :  { %v1687_v18 = vpop.permute.xlu2 %1686 }
0x2f99   :  { %v1689_v19 = vsel %vm975_vm10, %v1687_v18, 0.0 }
0x2fa1   :  { %v1668_v1 = vpop.permute.xlu1 %1667 }
0x2fa2   :  { %v1670_v63 = vperm.slane %v1668_v1, %v2832_v51 }
0x2fa4   :  { %v1671_v3 = vsel %vm201_vm0, %v1670_v63, %v1669_v62 }
0x2fa5   :  { %v1673_v4 = vsel %vm929_vm9, %v1671_v3, 0.0 }
0x2fa6   :  { %1674 = vadd.xlane.f32.xlu0 %v1673_v4 }
0x3014   :  { %v1734_v6 = vpop.f32.mrf.mxu2 }
0x3019   :  { %v1675_v2 = vpop.xlane.xlu0 %1674 }
0x301a   :  { %2392 = vrcp.f32 %v1675_v2 }
0x301c   :  { %v1736_v7 = vpop.f32.mrf.mxu2 }
0x3020   :  { %v2393_v5 = vpop.eup %2392 }
0x3021   :  { %v1678_v27 = vperm.slane %v2393_v5, 0  ;;  %v1679_v38 = vperm.slane %v2393_v5, 1 }
0x3023   :  { %v3088_v13 = vmul.f32 %v2391_v46, %v1679_v38  ;;  %v3090_v14 = vmul.f32 %v2389_v37, %v1678_v27 }
0x3025   :  { %v1693_v15 = vmul.f32 %v3088_v13, %v2862_v32  ;;  %v1692_v16 = vmul.f32 %v3090_v14, %v2851_v21 }
0x3027   :  { %1700 = vperm.xlu0 %2218, %v1693_v15   ;;  %1697 = vperm.xlu1 %2217, %v1692_v16  }
0x3051   :  { %1690 = vadd.xlane.f32.xlu1 %v1689_v19 }
0x3099   :  { %v1701_v24 = vpop.permute.xlu0 %1700  ;;  %v1698_v25 = vpop.permute.xlu1 %1697 }
0x309a   :  { %v1703_v26 = vperm.slane %v1701_v24, %v2832_v51  ;;  %v1702_v49 = vperm.slane %v1698_v25, %v2832_v51 }
0x309c   :  { %v1704_v33 = vsel %vm201_vm0, %v1703_v26, %v1702_v49 }
0x309d   :  { %v1706_v34 = vsel %vm929_vm9, %v1704_v33, 0.0 }
0x309e   :  { %1707 = vadd.xlane.f32.xlu2 %v1706_v34 }
0x30c4   :  { %v1691_v35 = vpop.xlane.xlu1 %1690 }
0x3111   :  { %v1708_v36 = vpop.xlane.xlu2 %1707 }
0x3112   :  { %v1709_v39 = vadd.f32 %v1708_v36, %v1691_v35 }
0x3114   :  { %v3102_v0 = vadd.f32 %v2874_v44, %v1709_v39 }
0x3116   :  { %1713 = vperm.xlu0 %2218, %v3102_v0  }
0x3188   :  { %v1714_v41 = vpop.permute.xlu0 %1713 }
0x3189   :  { %v1716_v23 = vmul.f32 %v3059_v57, %v1714_v41 }
0x318b   :  { %v1717_v42 = vadd.f32 %v3109_v59, %v1716_v23 }
0x318d   :  { %v1738_v17 = vadd.f32 %v1734_v6, %v1717_v42 }
0x318f   :  { %2394 = vtanh.f32 %v1738_v17  ;;  %v1739_v45 = vmul.f32 0.5, %v1738_v17 }
0x3191   :  { %2396 = vtanh.f32 %v1739_v45 }
0x3195   :  { %v2395_v43 = vpop.eup %2394 }
0x3196   :  { %1746 = vrot.lane.b32.xlu0 %v2395_v43, %s2556_s12 }
0x3197   :  { %v2397_v44 = vpop.eup %2396 }
0x3198   :  { %v1741_v37 = vmul.f32 0.5, %v2397_v44 }
0x319a   :  { %v1742_v46 = vadd.f32 0.5, %v1741_v37 }
0x319c   :  { %v1744_v60 = vmul.f32 %v1742_v46, %v3066_v8 }
0x3208   :  { %v1747_v56 = vpop.permute.xlu0 %1746 }
0x3209   :  { %v1749_v58 = vmul.f32 %v1747_v56, %v1742_v46 }
0x320b   :  { %1751 = vrot.lane.b32.xlu0 %v1749_v58, %s2557_s3 }
0x327d   :  { %v1752_v61 = vpop.permute.xlu0 %1751 }
0x327e   :  { %v3115_v1 = vadd.f32 %v1752_v61, %v1744_v60 }
0x3280   :  { %2398 = vtanh.f32 %v3115_v1 }
0x3286   :  { %v2399_v62 = vpop.eup %2398 }
0x3287   :  { %1757 = vrot.lane.b32.xlu0 %v2399_v62, %s2556_s12 }
0x32f9   :  { %v1758_v63 = vpop.permute.xlu0 %1757 }
0x32fa   :  { %v1760_v3 = vmul.f32 %v1758_v63, %v1742_v46 }
0x32fc   :  { %v1762_v4 = vrot.slane %v1760_v3, 1  ;;  %v1763_v6 = vperm.slane %v1760_v3, 0  ;;  %v1860_v17 = vpack.c.bf16 %v1760_v3, %v1760_v3 }
0x32fe   :  { %v1764_v2 = vperm.slane %v1762_v4, 0  ;;  %v1767_v7 = vmul.f32 %v1763_v6, %v2785_v9 }
0x3300   :  { %1771 = vrot.lane.b32.xlu1 %v1767_v7, %s2557_s3  ;;  %v1768_v5 = vmul.f32 %v1764_v2, %v2789_v11 }
0x3302   :  { %1773 = vrot.lane.b32.xlu0 %v1768_v5, %s2557_s3 }
0x3372   :  { %v1772_v8 = vpop.permute.xlu1 %1771 }
0x3373   :  { %v1777_v27 = vsel %vm127_vm1, %v1772_v8, 0.0 }
0x3374   :  { %1778 = vadd.xlane.f32.xlu2 %v1777_v27  ;;  %v1774_v38 = vpop.permute.xlu0 %1773  ;;  %v1826_v27 = vmul.f32 %v1760_v3, %v2854_v53 }
0x3375   :  { %v1780_v15 = vsel %vm127_vm1, %v1774_v38, 0.0 }
0x3376   :  { %1781 = vadd.xlane.f32.xlu0 %v1780_v15 }
0x33e7   :  { %v1779_v16 = vpop.xlane.xlu2 %1778 }
0x33e8   :  { %v1785_v19 = vperm.slane %v1779_v16, %v2832_v51 }
0x33e9   :  { %v1782_v18 = vpop.xlane.xlu0 %1781 }
0x33ea   :  { %v1786_v24 = vperm.slane %v1782_v18, %v2832_v51 }
0x33ec   :  { %v1787_v25 = vsel %vm201_vm0, %v1786_v24, %v1785_v19 }
0x33ed   :  { %v1789_v26 = vsel %vm929_vm9, %v1787_v25, -inf }
0x33ee   :  { %1790 = vmax.xlane.f32.xlu2 %v1789_v26 }
0x3461   :  { %v1791_v49 = vpop.xlane.xlu2 %1790 }
0x3462   :  { %v1793_v33 = vperm.slane %v1791_v49, 0  ;;  %v1794_v34 = vperm.slane %v1791_v49, 1 }
0x3464   :  { %v1797_v35 = vsub.f32 %v1779_v16, %v1793_v33  ;;  %v1798_v36 = vsub.f32 %v1782_v18, %v1794_v34  ;;  %v3150_v34 = vld [vmem:[#allocation2] ss:$0 sm:$0xff] }
0x3466   :  { %v1799_v39 = vmul.f32 1.442695, %v1797_v35  ;;  %v1801_v41 = vmul.f32 1.442695, %v1798_v36 }
0x3468   :  { %2400 = vpow2.f32 %v1799_v39 }
0x3469   :  { %2402 = vpow2.f32 %v1801_v41 }
0x346e   :  { %v2401_v23 = vpop.eup %2400 }
0x346f   :  { %v2403_v42 = vpop.eup %2402  ;;  %1806 = vperm.xlu2 %2219, %v2401_v23  }
0x3470   :  { %1809 = vperm.xlu1 %2217, %v2403_v42  }
0x3477   :  { %1862 = vrot.lane.b32.xlu2 %v1860_v17, %s2557_s3 }
0x34c9   :  { %v1807_v43 = vpop.permute.xlu2 %1806 }
0x34ca   :  { %v1811_v37 = vperm.slane %v1807_v43, %v2832_v51 }
0x34d1   :  { %v1863_v45 = vpop.permute.xlu2 %1862 }
0x34d2   :  { %2195 = vmatmul.msk.bf16.vlgmr.msrb.gmra.mxu3 %vm127_vm1, %v1863_v45 }
0x34e2   :  { %v1810_v44 = vpop.permute.xlu1 %1809 }
0x34e3   :  { %v1812_v46 = vperm.slane %v1810_v44, %v2832_v51 }
0x34e5   :  { %v1813_v56 = vsel %vm201_vm0, %v1812_v46, %v1811_v37 }
0x34e6   :  { %v1815_v58 = vsel %vm929_vm9, %v1813_v56, 0.0 }
0x34e7   :  { %1816 = vadd.xlane.f32.xlu1 %v1815_v58 }
0x3555   :  { %v1876_v60 = vpop.f32.mrf.mxu3 }
0x355a   :  { %v1817_v61 = vpop.xlane.xlu1 %1816 }
0x355b   :  { %2404 = vrcp.f32 %v1817_v61 }
0x355d   :  { %v1878_v62 = vpop.f32.mrf.mxu3 }
0x3561   :  { %v2405_v63 = vpop.eup %2404 }
0x3562   :  { %v1820_v4 = vperm.slane %v2405_v63, 0  ;;  %v1821_v6 = vperm.slane %v2405_v63, 1 }
0x3564   :  { %v3135_v2 = vmul.f32 %v2403_v42, %v1821_v6  ;;  %v3137_v7 = vmul.f32 %v2401_v23, %v1820_v4 }
0x3566   :  { %v1835_v5 = vmul.f32 %v3135_v2, %v2862_v32  ;;  %v1834_v8 = vmul.f32 %v3137_v7, %v2851_v21 }
0x3568   :  { %1842 = vperm.xlu2 %2219, %v1835_v5   ;;  %1839 = vperm.xlu0 %2218, %v1834_v8  }
0x3570   :  { %1828 = vrot.lane.b32.xlu2 %v1826_v27, %s2557_s3 }
0x35c2   :  { %v1843_v38 = vpop.permute.xlu2 %1842 }
0x35c3   :  { %v1845_v19 = vperm.slane %v1843_v38, %v2832_v51 }
0x35ca   :  { %v1829_v15 = vpop.permute.xlu2 %1828 }
0x35cb   :  { %v1831_v16 = vsel %vm975_vm10, %v1829_v15, 0.0 }
0x35cc   :  { %1832 = vadd.xlane.f32.xlu2 %v1831_v16 }
0x35da   :  { %v1840_v18 = vpop.permute.xlu0 %1839 }
0x35db   :  { %v1844_v24 = vperm.slane %v1840_v18, %v2832_v51 }
0x35dd   :  { %v1846_v25 = vsel %vm201_vm0, %v1845_v19, %v1844_v24 }
0x35de   :  { %v1848_v26 = vsel %vm929_vm9, %v1846_v25, 0.0 }
0x35df   :  { %1849 = vadd.xlane.f32.xlu0 %v1848_v26 }
0x363f   :  { %v1833_v49 = vpop.xlane.xlu2 %1832 }
0x3652   :  { %v1850_v33 = vpop.xlane.xlu0 %1849 }
0x3653   :  { %v1851_v3 = vadd.f32 %v1850_v33, %v1833_v49 }
0x3655   :  { %v3153_v35 = vadd.f32 %v3150_v34, %v1851_v3 }
0x3657   :  { %1855 = vperm.xlu1 %2217, %v3153_v35  }
0x36c9   :  { %v1856_v36 = vpop.permute.xlu1 %1855 }
0x36ca   :  { %v1858_v39 = vmul.f32 %v3059_v57, %v1856_v36 }
0x36cc   :  { %v1859_v41 = vadd.f32 %v3109_v59, %v1858_v39 }
0x36ce   :  { %v1880_v23 = vadd.f32 %v1876_v60, %v1859_v41 }
0x36d0   :  { %2406 = vtanh.f32 %v1880_v23  ;;  %v1881_v17 = vmul.f32 0.5, %v1880_v23 }
0x36d2   :  { %2408 = vtanh.f32 %v1881_v17 }
0x36d6   :  { %v2407_v42 = vpop.eup %2406 }
0x36d7   :  { %1888 = vrot.lane.b32.xlu1 %v2407_v42, %s2556_s12 }
0x36d8   :  { %v2409_v43 = vpop.eup %2408 }
0x36d9   :  { %v1883_v45 = vmul.f32 0.5, %v2409_v43 }
0x36db   :  { %v1884_v44 = vadd.f32 0.5, %v1883_v45 }
0x36dd   :  { %v1886_v56 = vmul.f32 %v1884_v44, %v3115_v1 }
0x3749   :  { %v1889_v37 = vpop.permute.xlu1 %1888 }
0x374a   :  { %v1891_v46 = vmul.f32 %v1889_v37, %v1884_v44 }
0x374c   :  { %1893 = vrot.lane.b32.xlu1 %v1891_v46, %s2557_s3 }
0x37be   :  { %v1894_v58 = vpop.permute.xlu1 %1893 }
0x37bf   :  { %v1896_v57 = vadd.f32 %v1894_v58, %v1886_v56 }
0x37c1   :  { %2410 = vtanh.f32 %v1896_v57 }
0x37c7   :  { %v2411_v59 = vpop.eup %2410 }
0x37c8   :  { %1899 = vrot.lane.b32.xlu2 %v2411_v59, %s2556_s12  ;;  %s2568_s12 = smov [#allocation10]  }
0x3822   :  { %v1900_v60 = vpop.permute.xlu2 %1899 }
0x3823   :  { %v1902_v61 = vmul.f32 %v1900_v60, %v1884_v44 }
0x3825   :  { %v1904_v62 = vrot.slane %v1902_v61, 1  ;;  %v1905_v63 = vperm.slane %v1902_v61, 0  ;;  %v1968_v37 = vmul.f32 %v1902_v61, %v2854_v53 }
0x3827   :  { %v1906_v4 = vperm.slane %v1904_v62, 0  ;;  %v1909_v6 = vmul.f32 %v1905_v63, %v2785_v9 }
0x3829   :  { %1913 = vrot.lane.b32.xlu0 %v1909_v6, %s2557_s3  ;;  %v1910_v5 = vmul.f32 %v1906_v4, %v2789_v11 }
0x382b   :  { %1915 = vrot.lane.b32.xlu1 %v1910_v5, %s2557_s3 }
0x389b   :  { %v1914_v1 = vpop.permute.xlu0 %1913 }
0x389c   :  { %v1919_v8 = vsel %vm127_vm1, %v1914_v1, 0.0 }
0x389d   :  { %1920 = vadd.xlane.f32.xlu1 %v1919_v8  ;;  %v1916_v27 = vpop.permute.xlu1 %1915 }
0x389e   :  { %v1922_v38 = vsel %vm127_vm1, %v1916_v27, 0.0  ;;  %vm2142_vm1 = vcmask 64512  }
0x389f   :  { %1923 = vadd.xlane.f32.xlu2 %v1922_v38 }
0x3910   :  { %v1921_v15 = vpop.xlane.xlu1 %1920 }
0x3911   :  { %v1927_v18 = vperm.slane %v1921_v15, %v2832_v51 }
0x3912   :  { %v1924_v16 = vpop.xlane.xlu2 %1923 }
0x3913   :  { %v1928_v9 = vperm.slane %v1924_v16, %v2832_v51 }
0x3915   :  { %v1929_v19 = vsel %vm201_vm0, %v1928_v9, %v1927_v18 }
0x3916   :  { %v1931_v11 = vsel %vm929_vm9, %v1929_v19, -inf }
0x3917   :  { %1932 = vmax.xlane.f32.xlu0 %v1931_v11 }
0x398a   :  { %v1933_v24 = vpop.xlane.xlu0 %1932 }
0x398b   :  { %v1935_v25 = vperm.slane %v1933_v24, 0  ;;  %v1936_v26 = vperm.slane %v1933_v24, 1 }
0x398d   :  { %v1939_v49 = vsub.f32 %v1921_v15, %v1935_v25  ;;  %v1940_v33 = vsub.f32 %v1924_v16, %v1936_v26 }
0x398f   :  { %v1941_v3 = vmul.f32 1.442695, %v1939_v49  ;;  %v1943_v36 = vmul.f32 1.442695, %v1940_v33 }
0x3991   :  { %2412 = vpow2.f32 %v1941_v3 }
0x3992   :  { %2414 = vpow2.f32 %v1943_v36 }
0x3997   :  { %v2413_v39 = vpop.eup %2412 }
0x3998   :  { %v2415_v41 = vpop.eup %2414  ;;  %1948 = vperm.xlu1 %2217, %v2413_v39  }
0x3999   :  { %1951 = vperm.xlu2 %2219, %v2415_v41  }
0x39f3   :  { %v1952_v23 = vpop.permute.xlu2 %1951 }
0x39f4   :  { %v1954_v17 = vperm.slane %v1952_v23, %v2832_v51 }
0x3a0a   :  { %v1949_v42 = vpop.permute.xlu1 %1948 }
0x3a0b   :  { %v1953_v43 = vperm.slane %v1949_v42, %v2832_v51 }
0x3a0d   :  { %v1955_v45 = vsel %vm201_vm0, %v1954_v17, %v1953_v43 }
0x3a0e   :  { %v1957_v44 = vsel %vm929_vm9, %v1955_v45, 0.0 }
0x3a0f   :  { %1958 = vadd.xlane.f32.xlu0 %v1957_v44 }
0x3a23   :  { %1970 = vrot.lane.b32.xlu0 %v1968_v37, %s2557_s3  ;;  %s2160_s3 = sshll.u32 %s2568_s12, 4  ;;  %s2161_s3 = int_to_ptr.vmem [resolvable:$true] %s2160_s3 }
0x3a82   :  { %v1959_v46 = vpop.xlane.xlu0 %1958 }
0x3a83   :  { %2416 = vrcp.f32 %v1959_v46 }
0x3a89   :  { %v2417_v56 = vpop.eup %2416 }
0x3a8a   :  { %v1962_v58 = vperm.slane %v2417_v56, 0  ;;  %v1963_v57 = vperm.slane %v2417_v56, 1 }
0x3a8c   :  { %v1967_v59 = vmul.f32 %v2415_v41, %v1963_v57  ;;  %v3178_v60 = vmul.f32 %v2413_v39, %v1962_v58 }
0x3a8e   :  { %v1977_v62 = vmul.f32 %v1967_v59, %v2862_v32  ;;  %v1976_v63 = vmul.f32 %v3178_v60, %v2851_v21 }
0x3a90   :  { %1984 = vperm.xlu0 %2218, %v1977_v62   ;;  %1981 = vperm.xlu2 %2219, %v1976_v63  }
0x3a95   :  { %v1971_v4 = vpop.permute.xlu0 %1970 }
0x3a96   :  { %v1973_v53 = vsel %vm975_vm10, %v1971_v4, 0.0 }
0x3a97   :  { %1974 = vadd.xlane.f32.xlu1 %v1973_v53 }
0x3a98   :  { %1995 = vrot.lane.b32.xlu0 %v2921_v10, %s2560_s6  ;;  %2062 = vperm.xlu2 %2219, %v2951_v20  }
0x3aa0   :  { %1998 = vrot.lane.b32.xlu0 %v2965_v40, %s2561_s8  ;;  %2083 = vperm.xlu2 %2219, %v3039_v29  }
0x3aa8   :  { %2001 = vrot.lane.b32.xlu0 %v3009_v12, %s2562_s25  ;;  %2098 = vperm.xlu2 %2219, %v3088_v13  }
0x3ab0   :  { %2007 = vrot.lane.b32.xlu0 %v3102_v0, %s2563_s26  ;;  %2004 = vrot.lane.b32.xlu1 %v3053_v47, %s2564_s2 }
0x3ab8   :  { %2010 = vrot.lane.b32.xlu0 %v3153_v35, %s2565_s27  ;;  %2038 = vperm.xlu1 %2217, %v2858_v30  }
0x3ac0   :  { %2035 = vperm.xlu0 %2218, %v2860_v31   ;;  %2050 = vperm.xlu1 %2217, %v2905_v52  }
0x3ac8   :  { %2047 = vperm.xlu0 %2218, %v2907_v54   ;;  %2071 = vperm.xlu1 %2217, %v2997_v55  }
0x3ad0   :  { %2059 = vperm.xlu0 %2218, %v2953_v22   ;;  %2086 = vperm.xlu1 %2217, %v3037_v28  }
0x3ad8   :  { %2074 = vperm.xlu0 %2218, %v2995_v50   ;;  %2107 = vperm.xlu1 %2217, %v3137_v7  }
0x3ae0   :  { %2095 = vperm.xlu0 %2218, %v3090_v14   ;;  %2122 = vperm.xlu1 %2217, %v1967_v59  }
0x3ae8   :  { %2110 = vperm.xlu0 %2218, %v3135_v2  }
0x3aea   :  { %v1982_v21 = vpop.permute.xlu2 %1981 }
0x3aeb   :  { %v1986_v31 = vperm.slane %v1982_v21, %v2832_v51 }
0x3af2   :  { %v2063_v61 = vpop.permute.xlu2 %2062 }
0x3af3   :  { %v2065_v41 = vperm.slane %v2063_v61, %v2832_v51 }
0x3afa   :  { %v2084_v27 = vpop.permute.xlu2 %2083 }
0x3afb   :  { %v2088_v18 = vperm.slane %v2084_v27, %v2832_v51 }
0x3b02   :  { %v1985_v30 = vpop.permute.xlu0 %1984  ;;  %v2099_v37 = vpop.permute.xlu2 %2098 }
0x3b03   :  { %v1987_v32 = vperm.slane %v1985_v30, %v2832_v51  ;;  %v2101_v57 = vperm.slane %v2099_v37, %v2832_v51 }
0x3b05   :  { %v1988_v52 = vsel %vm201_vm0, %v1987_v32, %v1986_v31  ;;  %vm2027_vm0 = vcmask 48128  }
0x3b06   :  { %v1990_v54 = vsel %vm929_vm9, %v1988_v52, 0.0 }
0x3b07   :  { %1991 = vadd.xlane.f32.xlu2 %v1990_v54 }
0x3b0a   :  { %v1996_v10 = vpop.permute.xlu0 %1995  ;;  %v1975_v50 = vpop.xlane.xlu1 %1974 }
0x3b0b   :  { %v2018_v20 = vsel %vm2017_vm11, %v2877_v48, %v1996_v10 }
0x3b12   :  { %v1999_v22 = vpop.permute.xlu0 %1998 }
0x3b13   :  { %v2020_v40 = vsel %vm2019_vm12, %v2018_v20, %v1999_v22 }
0x3b1a   :  { %v2002_v55 = vpop.permute.xlu0 %2001 }
0x3b1b   :  { %v2022_v12 = vsel %vm2021_vm13, %v2020_v40, %v2002_v55 }
0x3b22   :  { %v2005_v28 = vpop.permute.xlu1 %2004  ;;  %v2008_v29 = vpop.permute.xlu0 %2007 }
0x3b23   :  { %v2024_v47 = vsel %vm2023_vm14, %v2022_v12, %v2005_v28 }
0x3b24   :  { %v2026_v13 = vsel %vm2025_vm15, %v2024_v47, %v2008_v29 }
0x3b2a   :  { %v2039_v14 = vpop.permute.xlu1 %2038  ;;  %v2011_v0 = vpop.permute.xlu0 %2010 }
0x3b2b   :  { %v2028_v2 = vsel %vm2027_vm0, %v2026_v13, %v2011_v0  ;;  %v2041_v33 = vperm.slane %v2039_v14, %v2832_v51 }
0x3b32   :  { %v2051_v7 = vpop.permute.xlu1 %2050  ;;  %v2036_v35 = vpop.permute.xlu0 %2035 }
0x3b33   :  { %v2040_v6 = vperm.slane %v2036_v35, %v2832_v51  ;;  %v2053_v26 = vperm.slane %v2051_v7, %v2832_v51 }
0x3b35   :  { %v2129_v3 = vsel %vm787_vm2, %v2041_v33, %v2053_v26 }
0x3b36   :  { %v2131_v17 = vsel %vm790_vm3, %v2129_v3, %v2065_v41 }
0x3b3a   :  { %v2048_v48 = vpop.permute.xlu0 %2047  ;;  %v2072_v5 = vpop.permute.xlu1 %2071 }
0x3b3b   :  { %v2052_v1 = vperm.slane %v2048_v48, %v2832_v51  ;;  %v2076_v16 = vperm.slane %v2072_v5, %v2832_v51 }
0x3b3d   :  { %v2128_v8 = vsel %vm787_vm2, %v2040_v6, %v2052_v1  ;;  %vm2029_vm2 = vcmask 56320  }
0x3b42   :  { %v2060_v38 = vpop.permute.xlu0 %2059  ;;  %v2087_v9 = vpop.permute.xlu1 %2086 }
0x3b43   :  { %v2064_v15 = vperm.slane %v2060_v38, %v2832_v51  ;;  %v2089_v46 = vperm.slane %v2087_v9, %v2832_v51 }
0x3b45   :  { %v2130_v19 = vsel %vm790_vm3, %v2128_v8, %v2064_v15 }
0x3b46   :  { %v2132_v11 = vsel %vm793_vm4, %v2130_v19, %v2076_v16 }
0x3b47   :  { %v2134_v24 = vsel %vm796_vm5, %v2132_v11, %v2088_v18 }
0x3b4a   :  { %v2075_v25 = vpop.permute.xlu0 %2074  ;;  %v2108_v49 = vpop.permute.xlu1 %2107 }
0x3b4b   :  { %v2077_v36 = vperm.slane %v2075_v25, %v2832_v51  ;;  %v2112_v42 = vperm.slane %v2108_v49, %v2832_v51 }
0x3b4d   :  { %v2133_v45 = vsel %vm793_vm4, %v2131_v17, %v2077_v36 }
0x3b4e   :  { %v2135_v56 = vsel %vm796_vm5, %v2133_v45, %v2089_v46 }
0x3b4f   :  { %v2137_v4 = vsel %vm799_vm6, %v2135_v56, %v2101_v57 }
0x3b52   :  { %v2096_v39 = vpop.permute.xlu0 %2095  ;;  %v2123_v58 = vpop.permute.xlu1 %2122 }
0x3b53   :  { %v2100_v23 = vperm.slane %v2096_v39, %v2832_v51  ;;  %v2125_v63 = vperm.slane %v2123_v58, %v2832_v51 }
0x3b55   :  { %v2136_v43 = vsel %vm799_vm6, %v2134_v24, %v2100_v23 }
0x3b56   :  { %v2138_v44 = vsel %vm802_vm7, %v2136_v43, %v2112_v42 }
0x3b5a   :  { %v2111_v59 = vpop.permute.xlu0 %2110 }
0x3b5b   :  { %v2113_v62 = vperm.slane %v2111_v59, %v2832_v51 }
0x3b5d   :  { %v2139_v53 = vsel %vm802_vm7, %v2137_v4, %v2113_v62 }
0x3b5e   :  { %v2141_v21 = vsel %vm805_vm8, %v2139_v53, %v2125_v63 }
0x3b5f   :  { %2144 = vst.msk [vmem:[#allocation10 + $0x8] sm:$0xff] %vm2142_vm1, %v2141_v21 }
0x3b7a   :  { %v1992_v30 = vpop.xlane.xlu2 %1991 }
0x3b7b   :  { %v1993_v31 = vadd.f32 %v1992_v30, %v1975_v50 }
0x3b7d   :  { %v1994_v32 = vadd.f32 %v3150_v34, %v1993_v31 }
0x3b7f   :  { %2014 = vrot.lane.b32.xlu2 %v1994_v32, %s2566_s28 }
0x3b87   :  { %2119 = vperm.xlu2 %2219, %v3178_v60  }
0x3bd9   :  { %v2015_v52 = vpop.permute.xlu2 %2014 }
0x3bda   :  { %v2030_v54 = vsel %vm2029_vm2, %v2028_v2, %v2015_v52 }
0x3bdb   :  { %2031 = vst.msk [vmem:[#allocation9] sm:$0x3] %vm929_vm9, %v2030_v54 }
0x3bdc   :  { %2155 = dma.vmem_to_hbm [thread:$0]  %s2151_s1, 32, %s2153_s11, [#allocation5]  }
0x3be1   :  { %v2120_v34 = vpop.permute.xlu2 %2119 }
0x3be2   :  { %v2124_v60 = vperm.slane %v2120_v34, %v2832_v51 }
0x3be4   :  { %v2140_v10 = vsel %vm805_vm8, %v2138_v44, %v2124_v60 }
0x3be5   :  { %2143 = vst.msk [vmem:[#allocation10] sm:$0xff] %vm2142_vm1, %v2140_v10 }
0x3be6   :  { %2168 = dma.vmem_to_hbm [thread:$0]  %s2161_s3, 256, %s2163_s15, [#allocation11], %s2551_s23, %s2551_s23, %s2552_s24  }
0x3be7   :  { %2546 = dma.done.wait [#allocation5], 32  }
0x3be8   :  { %2547 = vsyncadd [#allocation5], 4294967264 }
0x3be9   :  { %2548 = dma.done.wait [#allocation11], 256  }
0x3bea   :  { %2549 = vsyncadd [#allocation11], 4294967040 }
0x3beb   :  { %2177 = vsyncpa [#allocation4], 1 }
0x3bec   :  { %2178 = vsyncpa [#allocation7], 1 }
0x3bed   :  { %2179 = vsyncpa [#allocation5], 1 }
0x3bee   :  { %2180 = vsyncpa [#allocation11], 1 }

</bundles_post_ra>
